<compile_context>
chip_gen: v5e
topology: v5e:2x2
jax: 0.10.0
libtpu: 0.0.40
codegen_flags: <defaults>
</compile_context>

<pallas_src>
import functools

import jax
import jax.numpy as jnp
from jax.experimental import pallas as pl
from jax.experimental.pallas import tpu as pltpu

EPS = 1e-5  # layer_norm_eps default of nn.TransformerEncoderLayer / nn.LayerNorm


# ----------------------------- fused kernel --------------------------------


def fused_transformer_kernel(
    x_ref,                               # (B, T, E)   f32
    wqkv_ref, bqkv_ref,                  # (L, E, 3E)  bf16 / (L, 1, 3E) f32
    wo_ref, bo_ref,                      # (L, E, E)   bf16 / (L, 1, E)  f32
    g1_ref, bt1_ref,                     # (L, 1, E)   f32
    w1_ref, b1_ref,                      # (L, E, F)   bf16 / (L, 1, F)  f32
    w2_ref, b2_ref,                      # (L, F, E)   bf16 / (L, 1, E)  f32
    g2_ref, bt2_ref,                     # (L, 1, E)   f32
    gf_ref, btf_ref,                     # (1, E)      f32
    wf_ref, bf_ref,                      # (E, V)      bf16 / (1, V)     f32
    o_ref,                               # (B, T, V)   f32
    *, n_heads, n_layers):
    B, T, E = x_ref.shape
    V = o_ref.shape[-1]
    M = B * T
    d_h = E // n_heads
    scale = 1.0 / float(d_h) ** 0.5

    def layer_norm(y, gain, bias):
        # fused one-pass stats: var = E[y^2] - mu^2
        mu = jnp.mean(y, axis=-1, keepdims=True)
        var = jnp.mean(y * y, axis=-1, keepdims=True) - mu * mu
        return (y - mu) * jax.lax.rsqrt(var + EPS) * gain + bias

    # flatten tokens: all token-wise matmuls run with M = B*T rows
    x = x_ref[...].reshape(M, E)                                   # f32

    for l in range(n_layers):                                      # static (L=2)
        # ---------------- self-attention sub-layer (post-norm) -------------
        qkv = jnp.dot(x.astype(jnp.bfloat16), wqkv_ref[l],
                      preferred_element_type=jnp.float32) + bqkv_ref[l]   # (M, 3E)
        q = (qkv[:, :E] * scale).reshape(B, T, E).astype(jnp.bfloat16)
        k = qkv[:, E:2 * E].reshape(B, T, E).astype(jnp.bfloat16)
        v = qkv[:, 2 * E:].reshape(B, T, E).astype(jnp.bfloat16)

        wo_l = wo_ref[l]                                           # (E, E) bf16
        attn = jnp.zeros((M, E), jnp.float32)
        for h in range(n_heads):                                   # static (H=4)
            sl = slice(h * d_h, (h + 1) * d_h)
            # batched over B, feature axis contracted directly (no kh.T)
            s = jnp.einsum('btd,bsd->bts', q[:, :, sl], k[:, :, sl],
                           preferred_element_type=jnp.float32)     # (B, T, T)
            s = s - jnp.max(s, axis=-1, keepdims=True)
            p = jnp.exp(s)
            p = p * pl.reciprocal(jnp.sum(p, axis=-1, keepdims=True),
                                  approx=True)
            ctx = jnp.einsum('bts,bsd->btd', p.astype(jnp.bfloat16),
                             v[:, :, sl],
                             preferred_element_type=jnp.float32)   # (B, T, d_h)
            # accumulate through the matching slice of Wo -> no concat needed
            attn = attn + jnp.dot(ctx.reshape(M, d_h).astype(jnp.bfloat16),
                                  wo_l[sl, :],
                                  preferred_element_type=jnp.float32)
        y = x + attn + bo_ref[l]                                   # residual
        x = layer_norm(y, g1_ref[l], bt1_ref[l])

        # ---------------- feed-forward sub-layer (post-norm) ---------------
        h1 = jnp.dot(x.astype(jnp.bfloat16), w1_ref[l],
                     preferred_element_type=jnp.float32) + b1_ref[l]
        h1 = jnp.maximum(h1, 0.0)                                  # ReLU
        y2 = jnp.dot(h1.astype(jnp.bfloat16), w2_ref[l],
                     preferred_element_type=jnp.float32) + b2_ref[l]
        x = layer_norm(x + y2, g2_ref[l], bt2_ref[l])

    # ---------------- final LayerNorm + vocab head --------------------------
    xn = layer_norm(x, gf_ref[...], btf_ref[...])
    logits = jnp.dot(xn.astype(jnp.bfloat16), wf_ref[...],
                     preferred_element_type=jnp.float32) + bf_ref[...]
    o_ref[...] = logits.reshape(B, T, V)


# ----------------------------- wrapper --------------------------------------


_WEIGHT_NAMES = ("wqkv", "bqkv", "wo", "bo", "g1", "bt1",
                 "w1", "b1", "w2", "b2", "g2", "bt2",
                 "g_f", "bt_f", "wf", "bf")


def simple_transformer_forward(tokens, params):
    B, T = tokens.shape
    # Embedding gather + positional embedding: plain-JAX glue.
    x = jnp.take(params["embed"], tokens, axis=0) + params["pos_embed"][:, :T, :]
    x = x.astype(jnp.float32)

    weights = [params[n] for n in _WEIGHT_NAMES]
    V = params["wf"].shape[-1]

    kern = functools.partial(fused_transformer_kernel,
                             n_heads=params["n_heads"],
                             n_layers=params["n_layers"])
    vmem_specs = [pl.BlockSpec(memory_space=pltpu.MemorySpace.VMEM)
                  for _ in range(1 + len(weights))]
    return pl.pallas_call(
        kern,
        out_shape=jax.ShapeDtypeStruct((B, T, V), jnp.float32),
        in_specs=vmem_specs,
        out_specs=pl.BlockSpec(memory_space=pltpu.MemorySpace.VMEM),
    )(x, *weights)


# ----------------------------- params --------------------------------------


def init_params(key, vocab_size, embed_dim, block_size, n_heads, n_layers, dim_ff):
    std = 0.02
    keys = iter(jax.random.split(key, 32))

    def nrm(shape, dtype=jnp.float32):
        return (std * jax.random.normal(next(keys), shape,
                                        dtype=jnp.float32)).astype(dtype)

    L, E, F, Vv = n_layers, embed_dim, dim_ff, vocab_size
    return {
        "n_heads": n_heads,
        "n_layers": n_layers,
        "embed": nrm((Vv, E)),
        # matches nn.Parameter(torch.zeros(1, block_size, embed_dim))
        "pos_embed": jnp.zeros((1, block_size, E), jnp.float32),
        # per-layer weights stacked on leading layer axis; MXU matrices in bf16
        "wqkv": nrm((L, E, 3 * E), jnp.bfloat16),   # in_proj, transposed
        "bqkv": nrm((L, 1, 3 * E)),
        "wo":   nrm((L, E, E), jnp.bfloat16),       # out_proj, transposed
        "bo":   nrm((L, 1, E)),
        "g1":   jnp.ones((L, 1, E), jnp.float32),
        "bt1":  jnp.zeros((L, 1, E), jnp.float32),
        "w1":   nrm((L, E, F), jnp.bfloat16),       # linear1, transposed
        "b1":   nrm((L, 1, F)),
        "w2":   nrm((L, F, E), jnp.bfloat16),       # linear2, transposed
        "b2":   nrm((L, 1, E)),
        "g2":   jnp.ones((L, 1, E), jnp.float32),
        "bt2":  jnp.zeros((L, 1, E), jnp.float32),
        # final LayerNorm + fc
        "g_f":  jnp.ones((1, E), jnp.float32),
        "bt_f": jnp.zeros((1, E), jnp.float32),
        "wf":   nrm((E, Vv), jnp.bfloat16),
        "bf":   nrm((1, Vv)),
    }


# ----------------------------- main ----------------------------------------


if __name__ == "__main__":
    vocab_size = 256
    embed_dim = 128      # module default
    block_size = 128     # module default
    n_heads = 4          # module default
    n_layers = 2         # module default
    dim_ff = 2048        # nn.TransformerEncoderLayer default dim_feedforward
    B, T = 2, 8          # small example shapes

    key = jax.random.PRNGKey(0)
    pkey, tkey = jax.random.split(key)
    params = init_params(pkey, vocab_size, embed_dim, block_size, n_heads,
                         n_layers, dim_ff)
    tokens = jax.random.randint(tkey, (B, T), 0, vocab_size, dtype=jnp.int32)

    logits = simple_transformer_forward(tokens, params)
    jax.block_until_ready(logits)

    assert logits.shape == (B, T, vocab_size), logits.shape
    assert bool(jnp.all(jnp.isfinite(logits)))
    print("KERNEL_OK")
</pallas_src>

<mosaic_0001>
module attributes {stable_mosaic.version = 11 : i64} {
  func.func @fused_transformer_kernel(%arg0: memref<2x8x128xf32, #tpu.memory_space<vmem>>, %arg1: memref<2x128x384xbf16, #tpu.memory_space<vmem>>, %arg2: memref<2x1x384xf32, #tpu.memory_space<vmem>>, %arg3: memref<2x128x128xbf16, #tpu.memory_space<vmem>>, %arg4: memref<2x1x128xf32, #tpu.memory_space<vmem>>, %arg5: memref<2x1x128xf32, #tpu.memory_space<vmem>>, %arg6: memref<2x1x128xf32, #tpu.memory_space<vmem>>, %arg7: memref<2x128x2048xbf16, #tpu.memory_space<vmem>>, %arg8: memref<2x1x2048xf32, #tpu.memory_space<vmem>>, %arg9: memref<2x2048x128xbf16, #tpu.memory_space<vmem>>, %arg10: memref<2x1x128xf32, #tpu.memory_space<vmem>>, %arg11: memref<2x1x128xf32, #tpu.memory_space<vmem>>, %arg12: memref<2x1x128xf32, #tpu.memory_space<vmem>>, %arg13: memref<1x128xf32, #tpu.memory_space<vmem>>, %arg14: memref<1x128xf32, #tpu.memory_space<vmem>>, %arg15: memref<128x256xbf16, #tpu.memory_space<vmem>>, %arg16: memref<1x256xf32, #tpu.memory_space<vmem>>, %arg17: memref<2x8x256xf32, #tpu.memory_space<vmem>>) attributes {dimension_semantics = [], scalar_prefetch = 0 : i64, scratch_operands = 0 : i64, tpu.core_type = #tpu.core_type<tc>} {
    %c0 = arith.constant 0 : index
    %c0_0 = arith.constant 0 : index
    %c0_1 = arith.constant 0 : index
    %0 = vector.load %arg0[%c0, %c0_0, %c0_1] : memref<2x8x128xf32, #tpu.memory_space<vmem>>, vector<2x8x128xf32>
    %1 = vector.shape_cast %0 : vector<2x8x128xf32> to vector<16x128xf32>
    %2 = arith.truncf %1 : vector<16x128xf32> to vector<16x128xbf16>
    %c0_2 = arith.constant 0 : index
    %c0_3 = arith.constant 0 : index
    %c0_4 = arith.constant 0 : index
    %3 = vector.load %arg1[%c0_2, %c0_3, %c0_4] : memref<2x128x384xbf16, #tpu.memory_space<vmem>>, vector<1x128x384xbf16>
    %4 = vector.shape_cast %3 : vector<1x128x384xbf16> to vector<128x384xbf16>
    %cst = arith.constant dense<0.000000e+00> : vector<16x384xf32>
    %5 = tpu.matmul %2, %4, %cst {dimension_numbers = #tpu.dot_dimension_numbers<[1], [0], [0], [1], [0, 0, 1, 1], [], []>} : vector<16x128xbf16>, vector<128x384xbf16>, vector<16x384xf32> -> vector<16x384xf32>
    %c0_5 = arith.constant 0 : index
    %c0_6 = arith.constant 0 : index
    %c0_7 = arith.constant 0 : index
    %6 = vector.load %arg2[%c0_5, %c0_6, %c0_7] : memref<2x1x384xf32, #tpu.memory_space<vmem>>, vector<1x1x384xf32>
    %7 = vector.shape_cast %6 : vector<1x1x384xf32> to vector<1x384xf32>
    %8 = vector.broadcast %7 : vector<1x384xf32> to vector<16x384xf32>
    %9 = arith.addf %5, %8 : vector<16x384xf32>
    %10 = vector.extract_strided_slice %9 {offsets = [0, 0], sizes = [16, 128], strides = [1, 1]} : vector<16x384xf32> to vector<16x128xf32>
    %cst_8 = arith.constant 0.176776692 : f32
    %11 = vector.broadcast %cst_8 : f32 to vector<16x128xf32>
    %12 = arith.mulf %10, %11 : vector<16x128xf32>
    %13 = vector.shape_cast %12 : vector<16x128xf32> to vector<2x8x128xf32>
    %14 = arith.truncf %13 : vector<2x8x128xf32> to vector<2x8x128xbf16>
    %15 = vector.extract_strided_slice %9 {offsets = [0, 128], sizes = [16, 128], strides = [1, 1]} : vector<16x384xf32> to vector<16x128xf32>
    %16 = vector.shape_cast %15 : vector<16x128xf32> to vector<2x8x128xf32>
    %17 = arith.truncf %16 : vector<2x8x128xf32> to vector<2x8x128xbf16>
    %18 = vector.extract_strided_slice %9 {offsets = [0, 256], sizes = [16, 128], strides = [1, 1]} : vector<16x384xf32> to vector<16x128xf32>
    %19 = vector.shape_cast %18 : vector<16x128xf32> to vector<2x8x128xf32>
    %20 = arith.truncf %19 : vector<2x8x128xf32> to vector<2x8x128xbf16>
    %c0_9 = arith.constant 0 : index
    %c0_10 = arith.constant 0 : index
    %c0_11 = arith.constant 0 : index
    %21 = vector.load %arg3[%c0_9, %c0_10, %c0_11] : memref<2x128x128xbf16, #tpu.memory_space<vmem>>, vector<1x128x128xbf16>
    %22 = vector.shape_cast %21 : vector<1x128x128xbf16> to vector<128x128xbf16>
    %cst_12 = arith.constant 0.000000e+00 : f32
    %23 = vector.broadcast %cst_12 : f32 to vector<16x128xf32>
    %24 = vector.extract_strided_slice %14 {offsets = [0, 0, 0], sizes = [2, 8, 32], strides = [1, 1, 1]} : vector<2x8x128xbf16> to vector<2x8x32xbf16>
    %25 = vector.extract_strided_slice %17 {offsets = [0, 0, 0], sizes = [2, 8, 32], strides = [1, 1, 1]} : vector<2x8x128xbf16> to vector<2x8x32xbf16>
    "tpu.trace_start"() <{level = 10 : i32, message = "btd,bsd->bts"}> : () -> ()
    %cst_13 = arith.constant dense<0.000000e+00> : vector<2x8x8xf32>
    %26 = tpu.matmul %24, %25, %cst_13 {dimension_numbers = #tpu.dot_dimension_numbers<[2], [2], [1], [1], [0, 0, 0, 1, 1, 1], [0], [0]>} : vector<2x8x32xbf16>, vector<2x8x32xbf16>, vector<2x8x8xf32> -> vector<2x8x8xf32>
    "tpu.trace_stop"() : () -> ()
    %cst_14 = arith.constant dense<0xFF800000> : vector<2x8xf32>
    %27 = vector.multi_reduction <maximumf>, %26, %cst_14 [2] : vector<2x8x8xf32> to vector<2x8xf32>
    %28 = vector.shape_cast %27 : vector<2x8xf32> to vector<2x8x1xf32>
    %29 = vector.broadcast %28 : vector<2x8x1xf32> to vector<2x8x8xf32>
    %30 = arith.subf %26, %29 : vector<2x8x8xf32>
    %31 = math.exp %30 : vector<2x8x8xf32>
    %cst_15 = arith.constant dense<0.000000e+00> : vector<2x8xf32>
    %32 = vector.multi_reduction <add>, %31, %cst_15 [2] : vector<2x8x8xf32> to vector<2x8xf32>
    %33 = vector.shape_cast %32 : vector<2x8xf32> to vector<2x8x1xf32>
    %34 = tpu.reciprocal %33 {approx = true} : vector<2x8x1xf32> -> vector<2x8x1xf32>
    %35 = vector.broadcast %34 : vector<2x8x1xf32> to vector<2x8x8xf32>
    %36 = arith.mulf %31, %35 : vector<2x8x8xf32>
    %37 = arith.truncf %36 : vector<2x8x8xf32> to vector<2x8x8xbf16>
    %38 = vector.extract_strided_slice %20 {offsets = [0, 0, 0], sizes = [2, 8, 32], strides = [1, 1, 1]} : vector<2x8x128xbf16> to vector<2x8x32xbf16>
    "tpu.trace_start"() <{level = 10 : i32, message = "bts,bsd->btd"}> : () -> ()
    %cst_16 = arith.constant dense<0.000000e+00> : vector<2x8x32xf32>
    %39 = tpu.matmul %37, %38, %cst_16 {dimension_numbers = #tpu.dot_dimension_numbers<[2], [1], [1], [2], [0, 0, 0, 1, 1, 2], [0], [0]>} : vector<2x8x8xbf16>, vector<2x8x32xbf16>, vector<2x8x32xf32> -> vector<2x8x32xf32>
    "tpu.trace_stop"() : () -> ()
    %40 = vector.shape_cast %39 : vector<2x8x32xf32> to vector<16x32xf32>
    %41 = arith.truncf %40 : vector<16x32xf32> to vector<16x32xbf16>
    %42 = vector.extract_strided_slice %22 {offsets = [0, 0], sizes = [32, 128], strides = [1, 1]} : vector<128x128xbf16> to vector<32x128xbf16>
    %cst_17 = arith.constant dense<0.000000e+00> : vector<16x128xf32>
    %43 = tpu.matmul %41, %42, %cst_17 {dimension_numbers = #tpu.dot_dimension_numbers<[1], [0], [0], [1], [0, 0, 1, 1], [], []>} : vector<16x32xbf16>, vector<32x128xbf16>, vector<16x128xf32> -> vector<16x128xf32>
    %44 = arith.addf %23, %43 : vector<16x128xf32>
    %45 = vector.extract_strided_slice %14 {offsets = [0, 0, 32], sizes = [2, 8, 32], strides = [1, 1, 1]} : vector<2x8x128xbf16> to vector<2x8x32xbf16>
    %46 = vector.extract_strided_slice %17 {offsets = [0, 0, 32], sizes = [2, 8, 32], strides = [1, 1, 1]} : vector<2x8x128xbf16> to vector<2x8x32xbf16>
    "tpu.trace_start"() <{level = 10 : i32, message = "btd,bsd->bts"}> : () -> ()
    %cst_18 = arith.constant dense<0.000000e+00> : vector<2x8x8xf32>
    %47 = tpu.matmul %45, %46, %cst_18 {dimension_numbers = #tpu.dot_dimension_numbers<[2], [2], [1], [1], [0, 0, 0, 1, 1, 1], [0], [0]>} : vector<2x8x32xbf16>, vector<2x8x32xbf16>, vector<2x8x8xf32> -> vector<2x8x8xf32>
    "tpu.trace_stop"() : () -> ()
    %cst_19 = arith.constant dense<0xFF800000> : vector<2x8xf32>
    %48 = vector.multi_reduction <maximumf>, %47, %cst_19 [2] : vector<2x8x8xf32> to vector<2x8xf32>
    %49 = vector.shape_cast %48 : vector<2x8xf32> to vector<2x8x1xf32>
    %50 = vector.broadcast %49 : vector<2x8x1xf32> to vector<2x8x8xf32>
    %51 = arith.subf %47, %50 : vector<2x8x8xf32>
    %52 = math.exp %51 : vector<2x8x8xf32>
    %cst_20 = arith.constant dense<0.000000e+00> : vector<2x8xf32>
    %53 = vector.multi_reduction <add>, %52, %cst_20 [2] : vector<2x8x8xf32> to vector<2x8xf32>
    %54 = vector.shape_cast %53 : vector<2x8xf32> to vector<2x8x1xf32>
    %55 = tpu.reciprocal %54 {approx = true} : vector<2x8x1xf32> -> vector<2x8x1xf32>
    %56 = vector.broadcast %55 : vector<2x8x1xf32> to vector<2x8x8xf32>
    %57 = arith.mulf %52, %56 : vector<2x8x8xf32>
    %58 = arith.truncf %57 : vector<2x8x8xf32> to vector<2x8x8xbf16>
    %59 = vector.extract_strided_slice %20 {offsets = [0, 0, 32], sizes = [2, 8, 32], strides = [1, 1, 1]} : vector<2x8x128xbf16> to vector<2x8x32xbf16>
    "tpu.trace_start"() <{level = 10 : i32, message = "bts,bsd->btd"}> : () -> ()
    %cst_21 = arith.constant dense<0.000000e+00> : vector<2x8x32xf32>
    %60 = tpu.matmul %58, %59, %cst_21 {dimension_numbers = #tpu.dot_dimension_numbers<[2], [1], [1], [2], [0, 0, 0, 1, 1, 2], [0], [0]>} : vector<2x8x8xbf16>, vector<2x8x32xbf16>, vector<2x8x32xf32> -> vector<2x8x32xf32>
    "tpu.trace_stop"() : () -> ()
    %61 = vector.shape_cast %60 : vector<2x8x32xf32> to vector<16x32xf32>
    %62 = arith.truncf %61 : vector<16x32xf32> to vector<16x32xbf16>
    %63 = vector.extract_strided_slice %22 {offsets = [32, 0], sizes = [32, 128], strides = [1, 1]} : vector<128x128xbf16> to vector<32x128xbf16>
    %cst_22 = arith.constant dense<0.000000e+00> : vector<16x128xf32>
    %64 = tpu.matmul %62, %63, %cst_22 {dimension_numbers = #tpu.dot_dimension_numbers<[1], [0], [0], [1], [0, 0, 1, 1], [], []>} : vector<16x32xbf16>, vector<32x128xbf16>, vector<16x128xf32> -> vector<16x128xf32>
    %65 = arith.addf %44, %64 : vector<16x128xf32>
    %66 = vector.extract_strided_slice %14 {offsets = [0, 0, 64], sizes = [2, 8, 32], strides = [1, 1, 1]} : vector<2x8x128xbf16> to vector<2x8x32xbf16>
    %67 = vector.extract_strided_slice %17 {offsets = [0, 0, 64], sizes = [2, 8, 32], strides = [1, 1, 1]} : vector<2x8x128xbf16> to vector<2x8x32xbf16>
    "tpu.trace_start"() <{level = 10 : i32, message = "btd,bsd->bts"}> : () -> ()
    %cst_23 = arith.constant dense<0.000000e+00> : vector<2x8x8xf32>
    %68 = tpu.matmul %66, %67, %cst_23 {dimension_numbers = #tpu.dot_dimension_numbers<[2], [2], [1], [1], [0, 0, 0, 1, 1, 1], [0], [0]>} : vector<2x8x32xbf16>, vector<2x8x32xbf16>, vector<2x8x8xf32> -> vector<2x8x8xf32>
    "tpu.trace_stop"() : () -> ()
    %cst_24 = arith.constant dense<0xFF800000> : vector<2x8xf32>
    %69 = vector.multi_reduction <maximumf>, %68, %cst_24 [2] : vector<2x8x8xf32> to vector<2x8xf32>
    %70 = vector.shape_cast %69 : vector<2x8xf32> to vector<2x8x1xf32>
    %71 = vector.broadcast %70 : vector<2x8x1xf32> to vector<2x8x8xf32>
    %72 = arith.subf %68, %71 : vector<2x8x8xf32>
    %73 = math.exp %72 : vector<2x8x8xf32>
    %cst_25 = arith.constant dense<0.000000e+00> : vector<2x8xf32>
    %74 = vector.multi_reduction <add>, %73, %cst_25 [2] : vector<2x8x8xf32> to vector<2x8xf32>
    %75 = vector.shape_cast %74 : vector<2x8xf32> to vector<2x8x1xf32>
    %76 = tpu.reciprocal %75 {approx = true} : vector<2x8x1xf32> -> vector<2x8x1xf32>
    %77 = vector.broadcast %76 : vector<2x8x1xf32> to vector<2x8x8xf32>
    %78 = arith.mulf %73, %77 : vector<2x8x8xf32>
    %79 = arith.truncf %78 : vector<2x8x8xf32> to vector<2x8x8xbf16>
    %80 = vector.extract_strided_slice %20 {offsets = [0, 0, 64], sizes = [2, 8, 32], strides = [1, 1, 1]} : vector<2x8x128xbf16> to vector<2x8x32xbf16>
    "tpu.trace_start"() <{level = 10 : i32, message = "bts,bsd->btd"}> : () -> ()
    %cst_26 = arith.constant dense<0.000000e+00> : vector<2x8x32xf32>
    %81 = tpu.matmul %79, %80, %cst_26 {dimension_numbers = #tpu.dot_dimension_numbers<[2], [1], [1], [2], [0, 0, 0, 1, 1, 2], [0], [0]>} : vector<2x8x8xbf16>, vector<2x8x32xbf16>, vector<2x8x32xf32> -> vector<2x8x32xf32>
    "tpu.trace_stop"() : () -> ()
    %82 = vector.shape_cast %81 : vector<2x8x32xf32> to vector<16x32xf32>
    %83 = arith.truncf %82 : vector<16x32xf32> to vector<16x32xbf16>
    %84 = vector.extract_strided_slice %22 {offsets = [64, 0], sizes = [32, 128], strides = [1, 1]} : vector<128x128xbf16> to vector<32x128xbf16>
    %cst_27 = arith.constant dense<0.000000e+00> : vector<16x128xf32>
    %85 = tpu.matmul %83, %84, %cst_27 {dimension_numbers = #tpu.dot_dimension_numbers<[1], [0], [0], [1], [0, 0, 1, 1], [], []>} : vector<16x32xbf16>, vector<32x128xbf16>, vector<16x128xf32> -> vector<16x128xf32>
    %86 = arith.addf %65, %85 : vector<16x128xf32>
    %87 = vector.extract_strided_slice %14 {offsets = [0, 0, 96], sizes = [2, 8, 32], strides = [1, 1, 1]} : vector<2x8x128xbf16> to vector<2x8x32xbf16>
    %88 = vector.extract_strided_slice %17 {offsets = [0, 0, 96], sizes = [2, 8, 32], strides = [1, 1, 1]} : vector<2x8x128xbf16> to vector<2x8x32xbf16>
    "tpu.trace_start"() <{level = 10 : i32, message = "btd,bsd->bts"}> : () -> ()
    %cst_28 = arith.constant dense<0.000000e+00> : vector<2x8x8xf32>
    %89 = tpu.matmul %87, %88, %cst_28 {dimension_numbers = #tpu.dot_dimension_numbers<[2], [2], [1], [1], [0, 0, 0, 1, 1, 1], [0], [0]>} : vector<2x8x32xbf16>, vector<2x8x32xbf16>, vector<2x8x8xf32> -> vector<2x8x8xf32>
    "tpu.trace_stop"() : () -> ()
    %cst_29 = arith.constant dense<0xFF800000> : vector<2x8xf32>
    %90 = vector.multi_reduction <maximumf>, %89, %cst_29 [2] : vector<2x8x8xf32> to vector<2x8xf32>
    %91 = vector.shape_cast %90 : vector<2x8xf32> to vector<2x8x1xf32>
    %92 = vector.broadcast %91 : vector<2x8x1xf32> to vector<2x8x8xf32>
    %93 = arith.subf %89, %92 : vector<2x8x8xf32>
    %94 = math.exp %93 : vector<2x8x8xf32>
    %cst_30 = arith.constant dense<0.000000e+00> : vector<2x8xf32>
    %95 = vector.multi_reduction <add>, %94, %cst_30 [2] : vector<2x8x8xf32> to vector<2x8xf32>
    %96 = vector.shape_cast %95 : vector<2x8xf32> to vector<2x8x1xf32>
    %97 = tpu.reciprocal %96 {approx = true} : vector<2x8x1xf32> -> vector<2x8x1xf32>
    %98 = vector.broadcast %97 : vector<2x8x1xf32> to vector<2x8x8xf32>
    %99 = arith.mulf %94, %98 : vector<2x8x8xf32>
    %100 = arith.truncf %99 : vector<2x8x8xf32> to vector<2x8x8xbf16>
    %101 = vector.extract_strided_slice %20 {offsets = [0, 0, 96], sizes = [2, 8, 32], strides = [1, 1, 1]} : vector<2x8x128xbf16> to vector<2x8x32xbf16>
    "tpu.trace_start"() <{level = 10 : i32, message = "bts,bsd->btd"}> : () -> ()
    %cst_31 = arith.constant dense<0.000000e+00> : vector<2x8x32xf32>
    %102 = tpu.matmul %100, %101, %cst_31 {dimension_numbers = #tpu.dot_dimension_numbers<[2], [1], [1], [2], [0, 0, 0, 1, 1, 2], [0], [0]>} : vector<2x8x8xbf16>, vector<2x8x32xbf16>, vector<2x8x32xf32> -> vector<2x8x32xf32>
    "tpu.trace_stop"() : () -> ()
    %103 = vector.shape_cast %102 : vector<2x8x32xf32> to vector<16x32xf32>
    %104 = arith.truncf %103 : vector<16x32xf32> to vector<16x32xbf16>
    %105 = vector.extract_strided_slice %22 {offsets = [96, 0], sizes = [32, 128], strides = [1, 1]} : vector<128x128xbf16> to vector<32x128xbf16>
    %cst_32 = arith.constant dense<0.000000e+00> : vector<16x128xf32>
    %106 = tpu.matmul %104, %105, %cst_32 {dimension_numbers = #tpu.dot_dimension_numbers<[1], [0], [0], [1], [0, 0, 1, 1], [], []>} : vector<16x32xbf16>, vector<32x128xbf16>, vector<16x128xf32> -> vector<16x128xf32>
    %107 = arith.addf %86, %106 : vector<16x128xf32>
    %108 = arith.addf %1, %107 : vector<16x128xf32>
    %c0_33 = arith.constant 0 : index
    %c0_34 = arith.constant 0 : index
    %c0_35 = arith.constant 0 : index
    %109 = vector.load %arg4[%c0_33, %c0_34, %c0_35] : memref<2x1x128xf32, #tpu.memory_space<vmem>>, vector<1x1x128xf32>
    %110 = vector.shape_cast %109 : vector<1x1x128xf32> to vector<1x128xf32>
    %111 = vector.broadcast %110 : vector<1x128xf32> to vector<16x128xf32>
    %112 = arith.addf %108, %111 : vector<16x128xf32>
    %c0_36 = arith.constant 0 : index
    %c0_37 = arith.constant 0 : index
    %c0_38 = arith.constant 0 : index
    %113 = vector.load %arg5[%c0_36, %c0_37, %c0_38] : memref<2x1x128xf32, #tpu.memory_space<vmem>>, vector<1x1x128xf32>
    %114 = vector.shape_cast %113 : vector<1x1x128xf32> to vector<1x128xf32>
    %c0_39 = arith.constant 0 : index
    %c0_40 = arith.constant 0 : index
    %c0_41 = arith.constant 0 : index
    %115 = vector.load %arg6[%c0_39, %c0_40, %c0_41] : memref<2x1x128xf32, #tpu.memory_space<vmem>>, vector<1x1x128xf32>
    %116 = vector.shape_cast %115 : vector<1x1x128xf32> to vector<1x128xf32>
    %cst_42 = arith.constant dense<0.000000e+00> : vector<16xf32>
    %117 = vector.multi_reduction <add>, %112, %cst_42 [1] : vector<16x128xf32> to vector<16xf32>
    %118 = vector.shape_cast %117 : vector<16xf32> to vector<16x1xf32>
    %cst_43 = arith.constant 1.280000e+02 : f32
    %119 = vector.broadcast %cst_43 : f32 to vector<16x1xf32>
    %120 = arith.divf %118, %119 : vector<16x1xf32>
    %121 = arith.mulf %112, %112 : vector<16x128xf32>
    %cst_44 = arith.constant dense<0.000000e+00> : vector<16xf32>
    %122 = vector.multi_reduction <add>, %121, %cst_44 [1] : vector<16x128xf32> to vector<16xf32>
    %123 = vector.shape_cast %122 : vector<16xf32> to vector<16x1xf32>
    %cst_45 = arith.constant 1.280000e+02 : f32
    %124 = vector.broadcast %cst_45 : f32 to vector<16x1xf32>
    %125 = arith.divf %123, %124 : vector<16x1xf32>
    %126 = arith.mulf %120, %120 : vector<16x1xf32>
    %127 = arith.subf %125, %126 : vector<16x1xf32>
    %128 = vector.broadcast %120 : vector<16x1xf32> to vector<16x128xf32>
    %129 = arith.subf %112, %128 : vector<16x128xf32>
    %cst_46 = arith.constant 9.99999974E-6 : f32
    %130 = vector.broadcast %cst_46 : f32 to vector<16x1xf32>
    %131 = arith.addf %127, %130 : vector<16x1xf32>
    %132 = math.rsqrt %131 : vector<16x1xf32>
    %133 = vector.broadcast %132 : vector<16x1xf32> to vector<16x128xf32>
    %134 = arith.mulf %129, %133 : vector<16x128xf32>
    %135 = vector.broadcast %114 : vector<1x128xf32> to vector<16x128xf32>
    %136 = arith.mulf %134, %135 : vector<16x128xf32>
    %137 = vector.broadcast %116 : vector<1x128xf32> to vector<16x128xf32>
    %138 = arith.addf %136, %137 : vector<16x128xf32>
    %139 = arith.truncf %138 : vector<16x128xf32> to vector<16x128xbf16>
    %c0_47 = arith.constant 0 : index
    %c0_48 = arith.constant 0 : index
    %c0_49 = arith.constant 0 : index
    %140 = vector.load %arg7[%c0_47, %c0_48, %c0_49] : memref<2x128x2048xbf16, #tpu.memory_space<vmem>>, vector<1x128x2048xbf16>
    %141 = vector.shape_cast %140 : vector<1x128x2048xbf16> to vector<128x2048xbf16>
    %cst_50 = arith.constant dense<0.000000e+00> : vector<16x2048xf32>
    %142 = tpu.matmul %139, %141, %cst_50 {dimension_numbers = #tpu.dot_dimension_numbers<[1], [0], [0], [1], [0, 0, 1, 1], [], []>} : vector<16x128xbf16>, vector<128x2048xbf16>, vector<16x2048xf32> -> vector<16x2048xf32>
    %c0_51 = arith.constant 0 : index
    %c0_52 = arith.constant 0 : index
    %c0_53 = arith.constant 0 : index
    %143 = vector.load %arg8[%c0_51, %c0_52, %c0_53] : memref<2x1x2048xf32, #tpu.memory_space<vmem>>, vector<1x1x2048xf32>
    %144 = vector.shape_cast %143 : vector<1x1x2048xf32> to vector<1x2048xf32>
    %145 = vector.broadcast %144 : vector<1x2048xf32> to vector<16x2048xf32>
    %146 = arith.addf %142, %145 : vector<16x2048xf32>
    %cst_54 = arith.constant 0.000000e+00 : f32
    %147 = vector.broadcast %cst_54 : f32 to vector<16x2048xf32>
    %148 = arith.maximumf %146, %147 : vector<16x2048xf32>
    %149 = arith.truncf %148 : vector<16x2048xf32> to vector<16x2048xbf16>
    %c0_55 = arith.constant 0 : index
    %c0_56 = arith.constant 0 : index
    %c0_57 = arith.constant 0 : index
    %150 = vector.load %arg9[%c0_55, %c0_56, %c0_57] : memref<2x2048x128xbf16, #tpu.memory_space<vmem>>, vector<1x2048x128xbf16>
    %151 = vector.shape_cast %150 : vector<1x2048x128xbf16> to vector<2048x128xbf16>
    %cst_58 = arith.constant dense<0.000000e+00> : vector<16x128xf32>
    %152 = tpu.matmul %149, %151, %cst_58 {dimension_numbers = #tpu.dot_dimension_numbers<[1], [0], [0], [1], [0, 0, 1, 1], [], []>} : vector<16x2048xbf16>, vector<2048x128xbf16>, vector<16x128xf32> -> vector<16x128xf32>
    %c0_59 = arith.constant 0 : index
    %c0_60 = arith.constant 0 : index
    %c0_61 = arith.constant 0 : index
    %153 = vector.load %arg10[%c0_59, %c0_60, %c0_61] : memref<2x1x128xf32, #tpu.memory_space<vmem>>, vector<1x1x128xf32>
    %154 = vector.shape_cast %153 : vector<1x1x128xf32> to vector<1x128xf32>
    %155 = vector.broadcast %154 : vector<1x128xf32> to vector<16x128xf32>
    %156 = arith.addf %152, %155 : vector<16x128xf32>
    %157 = arith.addf %138, %156 : vector<16x128xf32>
    %c0_62 = arith.constant 0 : index
    %c0_63 = arith.constant 0 : index
    %c0_64 = arith.constant 0 : index
    %158 = vector.load %arg11[%c0_62, %c0_63, %c0_64] : memref<2x1x128xf32, #tpu.memory_space<vmem>>, vector<1x1x128xf32>
    %159 = vector.shape_cast %158 : vector<1x1x128xf32> to vector<1x128xf32>
    %c0_65 = arith.constant 0 : index
    %c0_66 = arith.constant 0 : index
    %c0_67 = arith.constant 0 : index
    %160 = vector.load %arg12[%c0_65, %c0_66, %c0_67] : memref<2x1x128xf32, #tpu.memory_space<vmem>>, vector<1x1x128xf32>
    %161 = vector.shape_cast %160 : vector<1x1x128xf32> to vector<1x128xf32>
    %cst_68 = arith.constant dense<0.000000e+00> : vector<16xf32>
    %162 = vector.multi_reduction <add>, %157, %cst_68 [1] : vector<16x128xf32> to vector<16xf32>
    %163 = vector.shape_cast %162 : vector<16xf32> to vector<16x1xf32>
    %cst_69 = arith.constant 1.280000e+02 : f32
    %164 = vector.broadcast %cst_69 : f32 to vector<16x1xf32>
    %165 = arith.divf %163, %164 : vector<16x1xf32>
    %166 = arith.mulf %157, %157 : vector<16x128xf32>
    %cst_70 = arith.constant dense<0.000000e+00> : vector<16xf32>
    %167 = vector.multi_reduction <add>, %166, %cst_70 [1] : vector<16x128xf32> to vector<16xf32>
    %168 = vector.shape_cast %167 : vector<16xf32> to vector<16x1xf32>
    %cst_71 = arith.constant 1.280000e+02 : f32
    %169 = vector.broadcast %cst_71 : f32 to vector<16x1xf32>
    %170 = arith.divf %168, %169 : vector<16x1xf32>
    %171 = arith.mulf %165, %165 : vector<16x1xf32>
    %172 = arith.subf %170, %171 : vector<16x1xf32>
    %173 = vector.broadcast %165 : vector<16x1xf32> to vector<16x128xf32>
    %174 = arith.subf %157, %173 : vector<16x128xf32>
    %cst_72 = arith.constant 9.99999974E-6 : f32
    %175 = vector.broadcast %cst_72 : f32 to vector<16x1xf32>
    %176 = arith.addf %172, %175 : vector<16x1xf32>
    %177 = math.rsqrt %176 : vector<16x1xf32>
    %178 = vector.broadcast %177 : vector<16x1xf32> to vector<16x128xf32>
    %179 = arith.mulf %174, %178 : vector<16x128xf32>
    %180 = vector.broadcast %159 : vector<1x128xf32> to vector<16x128xf32>
    %181 = arith.mulf %179, %180 : vector<16x128xf32>
    %182 = vector.broadcast %161 : vector<1x128xf32> to vector<16x128xf32>
    %183 = arith.addf %181, %182 : vector<16x128xf32>
    %184 = arith.truncf %183 : vector<16x128xf32> to vector<16x128xbf16>
    %c1 = arith.constant 1 : index
    %c0_73 = arith.constant 0 : index
    %c0_74 = arith.constant 0 : index
    %185 = vector.load %arg1[%c1, %c0_73, %c0_74] : memref<2x128x384xbf16, #tpu.memory_space<vmem>>, vector<1x128x384xbf16>
    %186 = vector.shape_cast %185 : vector<1x128x384xbf16> to vector<128x384xbf16>
    %cst_75 = arith.constant dense<0.000000e+00> : vector<16x384xf32>
    %187 = tpu.matmul %184, %186, %cst_75 {dimension_numbers = #tpu.dot_dimension_numbers<[1], [0], [0], [1], [0, 0, 1, 1], [], []>} : vector<16x128xbf16>, vector<128x384xbf16>, vector<16x384xf32> -> vector<16x384xf32>
    %c1_76 = arith.constant 1 : index
    %c0_77 = arith.constant 0 : index
    %c0_78 = arith.constant 0 : index
    %188 = vector.load %arg2[%c1_76, %c0_77, %c0_78] : memref<2x1x384xf32, #tpu.memory_space<vmem>>, vector<1x1x384xf32>
    %189 = vector.shape_cast %188 : vector<1x1x384xf32> to vector<1x384xf32>
    %190 = vector.broadcast %189 : vector<1x384xf32> to vector<16x384xf32>
    %191 = arith.addf %187, %190 : vector<16x384xf32>
    %192 = vector.extract_strided_slice %191 {offsets = [0, 0], sizes = [16, 128], strides = [1, 1]} : vector<16x384xf32> to vector<16x128xf32>
    %cst_79 = arith.constant 0.176776692 : f32
    %193 = vector.broadcast %cst_79 : f32 to vector<16x128xf32>
    %194 = arith.mulf %192, %193 : vector<16x128xf32>
    %195 = vector.shape_cast %194 : vector<16x128xf32> to vector<2x8x128xf32>
    %196 = arith.truncf %195 : vector<2x8x128xf32> to vector<2x8x128xbf16>
    %197 = vector.extract_strided_slice %191 {offsets = [0, 128], sizes = [16, 128], strides = [1, 1]} : vector<16x384xf32> to vector<16x128xf32>
    %198 = vector.shape_cast %197 : vector<16x128xf32> to vector<2x8x128xf32>
    %199 = arith.truncf %198 : vector<2x8x128xf32> to vector<2x8x128xbf16>
    %200 = vector.extract_strided_slice %191 {offsets = [0, 256], sizes = [16, 128], strides = [1, 1]} : vector<16x384xf32> to vector<16x128xf32>
    %201 = vector.shape_cast %200 : vector<16x128xf32> to vector<2x8x128xf32>
    %202 = arith.truncf %201 : vector<2x8x128xf32> to vector<2x8x128xbf16>
    %c1_80 = arith.constant 1 : index
    %c0_81 = arith.constant 0 : index
    %c0_82 = arith.constant 0 : index
    %203 = vector.load %arg3[%c1_80, %c0_81, %c0_82] : memref<2x128x128xbf16, #tpu.memory_space<vmem>>, vector<1x128x128xbf16>
    %204 = vector.shape_cast %203 : vector<1x128x128xbf16> to vector<128x128xbf16>
    %cst_83 = arith.constant 0.000000e+00 : f32
    %205 = vector.broadcast %cst_83 : f32 to vector<16x128xf32>
    %206 = vector.extract_strided_slice %196 {offsets = [0, 0, 0], sizes = [2, 8, 32], strides = [1, 1, 1]} : vector<2x8x128xbf16> to vector<2x8x32xbf16>
    %207 = vector.extract_strided_slice %199 {offsets = [0, 0, 0], sizes = [2, 8, 32], strides = [1, 1, 1]} : vector<2x8x128xbf16> to vector<2x8x32xbf16>
    "tpu.trace_start"() <{level = 10 : i32, message = "btd,bsd->bts"}> : () -> ()
    %cst_84 = arith.constant dense<0.000000e+00> : vector<2x8x8xf32>
    %208 = tpu.matmul %206, %207, %cst_84 {dimension_numbers = #tpu.dot_dimension_numbers<[2], [2], [1], [1], [0, 0, 0, 1, 1, 1], [0], [0]>} : vector<2x8x32xbf16>, vector<2x8x32xbf16>, vector<2x8x8xf32> -> vector<2x8x8xf32>
    "tpu.trace_stop"() : () -> ()
    %cst_85 = arith.constant dense<0xFF800000> : vector<2x8xf32>
    %209 = vector.multi_reduction <maximumf>, %208, %cst_85 [2] : vector<2x8x8xf32> to vector<2x8xf32>
    %210 = vector.shape_cast %209 : vector<2x8xf32> to vector<2x8x1xf32>
    %211 = vector.broadcast %210 : vector<2x8x1xf32> to vector<2x8x8xf32>
    %212 = arith.subf %208, %211 : vector<2x8x8xf32>
    %213 = math.exp %212 : vector<2x8x8xf32>
    %cst_86 = arith.constant dense<0.000000e+00> : vector<2x8xf32>
    %214 = vector.multi_reduction <add>, %213, %cst_86 [2] : vector<2x8x8xf32> to vector<2x8xf32>
    %215 = vector.shape_cast %214 : vector<2x8xf32> to vector<2x8x1xf32>
    %216 = tpu.reciprocal %215 {approx = true} : vector<2x8x1xf32> -> vector<2x8x1xf32>
    %217 = vector.broadcast %216 : vector<2x8x1xf32> to vector<2x8x8xf32>
    %218 = arith.mulf %213, %217 : vector<2x8x8xf32>
    %219 = arith.truncf %218 : vector<2x8x8xf32> to vector<2x8x8xbf16>
    %220 = vector.extract_strided_slice %202 {offsets = [0, 0, 0], sizes = [2, 8, 32], strides = [1, 1, 1]} : vector<2x8x128xbf16> to vector<2x8x32xbf16>
    "tpu.trace_start"() <{level = 10 : i32, message = "bts,bsd->btd"}> : () -> ()
    %cst_87 = arith.constant dense<0.000000e+00> : vector<2x8x32xf32>
    %221 = tpu.matmul %219, %220, %cst_87 {dimension_numbers = #tpu.dot_dimension_numbers<[2], [1], [1], [2], [0, 0, 0, 1, 1, 2], [0], [0]>} : vector<2x8x8xbf16>, vector<2x8x32xbf16>, vector<2x8x32xf32> -> vector<2x8x32xf32>
    "tpu.trace_stop"() : () -> ()
    %222 = vector.shape_cast %221 : vector<2x8x32xf32> to vector<16x32xf32>
    %223 = arith.truncf %222 : vector<16x32xf32> to vector<16x32xbf16>
    %224 = vector.extract_strided_slice %204 {offsets = [0, 0], sizes = [32, 128], strides = [1, 1]} : vector<128x128xbf16> to vector<32x128xbf16>
    %cst_88 = arith.constant dense<0.000000e+00> : vector<16x128xf32>
    %225 = tpu.matmul %223, %224, %cst_88 {dimension_numbers = #tpu.dot_dimension_numbers<[1], [0], [0], [1], [0, 0, 1, 1], [], []>} : vector<16x32xbf16>, vector<32x128xbf16>, vector<16x128xf32> -> vector<16x128xf32>
    %226 = arith.addf %205, %225 : vector<16x128xf32>
    %227 = vector.extract_strided_slice %196 {offsets = [0, 0, 32], sizes = [2, 8, 32], strides = [1, 1, 1]} : vector<2x8x128xbf16> to vector<2x8x32xbf16>
    %228 = vector.extract_strided_slice %199 {offsets = [0, 0, 32], sizes = [2, 8, 32], strides = [1, 1, 1]} : vector<2x8x128xbf16> to vector<2x8x32xbf16>
    "tpu.trace_start"() <{level = 10 : i32, message = "btd,bsd->bts"}> : () -> ()
    %cst_89 = arith.constant dense<0.000000e+00> : vector<2x8x8xf32>
    %229 = tpu.matmul %227, %228, %cst_89 {dimension_numbers = #tpu.dot_dimension_numbers<[2], [2], [1], [1], [0, 0, 0, 1, 1, 1], [0], [0]>} : vector<2x8x32xbf16>, vector<2x8x32xbf16>, vector<2x8x8xf32> -> vector<2x8x8xf32>
    "tpu.trace_stop"() : () -> ()
    %cst_90 = arith.constant dense<0xFF800000> : vector<2x8xf32>
    %230 = vector.multi_reduction <maximumf>, %229, %cst_90 [2] : vector<2x8x8xf32> to vector<2x8xf32>
    %231 = vector.shape_cast %230 : vector<2x8xf32> to vector<2x8x1xf32>
    %232 = vector.broadcast %231 : vector<2x8x1xf32> to vector<2x8x8xf32>
    %233 = arith.subf %229, %232 : vector<2x8x8xf32>
    %234 = math.exp %233 : vector<2x8x8xf32>
    %cst_91 = arith.constant dense<0.000000e+00> : vector<2x8xf32>
    %235 = vector.multi_reduction <add>, %234, %cst_91 [2] : vector<2x8x8xf32> to vector<2x8xf32>
    %236 = vector.shape_cast %235 : vector<2x8xf32> to vector<2x8x1xf32>
    %237 = tpu.reciprocal %236 {approx = true} : vector<2x8x1xf32> -> vector<2x8x1xf32>
    %238 = vector.broadcast %237 : vector<2x8x1xf32> to vector<2x8x8xf32>
    %239 = arith.mulf %234, %238 : vector<2x8x8xf32>
    %240 = arith.truncf %239 : vector<2x8x8xf32> to vector<2x8x8xbf16>
    %241 = vector.extract_strided_slice %202 {offsets = [0, 0, 32], sizes = [2, 8, 32], strides = [1, 1, 1]} : vector<2x8x128xbf16> to vector<2x8x32xbf16>
    "tpu.trace_start"() <{level = 10 : i32, message = "bts,bsd->btd"}> : () -> ()
    %cst_92 = arith.constant dense<0.000000e+00> : vector<2x8x32xf32>
    %242 = tpu.matmul %240, %241, %cst_92 {dimension_numbers = #tpu.dot_dimension_numbers<[2], [1], [1], [2], [0, 0, 0, 1, 1, 2], [0], [0]>} : vector<2x8x8xbf16>, vector<2x8x32xbf16>, vector<2x8x32xf32> -> vector<2x8x32xf32>
    "tpu.trace_stop"() : () -> ()
    %243 = vector.shape_cast %242 : vector<2x8x32xf32> to vector<16x32xf32>
    %244 = arith.truncf %243 : vector<16x32xf32> to vector<16x32xbf16>
    %245 = vector.extract_strided_slice %204 {offsets = [32, 0], sizes = [32, 128], strides = [1, 1]} : vector<128x128xbf16> to vector<32x128xbf16>
    %cst_93 = arith.constant dense<0.000000e+00> : vector<16x128xf32>
    %246 = tpu.matmul %244, %245, %cst_93 {dimension_numbers = #tpu.dot_dimension_numbers<[1], [0], [0], [1], [0, 0, 1, 1], [], []>} : vector<16x32xbf16>, vector<32x128xbf16>, vector<16x128xf32> -> vector<16x128xf32>
    %247 = arith.addf %226, %246 : vector<16x128xf32>
    %248 = vector.extract_strided_slice %196 {offsets = [0, 0, 64], sizes = [2, 8, 32], strides = [1, 1, 1]} : vector<2x8x128xbf16> to vector<2x8x32xbf16>
    %249 = vector.extract_strided_slice %199 {offsets = [0, 0, 64], sizes = [2, 8, 32], strides = [1, 1, 1]} : vector<2x8x128xbf16> to vector<2x8x32xbf16>
    "tpu.trace_start"() <{level = 10 : i32, message = "btd,bsd->bts"}> : () -> ()
    %cst_94 = arith.constant dense<0.000000e+00> : vector<2x8x8xf32>
    %250 = tpu.matmul %248, %249, %cst_94 {dimension_numbers = #tpu.dot_dimension_numbers<[2], [2], [1], [1], [0, 0, 0, 1, 1, 1], [0], [0]>} : vector<2x8x32xbf16>, vector<2x8x32xbf16>, vector<2x8x8xf32> -> vector<2x8x8xf32>
    "tpu.trace_stop"() : () -> ()
    %cst_95 = arith.constant dense<0xFF800000> : vector<2x8xf32>
    %251 = vector.multi_reduction <maximumf>, %250, %cst_95 [2] : vector<2x8x8xf32> to vector<2x8xf32>
    %252 = vector.shape_cast %251 : vector<2x8xf32> to vector<2x8x1xf32>
    %253 = vector.broadcast %252 : vector<2x8x1xf32> to vector<2x8x8xf32>
    %254 = arith.subf %250, %253 : vector<2x8x8xf32>
    %255 = math.exp %254 : vector<2x8x8xf32>
    %cst_96 = arith.constant dense<0.000000e+00> : vector<2x8xf32>
    %256 = vector.multi_reduction <add>, %255, %cst_96 [2] : vector<2x8x8xf32> to vector<2x8xf32>
    %257 = vector.shape_cast %256 : vector<2x8xf32> to vector<2x8x1xf32>
    %258 = tpu.reciprocal %257 {approx = true} : vector<2x8x1xf32> -> vector<2x8x1xf32>
    %259 = vector.broadcast %258 : vector<2x8x1xf32> to vector<2x8x8xf32>
    %260 = arith.mulf %255, %259 : vector<2x8x8xf32>
    %261 = arith.truncf %260 : vector<2x8x8xf32> to vector<2x8x8xbf16>
    %262 = vector.extract_strided_slice %202 {offsets = [0, 0, 64], sizes = [2, 8, 32], strides = [1, 1, 1]} : vector<2x8x128xbf16> to vector<2x8x32xbf16>
    "tpu.trace_start"() <{level = 10 : i32, message = "bts,bsd->btd"}> : () -> ()
    %cst_97 = arith.constant dense<0.000000e+00> : vector<2x8x32xf32>
    %263 = tpu.matmul %261, %262, %cst_97 {dimension_numbers = #tpu.dot_dimension_numbers<[2], [1], [1], [2], [0, 0, 0, 1, 1, 2], [0], [0]>} : vector<2x8x8xbf16>, vector<2x8x32xbf16>, vector<2x8x32xf32> -> vector<2x8x32xf32>
    "tpu.trace_stop"() : () -> ()
    %264 = vector.shape_cast %263 : vector<2x8x32xf32> to vector<16x32xf32>
    %265 = arith.truncf %264 : vector<16x32xf32> to vector<16x32xbf16>
    %266 = vector.extract_strided_slice %204 {offsets = [64, 0], sizes = [32, 128], strides = [1, 1]} : vector<128x128xbf16> to vector<32x128xbf16>
    %cst_98 = arith.constant dense<0.000000e+00> : vector<16x128xf32>
    %267 = tpu.matmul %265, %266, %cst_98 {dimension_numbers = #tpu.dot_dimension_numbers<[1], [0], [0], [1], [0, 0, 1, 1], [], []>} : vector<16x32xbf16>, vector<32x128xbf16>, vector<16x128xf32> -> vector<16x128xf32>
    %268 = arith.addf %247, %267 : vector<16x128xf32>
    %269 = vector.extract_strided_slice %196 {offsets = [0, 0, 96], sizes = [2, 8, 32], strides = [1, 1, 1]} : vector<2x8x128xbf16> to vector<2x8x32xbf16>
    %270 = vector.extract_strided_slice %199 {offsets = [0, 0, 96], sizes = [2, 8, 32], strides = [1, 1, 1]} : vector<2x8x128xbf16> to vector<2x8x32xbf16>
    "tpu.trace_start"() <{level = 10 : i32, message = "btd,bsd->bts"}> : () -> ()
    %cst_99 = arith.constant dense<0.000000e+00> : vector<2x8x8xf32>
    %271 = tpu.matmul %269, %270, %cst_99 {dimension_numbers = #tpu.dot_dimension_numbers<[2], [2], [1], [1], [0, 0, 0, 1, 1, 1], [0], [0]>} : vector<2x8x32xbf16>, vector<2x8x32xbf16>, vector<2x8x8xf32> -> vector<2x8x8xf32>
    "tpu.trace_stop"() : () -> ()
    %cst_100 = arith.constant dense<0xFF800000> : vector<2x8xf32>
    %272 = vector.multi_reduction <maximumf>, %271, %cst_100 [2] : vector<2x8x8xf32> to vector<2x8xf32>
    %273 = vector.shape_cast %272 : vector<2x8xf32> to vector<2x8x1xf32>
    %274 = vector.broadcast %273 : vector<2x8x1xf32> to vector<2x8x8xf32>
    %275 = arith.subf %271, %274 : vector<2x8x8xf32>
    %276 = math.exp %275 : vector<2x8x8xf32>
    %cst_101 = arith.constant dense<0.000000e+00> : vector<2x8xf32>
    %277 = vector.multi_reduction <add>, %276, %cst_101 [2] : vector<2x8x8xf32> to vector<2x8xf32>
    %278 = vector.shape_cast %277 : vector<2x8xf32> to vector<2x8x1xf32>
    %279 = tpu.reciprocal %278 {approx = true} : vector<2x8x1xf32> -> vector<2x8x1xf32>
    %280 = vector.broadcast %279 : vector<2x8x1xf32> to vector<2x8x8xf32>
    %281 = arith.mulf %276, %280 : vector<2x8x8xf32>
    %282 = arith.truncf %281 : vector<2x8x8xf32> to vector<2x8x8xbf16>
    %283 = vector.extract_strided_slice %202 {offsets = [0, 0, 96], sizes = [2, 8, 32], strides = [1, 1, 1]} : vector<2x8x128xbf16> to vector<2x8x32xbf16>
    "tpu.trace_start"() <{level = 10 : i32, message = "bts,bsd->btd"}> : () -> ()
    %cst_102 = arith.constant dense<0.000000e+00> : vector<2x8x32xf32>
    %284 = tpu.matmul %282, %283, %cst_102 {dimension_numbers = #tpu.dot_dimension_numbers<[2], [1], [1], [2], [0, 0, 0, 1, 1, 2], [0], [0]>} : vector<2x8x8xbf16>, vector<2x8x32xbf16>, vector<2x8x32xf32> -> vector<2x8x32xf32>
    "tpu.trace_stop"() : () -> ()
    %285 = vector.shape_cast %284 : vector<2x8x32xf32> to vector<16x32xf32>
    %286 = arith.truncf %285 : vector<16x32xf32> to vector<16x32xbf16>
    %287 = vector.extract_strided_slice %204 {offsets = [96, 0], sizes = [32, 128], strides = [1, 1]} : vector<128x128xbf16> to vector<32x128xbf16>
    %cst_103 = arith.constant dense<0.000000e+00> : vector<16x128xf32>
    %288 = tpu.matmul %286, %287, %cst_103 {dimension_numbers = #tpu.dot_dimension_numbers<[1], [0], [0], [1], [0, 0, 1, 1], [], []>} : vector<16x32xbf16>, vector<32x128xbf16>, vector<16x128xf32> -> vector<16x128xf32>
    %289 = arith.addf %268, %288 : vector<16x128xf32>
    %290 = arith.addf %183, %289 : vector<16x128xf32>
    %c1_104 = arith.constant 1 : index
    %c0_105 = arith.constant 0 : index
    %c0_106 = arith.constant 0 : index
    %291 = vector.load %arg4[%c1_104, %c0_105, %c0_106] : memref<2x1x128xf32, #tpu.memory_space<vmem>>, vector<1x1x128xf32>
    %292 = vector.shape_cast %291 : vector<1x1x128xf32> to vector<1x128xf32>
    %293 = vector.broadcast %292 : vector<1x128xf32> to vector<16x128xf32>
    %294 = arith.addf %290, %293 : vector<16x128xf32>
    %c1_107 = arith.constant 1 : index
    %c0_108 = arith.constant 0 : index
    %c0_109 = arith.constant 0 : index
    %295 = vector.load %arg5[%c1_107, %c0_108, %c0_109] : memref<2x1x128xf32, #tpu.memory_space<vmem>>, vector<1x1x128xf32>
    %296 = vector.shape_cast %295 : vector<1x1x128xf32> to vector<1x128xf32>
    %c1_110 = arith.constant 1 : index
    %c0_111 = arith.constant 0 : index
    %c0_112 = arith.constant 0 : index
    %297 = vector.load %arg6[%c1_110, %c0_111, %c0_112] : memref<2x1x128xf32, #tpu.memory_space<vmem>>, vector<1x1x128xf32>
    %298 = vector.shape_cast %297 : vector<1x1x128xf32> to vector<1x128xf32>
    %cst_113 = arith.constant dense<0.000000e+00> : vector<16xf32>
    %299 = vector.multi_reduction <add>, %294, %cst_113 [1] : vector<16x128xf32> to vector<16xf32>
    %300 = vector.shape_cast %299 : vector<16xf32> to vector<16x1xf32>
    %cst_114 = arith.constant 1.280000e+02 : f32
    %301 = vector.broadcast %cst_114 : f32 to vector<16x1xf32>
    %302 = arith.divf %300, %301 : vector<16x1xf32>
    %303 = arith.mulf %294, %294 : vector<16x128xf32>
    %cst_115 = arith.constant dense<0.000000e+00> : vector<16xf32>
    %304 = vector.multi_reduction <add>, %303, %cst_115 [1] : vector<16x128xf32> to vector<16xf32>
    %305 = vector.shape_cast %304 : vector<16xf32> to vector<16x1xf32>
    %cst_116 = arith.constant 1.280000e+02 : f32
    %306 = vector.broadcast %cst_116 : f32 to vector<16x1xf32>
    %307 = arith.divf %305, %306 : vector<16x1xf32>
    %308 = arith.mulf %302, %302 : vector<16x1xf32>
    %309 = arith.subf %307, %308 : vector<16x1xf32>
    %310 = vector.broadcast %302 : vector<16x1xf32> to vector<16x128xf32>
    %311 = arith.subf %294, %310 : vector<16x128xf32>
    %cst_117 = arith.constant 9.99999974E-6 : f32
    %312 = vector.broadcast %cst_117 : f32 to vector<16x1xf32>
    %313 = arith.addf %309, %312 : vector<16x1xf32>
    %314 = math.rsqrt %313 : vector<16x1xf32>
    %315 = vector.broadcast %314 : vector<16x1xf32> to vector<16x128xf32>
    %316 = arith.mulf %311, %315 : vector<16x128xf32>
    %317 = vector.broadcast %296 : vector<1x128xf32> to vector<16x128xf32>
    %318 = arith.mulf %316, %317 : vector<16x128xf32>
    %319 = vector.broadcast %298 : vector<1x128xf32> to vector<16x128xf32>
    %320 = arith.addf %318, %319 : vector<16x128xf32>
    %321 = arith.truncf %320 : vector<16x128xf32> to vector<16x128xbf16>
    %c1_118 = arith.constant 1 : index
    %c0_119 = arith.constant 0 : index
    %c0_120 = arith.constant 0 : index
    %322 = vector.load %arg7[%c1_118, %c0_119, %c0_120] : memref<2x128x2048xbf16, #tpu.memory_space<vmem>>, vector<1x128x2048xbf16>
    %323 = vector.shape_cast %322 : vector<1x128x2048xbf16> to vector<128x2048xbf16>
    %cst_121 = arith.constant dense<0.000000e+00> : vector<16x2048xf32>
    %324 = tpu.matmul %321, %323, %cst_121 {dimension_numbers = #tpu.dot_dimension_numbers<[1], [0], [0], [1], [0, 0, 1, 1], [], []>} : vector<16x128xbf16>, vector<128x2048xbf16>, vector<16x2048xf32> -> vector<16x2048xf32>
    %c1_122 = arith.constant 1 : index
    %c0_123 = arith.constant 0 : index
    %c0_124 = arith.constant 0 : index
    %325 = vector.load %arg8[%c1_122, %c0_123, %c0_124] : memref<2x1x2048xf32, #tpu.memory_space<vmem>>, vector<1x1x2048xf32>
    %326 = vector.shape_cast %325 : vector<1x1x2048xf32> to vector<1x2048xf32>
    %327 = vector.broadcast %326 : vector<1x2048xf32> to vector<16x2048xf32>
    %328 = arith.addf %324, %327 : vector<16x2048xf32>
    %cst_125 = arith.constant 0.000000e+00 : f32
    %329 = vector.broadcast %cst_125 : f32 to vector<16x2048xf32>
    %330 = arith.maximumf %328, %329 : vector<16x2048xf32>
    %331 = arith.truncf %330 : vector<16x2048xf32> to vector<16x2048xbf16>
    %c1_126 = arith.constant 1 : index
    %c0_127 = arith.constant 0 : index
    %c0_128 = arith.constant 0 : index
    %332 = vector.load %arg9[%c1_126, %c0_127, %c0_128] : memref<2x2048x128xbf16, #tpu.memory_space<vmem>>, vector<1x2048x128xbf16>
    %333 = vector.shape_cast %332 : vector<1x2048x128xbf16> to vector<2048x128xbf16>
    %cst_129 = arith.constant dense<0.000000e+00> : vector<16x128xf32>
    %334 = tpu.matmul %331, %333, %cst_129 {dimension_numbers = #tpu.dot_dimension_numbers<[1], [0], [0], [1], [0, 0, 1, 1], [], []>} : vector<16x2048xbf16>, vector<2048x128xbf16>, vector<16x128xf32> -> vector<16x128xf32>
    %c1_130 = arith.constant 1 : index
    %c0_131 = arith.constant 0 : index
    %c0_132 = arith.constant 0 : index
    %335 = vector.load %arg10[%c1_130, %c0_131, %c0_132] : memref<2x1x128xf32, #tpu.memory_space<vmem>>, vector<1x1x128xf32>
    %336 = vector.shape_cast %335 : vector<1x1x128xf32> to vector<1x128xf32>
    %337 = vector.broadcast %336 : vector<1x128xf32> to vector<16x128xf32>
    %338 = arith.addf %334, %337 : vector<16x128xf32>
    %339 = arith.addf %320, %338 : vector<16x128xf32>
    %c1_133 = arith.constant 1 : index
    %c0_134 = arith.constant 0 : index
    %c0_135 = arith.constant 0 : index
    %340 = vector.load %arg11[%c1_133, %c0_134, %c0_135] : memref<2x1x128xf32, #tpu.memory_space<vmem>>, vector<1x1x128xf32>
    %341 = vector.shape_cast %340 : vector<1x1x128xf32> to vector<1x128xf32>
    %c1_136 = arith.constant 1 : index
    %c0_137 = arith.constant 0 : index
    %c0_138 = arith.constant 0 : index
    %342 = vector.load %arg12[%c1_136, %c0_137, %c0_138] : memref<2x1x128xf32, #tpu.memory_space<vmem>>, vector<1x1x128xf32>
    %343 = vector.shape_cast %342 : vector<1x1x128xf32> to vector<1x128xf32>
    %cst_139 = arith.constant dense<0.000000e+00> : vector<16xf32>
    %344 = vector.multi_reduction <add>, %339, %cst_139 [1] : vector<16x128xf32> to vector<16xf32>
    %345 = vector.shape_cast %344 : vector<16xf32> to vector<16x1xf32>
    %cst_140 = arith.constant 1.280000e+02 : f32
    %346 = vector.broadcast %cst_140 : f32 to vector<16x1xf32>
    %347 = arith.divf %345, %346 : vector<16x1xf32>
    %348 = arith.mulf %339, %339 : vector<16x128xf32>
    %cst_141 = arith.constant dense<0.000000e+00> : vector<16xf32>
    %349 = vector.multi_reduction <add>, %348, %cst_141 [1] : vector<16x128xf32> to vector<16xf32>
    %350 = vector.shape_cast %349 : vector<16xf32> to vector<16x1xf32>
    %cst_142 = arith.constant 1.280000e+02 : f32
    %351 = vector.broadcast %cst_142 : f32 to vector<16x1xf32>
    %352 = arith.divf %350, %351 : vector<16x1xf32>
    %353 = arith.mulf %347, %347 : vector<16x1xf32>
    %354 = arith.subf %352, %353 : vector<16x1xf32>
    %355 = vector.broadcast %347 : vector<16x1xf32> to vector<16x128xf32>
    %356 = arith.subf %339, %355 : vector<16x128xf32>
    %cst_143 = arith.constant 9.99999974E-6 : f32
    %357 = vector.broadcast %cst_143 : f32 to vector<16x1xf32>
    %358 = arith.addf %354, %357 : vector<16x1xf32>
    %359 = math.rsqrt %358 : vector<16x1xf32>
    %360 = vector.broadcast %359 : vector<16x1xf32> to vector<16x128xf32>
    %361 = arith.mulf %356, %360 : vector<16x128xf32>
    %362 = vector.broadcast %341 : vector<1x128xf32> to vector<16x128xf32>
    %363 = arith.mulf %361, %362 : vector<16x128xf32>
    %364 = vector.broadcast %343 : vector<1x128xf32> to vector<16x128xf32>
    %365 = arith.addf %363, %364 : vector<16x128xf32>
    %c0_144 = arith.constant 0 : index
    %c0_145 = arith.constant 0 : index
    %366 = vector.load %arg13[%c0_144, %c0_145] : memref<1x128xf32, #tpu.memory_space<vmem>>, vector<1x128xf32>
    %c0_146 = arith.constant 0 : index
    %c0_147 = arith.constant 0 : index
    %367 = vector.load %arg14[%c0_146, %c0_147] : memref<1x128xf32, #tpu.memory_space<vmem>>, vector<1x128xf32>
    %cst_148 = arith.constant dense<0.000000e+00> : vector<16xf32>
    %368 = vector.multi_reduction <add>, %365, %cst_148 [1] : vector<16x128xf32> to vector<16xf32>
    %369 = vector.shape_cast %368 : vector<16xf32> to vector<16x1xf32>
    %cst_149 = arith.constant 1.280000e+02 : f32
    %370 = vector.broadcast %cst_149 : f32 to vector<16x1xf32>
    %371 = arith.divf %369, %370 : vector<16x1xf32>
    %372 = arith.mulf %365, %365 : vector<16x128xf32>
    %cst_150 = arith.constant dense<0.000000e+00> : vector<16xf32>
    %373 = vector.multi_reduction <add>, %372, %cst_150 [1] : vector<16x128xf32> to vector<16xf32>
    %374 = vector.shape_cast %373 : vector<16xf32> to vector<16x1xf32>
    %cst_151 = arith.constant 1.280000e+02 : f32
    %375 = vector.broadcast %cst_151 : f32 to vector<16x1xf32>
    %376 = arith.divf %374, %375 : vector<16x1xf32>
    %377 = arith.mulf %371, %371 : vector<16x1xf32>
    %378 = arith.subf %376, %377 : vector<16x1xf32>
    %379 = vector.broadcast %371 : vector<16x1xf32> to vector<16x128xf32>
    %380 = arith.subf %365, %379 : vector<16x128xf32>
    %cst_152 = arith.constant 9.99999974E-6 : f32
    %381 = vector.broadcast %cst_152 : f32 to vector<16x1xf32>
    %382 = arith.addf %378, %381 : vector<16x1xf32>
    %383 = math.rsqrt %382 : vector<16x1xf32>
    %384 = vector.broadcast %383 : vector<16x1xf32> to vector<16x128xf32>
    %385 = arith.mulf %380, %384 : vector<16x128xf32>
    %386 = vector.broadcast %366 : vector<1x128xf32> to vector<16x128xf32>
    %387 = arith.mulf %385, %386 : vector<16x128xf32>
    %388 = vector.broadcast %367 : vector<1x128xf32> to vector<16x128xf32>
    %389 = arith.addf %387, %388 : vector<16x128xf32>
    %390 = arith.truncf %389 : vector<16x128xf32> to vector<16x128xbf16>
    %c0_153 = arith.constant 0 : index
    %c0_154 = arith.constant 0 : index
    %391 = vector.load %arg15[%c0_153, %c0_154] : memref<128x256xbf16, #tpu.memory_space<vmem>>, vector<128x256xbf16>
    %cst_155 = arith.constant dense<0.000000e+00> : vector<16x256xf32>
    %392 = tpu.matmul %390, %391, %cst_155 {dimension_numbers = #tpu.dot_dimension_numbers<[1], [0], [0], [1], [0, 0, 1, 1], [], []>} : vector<16x128xbf16>, vector<128x256xbf16>, vector<16x256xf32> -> vector<16x256xf32>
    %c0_156 = arith.constant 0 : index
    %c0_157 = arith.constant 0 : index
    %393 = vector.load %arg16[%c0_156, %c0_157] : memref<1x256xf32, #tpu.memory_space<vmem>>, vector<1x256xf32>
    %394 = vector.broadcast %393 : vector<1x256xf32> to vector<16x256xf32>
    %395 = arith.addf %392, %394 : vector<16x256xf32>
    %396 = vector.shape_cast %395 : vector<16x256xf32> to vector<2x8x256xf32>
    %c0_158 = arith.constant 0 : index
    %c0_159 = arith.constant 0 : index
    %c0_160 = arith.constant 0 : index
    %397 = vector.load %arg17[%c0_158, %c0_159, %c0_160] : memref<2x8x256xf32, #tpu.memory_space<vmem>>, vector<2x8x256xf32>
    tpu.vector_store %arg17[%c0_158, %c0_159, %c0_160], %396 {strides = array<i32>} : memref<2x8x256xf32, #tpu.memory_space<vmem>>, vector<2x8x256xf32>,
    return
  }
}

</mosaic_0001>

<bundles_post_ra>
// kernel: tpu_custom_call.1
= control target key start
LH: loop header
LB: loop body
LE: loop exit
PB: predicated region body
PF: predicated region fallthrough
CT: control target
= control target key end

     0   :  { %s11034_s0 = inlined_call_operand.hbm [shape: f32[2,8,128], index: 0, kind: input, shape index: {}]   ;;  %s11035_s1 = inlined_call_operand.hbm [shape: bf16[2,128,384], index: 1, kind: input, shape index: {}]   ;;  %s11036_s2 = inlined_call_operand.hbm [shape: f32[2,1,384], index: 2, kind: input, shape index: {}]   ;;  %s11037_s3 = inlined_call_operand.hbm [shape: bf16[2,128,128], index: 3, kind: input, shape index: {}]   ;;  %s11038_s4 = inlined_call_operand.vmem [shape: f32[2,1,128], index: 4, kind: input, shape index: {}]   ;;  %s11039_s5 = inlined_call_operand.vmem [shape: f32[2,1,128], index: 5, kind: input, shape index: {}]   ;;  %s11040_s6 = inlined_call_operand.hbm [shape: f32[2,1,128], index: 6, kind: input, shape index: {}]   ;;  %s11041_s7 = inlined_call_operand.hbm [shape: bf16[2,128,2048], index: 7, kind: input, shape index: {}]   ;;  %s11042_s8 = inlined_call_operand.hbm [shape: f32[2,1,2048], index: 8, kind: input, shape index: {}]   ;;  %s11043_s9 = inlined_call_operand.hbm [shape: bf16[2,2048,128], index: 9, kind: input, shape index: {}]   ;;  %s11044_s10 = inlined_call_operand.vmem [shape: f32[2,1,128], index: 10, kind: input, shape index: {}]   ;;  %s11045_s11 = inlined_call_operand.vmem [shape: f32[2,1,128], index: 11, kind: input, shape index: {}]   ;;  %s11046_s12 = inlined_call_operand.vmem [shape: f32[2,1,128], index: 12, kind: input, shape index: {}]   ;;  %s11047_s13 = inlined_call_operand.hbm [shape: f32[1,128], index: 13, kind: input, shape index: {}]   ;;  %s11048_s14 = inlined_call_operand.vmem [shape: f32[1,128], index: 14, kind: input, shape index: {}]   ;;  %s11049_s15 = inlined_call_operand.hbm [shape: bf16[128,256], index: 15, kind: input, shape index: {}]   ;;  %s11050_s16 = inlined_call_operand.vmem [shape: f32[1,256], index: 16, kind: input, shape index: {}]   ;;  %s11051_s17 = inlined_call_operand.hbm [shape: f32[2,8,256], index: 17, kind: output, shape index: {}]  }
   0x1   :  { %11052 = sst [smem:[#allocation27_spill]] %s11034_s0 }
   0x2   :  { %11053 = sst [smem:[#allocation28_spill]] %s11035_s1 }
   0x3   :  { %22 = vsyncpa [#allocation3], 0 }
   0x4   :  { %23 = vsyncpa [#allocation6], 0 }
   0x5   :  { %24 = vsyncpa [#allocation9], 0 }
   0x6   :  { %25 = vsyncpa [#allocation12], 0 }
   0x7   :  { %26 = vsyncpa [#allocation15], 0 }
   0x8   :  { %27 = vsyncpa [#allocation18], 0  ;;  %s11054_s26 = sld [smem:[#allocation28_spill]] }
   0xe   :  { %s46_s27 = sshll.u32 %s11054_s26, 4  ;;  %s47_s27 = int_to_ptr.hbm [resolvable:$true] %s46_s27 }
   0xf   :  { %28 = vsyncpa [#allocation4], 0  ;;  %s10388_s28 = smov [#allocation5]   ;;  %s72_s18 = sshll.u32 %s11037_s3, 4  ;;  %s73_s18 = int_to_ptr.hbm [resolvable:$true] %s72_s18 }
  0x10   :  { %s48_s29 = sshll.u32 %s10388_s28, 4  ;;  %s10389_s19 = smov 192   ;;  %s49_s29 = int_to_ptr.vmem [resolvable:$true] %s48_s29 }
  0x11   :  { %s10390_s1 = smov 12   ;;  %s10391_s20 = smov [#allocation8]  }
  0x12   :  { %54 = dma.hbm_to_vmem [thread:$0]  %s47_s27, 6144, %s49_s29, [#allocation6], %s10389_s19, %s10389_s19, %s10390_s1  }
  0x13   :  { %s74_s21 = sshll.u32 %s10391_s20, 4  ;;  %s10392_s22 = smov 64   ;;  %s75_s21 = int_to_ptr.vmem [resolvable:$true] %s74_s21 }
  0x14   :  { %s10393_s23 = smov 4   ;;  %s102_s26 = sshll.u32 %s11041_s7, 4  ;;  %s103_s26 = int_to_ptr.hbm [resolvable:$true] %s102_s26 }
  0x15   :  { %80 = dma.hbm_to_vmem [thread:$0]  %s73_s18, 2048, %s75_s21, [#allocation9], %s10392_s22, %s10392_s22, %s10393_s23  }
  0x16   :  { %s10394_s28 = smov [#allocation11]   ;;  %s10395_s3 = smov 1024  }
  0x17   :  { %s104_s0 = sshll.u32 %s10394_s28, 4  ;;  %s128_s30 = sshll.u32 %s11043_s9, 4  ;;  %s105_s0 = int_to_ptr.vmem [resolvable:$true] %s104_s0  ;;  %s129_s30 = int_to_ptr.hbm [resolvable:$true] %s128_s30 }
  0x18   :  { %110 = dma.hbm_to_vmem [thread:$0]  %s103_s26, 32768, %s105_s0, [#allocation12], %s10395_s3, %s10395_s3, %s10392_s22  }
  0x19   :  { %s10396_s19 = smov [#allocation14]   ;;  %s11055_s21 = sld [smem:[#allocation27_spill]] }
  0x1a   :  { %s130_s1 = sshll.u32 %s10396_s19, 4  ;;  %s10397_s7 = smov [#allocation2]   ;;  %s131_s1 = int_to_ptr.vmem [resolvable:$true] %s130_s1 }
  0x1b   :  { %136 = dma.hbm_to_vmem [thread:$0]  %s129_s30, 32768, %s131_s1, [#allocation15], %s10392_s22, %s10392_s22, %s10393_s23  }
  0x1c   :  { %s35_s25 = sshll.u32 %s10397_s7, 4  ;;  %s10398_s26 = smov 128   ;;  %s36_s25 = int_to_ptr.vmem [resolvable:$true] %s35_s25 }
  0x1d   :  { %s10399_s28 = smov 8   ;;  %s59_s3 = sshll.u32 %s11036_s2, 4  ;;  %s60_s3 = int_to_ptr.hbm [resolvable:$true] %s59_s3 }
  0x1e   :  { %s10400_s27 = smov [#allocation7]   ;;  %s89_s30 = sshll.u32 %s11040_s6, 4  ;;  %s90_s30 = int_to_ptr.hbm [resolvable:$true] %s89_s30 }
  0x1f   :  { %s33_s24 = sshll.u32 %s11055_s21, 4  ;;  %s61_s29 = sshll.u32 %s10400_s27, 4  ;;  %s34_s24 = int_to_ptr.hbm [resolvable:$true] %s33_s24  ;;  %s62_s29 = int_to_ptr.vmem [resolvable:$true] %s61_s29 }
  0x20   :  { %41 = dma.hbm_to_vmem [thread:$0]  %s34_s24, 256, %s36_s25, [#allocation3], %s10398_s26, %s10398_s26, %s10399_s28  }
  0x21   :  { %s10401_s1 = smov 48   ;;  %s10402_s18 = smov 3  }
  0x22   :  { %67 = dma.hbm_to_vmem [thread:$0]  %s60_s3, 96, %s62_s29, [#allocation6], %s10401_s1, %s10401_s1, %s10402_s18  }
  0x23   :  { %s10403_s20 = smov [#allocation10]   ;;  %s10404_s24 = smov 16  }
  0x24   :  { %s91_s21 = sshll.u32 %s10403_s20, 4  ;;  %s10405_s7 = smov 1   ;;  %s92_s21 = int_to_ptr.vmem [resolvable:$true] %s91_s21 }
  0x25   :  { %97 = dma.hbm_to_vmem [thread:$0]  %s90_s30, 32, %s92_s21, [#allocation9], %s10404_s24, %s10404_s24, %s10405_s7  }
  0x26   :  { %s115_s9 = sshll.u32 %s11042_s8, 4  ;;  %s10406_s0 = smov [#allocation13]   ;;  %s116_s9 = int_to_ptr.hbm [resolvable:$true] %s115_s9 }
  0x27   :  { %s117_s27 = sshll.u32 %s10406_s0, 4  ;;  %s10407_s6 = smov 256   ;;  %s118_s27 = int_to_ptr.vmem [resolvable:$true] %s117_s27 }
  0x28   :  { %123 = dma.hbm_to_vmem [thread:$0]  %s116_s9, 512, %s118_s27, [#allocation12], %s10407_s6, %s10407_s6, %s10404_s24  }
  0x29   :  { %s148_s19 = sshll.u32 %s11047_s13, 4  ;;  %s10408_s23 = smov [#allocation16]   ;;  %s149_s19 = int_to_ptr.hbm [resolvable:$true] %s148_s19 }
  0x2a   :  { %s150_s30 = sshll.u32 %s10408_s23, 4  ;;  %s160_s8 = sshll.u32 %s11049_s15, 4  ;;  %s151_s30 = int_to_ptr.vmem [resolvable:$true] %s150_s30  ;;  %s161_s8 = int_to_ptr.hbm [resolvable:$true] %s160_s8 }
  0x2b   :  { %153 = dma.hbm_to_vmem [thread:$0]  %s149_s19, 16, %s151_s30, [#allocation15]  }
  0x2c   :  { %s10409_s20 = smov [#allocation17]  }
  0x2d   :  { %s162_s21 = sshll.u32 %s10409_s20, 4  ;;  %s163_s21 = int_to_ptr.vmem [resolvable:$true] %s162_s21 }
  0x2e   :  { %168 = dma.hbm_to_vmem [thread:$0]  %s161_s8, 2048, %s163_s21, [#allocation18], %s10398_s26, %s10398_s26, %s10399_s28  }
  0x2f   :  { %10374 = dma.done.wait [#allocation3], 256  }
  0x30   :  { %10375 = vsyncadd [#allocation3], 4294967040 }
  0x31   :  { %10376 = dma.done.wait [#allocation6], 6240  }
  0x32   :  { %10377 = vsyncadd [#allocation6], 4294961056 }
  0x33   :  { %10378 = dma.done.wait [#allocation9], 2080  }
  0x34   :  { %10379 = vsyncadd [#allocation9], 4294965216 }
  0x35   :  { %10380 = dma.done.wait [#allocation12], 33280  }
  0x36   :  { %10381 = vsyncadd [#allocation12], 4294934016 }
  0x37   :  { %10382 = dma.done.wait [#allocation15], 32784  }
  0x38   :  { %10383 = vsyncadd [#allocation15], 4294934512 }
  0x39   :  { %10384 = dma.done.wait [#allocation18], 2048  }
  0x3a   :  { %10385 = vsyncadd [#allocation18], 4294965248  ;;  %v7065_v0 = vld [vmem:[#allocation5 + $0xa8] sm:$0xf]  ;;  %v9414_v1 = vld [vmem:[#allocation5 + $0xb0] sm:$0xf0] }
  0x3b   :  { %v9413_v2 = vld [vmem:[#allocation5 + $0xac] sm:$0xf]  ;;  %v7066_v3 = vor.u32 %v9414_v1, %v7065_v0  ;;  %v7067_v4 = vld [vmem:[#allocation5 + $0xb4] sm:$0xf0]  ;;  %v7053_v5 = vld [vmem:[#allocation5 + $0x90] sm:$0xf] }
  0x3c   :  { %v9411_v6 = vld [vmem:[#allocation5 + $0x98] sm:$0xf0]  ;;  %v7070_v7 = vor.u32 %v9413_v2, %v7067_v4  ;;  %v9410_v8 = vld [vmem:[#allocation5 + $0x94] sm:$0xf]  ;;  %v7055_v9 = vld [vmem:[#allocation5 + $0x9c] sm:$0xf0] }
  0x3d   :  { %383 = vmatpush.bf16.msra.mxu0 %v7066_v3  ;;  %v7054_v10 = vor.u32 %v9411_v6, %v7053_v5  ;;  %v7058_v11 = vor.u32 %v9410_v8, %v7055_v9  ;;  %v7041_v12 = vld [vmem:[#allocation5 + $0x78] sm:$0xf]  ;;  %v9408_v13 = vld [vmem:[#allocation5 + $0x80] sm:$0xf0]  ;;  %v9407_v14 = vld [vmem:[#allocation5 + $0x7c] sm:$0xf] }
  0x3e   :  { %397 = vmatpush.bf16.msra.mxu1 %v7070_v7  ;;  %v7043_v15 = vld [vmem:[#allocation5 + $0x84] sm:$0xf0]  ;;  %v7042_v16 = vor.u32 %v9408_v13, %v7041_v12  ;;  %v7029_v18 = vld [vmem:[#allocation5 + $0x60] sm:$0xf]  ;;  %v9405_v19 = vld [vmem:[#allocation5 + $0x68] sm:$0xf0] }
  0x3f   :  { %v7046_v17 = vor.u32 %v9407_v14, %v7043_v15  ;;  %v9404_v20 = vld [vmem:[#allocation5 + $0x64] sm:$0xf]  ;;  %v7031_v21 = vld [vmem:[#allocation5 + $0x6c] sm:$0xf0]  ;;  %v7030_v22 = vor.u32 %v9405_v19, %v7029_v18  ;;  %v7017_v23 = vld [vmem:[#allocation5 + $0x48] sm:$0xf] }
  0x40   :  { %v7073_v24 = vld [vmem:[#allocation5 + $0xb0] sm:$0xf]  ;;  %v9415_v25 = vld [vmem:[#allocation5 + $0xb8] sm:$0xf0]  ;;  %v7034_v26 = vor.u32 %v9404_v20, %v7031_v21  ;;  %v9402_v27 = vld [vmem:[#allocation5 + $0x50] sm:$0xf0] }
  0x41   :  { %384 = vmatpush.bf16.msra.mxu0 %v7054_v10  ;;  %v7074_v28 = vor.u32 %v9415_v25, %v7073_v24  ;;  %v7061_v29 = vld [vmem:[#allocation5 + $0x98] sm:$0xf]  ;;  %v9412_v30 = vld [vmem:[#allocation5 + $0xa0] sm:$0xf0]  ;;  %v9401_v31 = vld [vmem:[#allocation5 + $0x4c] sm:$0xf]  ;;  %v7018_v34 = vor.u32 %v9402_v27, %v7017_v23 }
  0x42   :  { %398 = vmatpush.bf16.msra.mxu1 %v7058_v11  ;;  %v7019_v32 = vld [vmem:[#allocation5 + $0x54] sm:$0xf0]  ;;  %v7062_v33 = vor.u32 %v9412_v30, %v7061_v29  ;;  %v7005_v35 = vld [vmem:[#allocation5 + $0x30] sm:$0xf]  ;;  %v7049_v36 = vld [vmem:[#allocation5 + $0x80] sm:$0xf] }
  0x43   :  { %411 = vmatpush.bf16.msra.mxu2 %v7074_v28  ;;  %v9409_v37 = vld [vmem:[#allocation5 + $0x88] sm:$0xf0]  ;;  %v7022_v38 = vor.u32 %v9401_v31, %v7019_v32  ;;  %v9399_v39 = vld [vmem:[#allocation5 + $0x38] sm:$0xf0]  ;;  %v9398_v40 = vld [vmem:[#allocation5 + $0x34] sm:$0xf] }
  0x44   :  { %v7007_v41 = vld [vmem:[#allocation5 + $0x3c] sm:$0xf0]  ;;  %v7037_v42 = vld [vmem:[#allocation5 + $0x68] sm:$0xf]  ;;  %v9406_v43 = vld [vmem:[#allocation5 + $0x70] sm:$0xf0]  ;;  %v7050_v46 = vor.u32 %v9409_v37, %v7049_v36  ;;  %v7006_v47 = vor.u32 %v9399_v39, %v7005_v35 }
  0x45   :  { %385 = vmatpush.bf16.msra.mxu0 %v7042_v16  ;;  %v6993_v44 = vld [vmem:[#allocation5 + $0x18] sm:$0xf]  ;;  %v9396_v45 = vld [vmem:[#allocation5 + $0x20] sm:$0xf0]  ;;  %v9395_v48 = vld [vmem:[#allocation5 + $0x1c] sm:$0xf]  ;;  %v7010_v50 = vor.u32 %v9398_v40, %v7007_v41  ;;  %v7038_v51 = vor.u32 %v9406_v43, %v7037_v42 }
  0x46   :  { %399 = vmatpush.bf16.msra.mxu1 %v7046_v17  ;;  %v6995_v49 = vld [vmem:[#allocation5 + $0x24] sm:$0xf0]  ;;  %v6994_v52 = vor.u32 %v9396_v45, %v6993_v44  ;;  %v7025_v53 = vld [vmem:[#allocation5 + $0x50] sm:$0xf]  ;;  %v9403_v54 = vld [vmem:[#allocation5 + $0x58] sm:$0xf0] }
  0x47   :  { %412 = vmatpush.bf16.msra.mxu2 %v7062_v33  ;;  %v6998_v55 = vor.u32 %v9395_v48, %v6995_v49  ;;  %v6981_v56 = vld [vmem:[#allocation5] sm:$0xf]  ;;  %v9393_v57 = vld [vmem:[#allocation5 + $0x8] sm:$0xf0]  ;;  %v9392_v58 = vld [vmem:[#allocation5 + $0x4] sm:$0xf]  ;;  %v7026_v61 = vor.u32 %v9403_v54, %v7025_v53 }
  0x48   :  { %v6983_v59 = vld [vmem:[#allocation5 + $0xc] sm:$0xf0]  ;;  %v6982_v62 = vor.u32 %v9393_v57, %v6981_v56  ;;  %v10552_v63 = vld [vmem:[#allocation2 + $0x8] sm:$0xff]  ;;  %v9400_v1 = vld [vmem:[#allocation5 + $0x40] sm:$0xf0]  ;;  %vm449_vm0 = vcmask 261120  }
  0x49   :  { %386 = vmatpush.bf16.msra.mxu0 %v7030_v22  ;;  %v10550_v60 = vld [vmem:[#allocation2] sm:$0xff]  ;;  %v7013_v0 = vld [vmem:[#allocation5 + $0x38] sm:$0xf]  ;;  %v6986_v2 = vor.u32 %v9392_v58, %v6983_v59  ;;  %v7001_v5 = vld [vmem:[#allocation5 + $0x20] sm:$0xf]  ;;  %s10410_s13 = smov 96  }
  0x4a   :  { %400 = vmatpush.bf16.msra.mxu1 %v7034_v26  ;;  %v214_v3 = vpack.c.bf16 %v10552_v63, %v10550_v60  ;;  %v7014_v4 = vor.u32 %v9400_v1, %v7013_v0  ;;  %v9397_v6 = vld [vmem:[#allocation5 + $0x28] sm:$0xf0]  ;;  %v6989_v8 = vld [vmem:[#allocation5 + $0x8] sm:$0xf]  ;;  %v9394_v9 = vld [vmem:[#allocation5 + $0x10] sm:$0xf0] }
  0x4b   :  { %413 = vmatpush.bf16.msra.mxu2 %v7050_v46  ;;  %v7002_v7 = vor.u32 %v9397_v6, %v7001_v5  ;;  %v6990_v10 = vor.u32 %v9394_v9, %v6989_v8  ;;  %v247_v11 = vld [vmem:[#allocation7] sm:$0x7]  ;;  %vm516_vm1 = vcmask 1043456   ;;  %vm488_vm2 = vcmask 64512   ;;  %s10411_s15 = smov 32   ;;  %s6961_s28 = sshll.u32 %s11051_s17, 4  ;;  %s6962_s28 = int_to_ptr.hbm [resolvable:$true] %s6961_s28 }
  0x4c   :  { %v249_v12 = vperm.slane %v247_v11, 0  ;;  %v250_v13 = vperm.slane %v247_v11, 1 }
  0x4d   :  { %387 = vmatpush.bf16.msra.mxu0 %v7018_v34 }
  0x4e   :  { %401 = vmatpush.bf16.msra.mxu1 %v7022_v38  ;;  %v251_v38 = vperm.slane %v247_v11, 2 }
  0x4f   :  { %414 = vmatpush.bf16.msra.mxu2 %v7038_v51 }
  0x51   :  { %388 = vmatpush.bf16.msra.mxu0 %v7006_v47 }
  0x52   :  { %402 = vmatpush.bf16.msra.mxu1 %v7010_v50 }
  0x53   :  { %415 = vmatpush.bf16.msra.mxu2 %v7026_v61 }
  0x55   :  { %389 = vmatpush.bf16.msra.mxu0 %v6994_v52 }
  0x56   :  { %403 = vmatpush.bf16.msra.mxu1 %v6998_v55 }
  0x57   :  { %416 = vmatpush.bf16.msra.mxu2 %v7014_v4 }
  0x59   :  { %390 = vmatpush.bf16.msra.mxu0 %v6982_v62 }
  0x5a   :  { %404 = vmatpush.bf16.msra.mxu1 %v6986_v2 }
  0x5b   :  { %417 = vmatpush.bf16.msra.mxu2 %v7002_v7 }
  0x5c   :  { %391 = vmatmul.bf16.vlgmr.msra.gmra.mxu0 %v214_v3 }
  0x5d   :  { %405 = vmatmul.bf16.vlgmr.msra.gmra.mxu1 %v214_v3 }
  0x5f   :  { %418 = vmatpush.bf16.msra.mxu2 %v6990_v10 }
  0x62   :  { %419 = vmatmul.bf16.vlgmr.msra.gmra.mxu2 %v214_v3 }
  0xd9   :  { %v392_v14 = vpop.f32.mrf.mxu0 }
  0xda   :  { %v393_v15 = vadd.f32 %v392_v14, %v249_v12  ;;  %v406_v16 = vpop.f32.mrf.mxu1 }
  0xdb   :  { %v407_v17 = vadd.f32 %v406_v16, %v250_v13 }
  0xdc   :  { %v425_v18 = vmul.f32 0.17677669, %v393_v15 }
  0xdd   :  { %v429_v19 = vpack.c.bf16 %v407_v17, %v407_v17 }
  0xde   :  { %v427_v20 = vpack.c.bf16 %v425_v18, %v425_v18 }
  0xdf   :  { %v559_v21 = vunpack.c.l.b16 %v429_v19  ;;  %v454_v22 = vsel %vm449_vm0, %v429_v19, 0 }
  0xe0   :  { %463 = vmatpush.bf16.xpose.msrb.mxu2 %v454_v22  ;;  %v554_v27 = vunpack.c.l.b16 %v427_v20 }
  0xe1   :  { %v10557_v23 = vpack.c.b16 %v559_v21, %v559_v21  ;;  %v394_v24 = vpop.f32.mrf.mxu0 }
  0xe2   :  { %v395_v25 = vadd.f32 %v394_v24, %v249_v12  ;;  %v408_v26 = vpop.f32.mrf.mxu1  ;;  %v10563_v33 = vpack.c.b16 %v554_v27, %v554_v27 }
  0xe3   :  { %v409_v28 = vadd.f32 %v408_v26, %v250_v13  ;;  %561 = vrot.lane.b32.xlu1 %v10557_v23, %s10410_s13 }
  0xe4   :  { %v426_v29 = vmul.f32 0.17677669, %v395_v25 }
  0xe5   :  { %v430_v30 = vpack.c.bf16 %v409_v28, %v409_v28  ;;  %v420_v39 = vpop.f32.mrf.mxu2 }
  0xe6   :  { %v428_v34 = vpack.c.bf16 %v426_v29, %v426_v29  ;;  %v421_v40 = vadd.f32 %v420_v39, %v251_v38 }
  0xe7   :  { %7075 = vmatmul.msk.bf16.vlgmr.msrb.gmra.mxu2 %vm449_vm0, %v427_v20  ;;  %v473_v31 = vsel %vm449_vm0, %v430_v30, 0  ;;  %v588_v32 = vunpack.c.l.b16 %v430_v30  ;;  %v9417_v30 = vld [vmem:[#allocation8 + $0x8] sm:$0xff] }
  0xe8   :  { %482 = vmatpush.bf16.xpose.msra.mxu3 %v473_v31  ;;  %v583_v36 = vunpack.c.l.b16 %v428_v34  ;;  %v431_v1 = vpack.c.bf16 %v421_v40, %v421_v40  ;;  %v9416_v31 = vld [vmem:[#allocation8] sm:$0xff] }
  0xe9   :  { %v10565_v35 = vpack.c.b16 %v588_v32, %v588_v32 }
  0xea   :  { %v10572_v37 = vpack.c.b16 %v583_v36, %v583_v36  ;;  %v636_v2 = vunpack.c.l.b16 %v431_v1  ;;  %v518_v4 = vsel %vm516_vm1, %v431_v1, 0 }
  0xeb   :  { %590 = vrot.lane.b32.xlu2 %v10565_v35, %s10410_s13  ;;  %556 = vrot.lane.b32.xlu1 %v10563_v33, %s10410_s13 }
  0xec   :  { %v10588_v3 = vpack.c.b16 %v636_v2, %v636_v2 }
  0xed   :  { %v422_v41 = vpop.f32.mrf.mxu2 }
  0xee   :  { %v423_v42 = vadd.f32 %v422_v41, %v251_v38 }
  0xef   :  { %7076 = vmatmul.msk.bf16.vlgmr.msra.gmra.mxu3 %vm449_vm0, %v428_v34 }
  0xf0   :  { %v10576_v43 = vpack.c.bf16 %v423_v42, %v423_v42  ;;  %527 = vmatpush.bf16.msrb.mxu3 %v518_v4 }
  0xf2   :  { %v537_v44 = vsel %vm516_vm1, %v10576_v43, 0  ;;  %v660_v28 = vunpack.c.l.b16 %v10576_v43 }
  0xf3   :  { %585 = vrot.lane.b32.xlu2 %v10572_v37, %s10410_s13  ;;  %546 = vmatpush.bf16.msrb.mxu1 %v537_v44 }
  0xf4   :  { %v10608_v29 = vpack.c.b16 %v660_v28, %v660_v28 }
 0x145   :  { %v591_v45 = vpop.permute.xlu2 %590 }
 0x146   :  { %v596_v46 = vsel %vm449_vm0, %v591_v45, 0 }
 0x147   :  { %605 = vmatpush.bf16.xpose.msra.mxu2 %v596_v46 }
 0x14d   :  { %v586_v47 = vpop.permute.xlu2 %585 }
 0x14e   :  { %7080 = vmatmul.msk.bf16.vlgmr.msra.gmra.mxu2 %vm449_vm0, %v586_v47 }
 0x14f   :  { %734 = vmatpush.bf16.msrb.mxu2 %v9417_v30 }
 0x153   :  { %735 = vmatpush.bf16.msrb.mxu2 %v9416_v31 }
 0x155   :  { %v562_v48 = vpop.permute.xlu1 %561 }
 0x156   :  { %v567_v49 = vsel %vm449_vm0, %v562_v48, 0 }
 0x157   :  { %576 = vmatpush.bf16.xpose.msra.mxu1 %v567_v49 }
 0x15d   :  { %v557_v14 = vpop.permute.xlu1 %556 }
 0x16a   :  { %v465_v50 = vpop.f32.mrf.mxu2 }
 0x16b   :  { %v489_v0 = vsel %vm488_vm2, %v465_v50, -inf }
 0x172   :  { %v467_v51 = vpop.f32.mrf.mxu2  ;;  %v484_v52 = vpop.f32.mrf.mxu3 }
 0x173   :  { %v492_v53 = vsel %vm488_vm2, %v484_v52, -inf }
 0x174   :  { %493 = vmax.xlane.f32.xlu0 %v492_v53 }
 0x17a   :  { %v486_v54 = vpop.f32.mrf.mxu3 }
 0x1d1   :  { %v10584_v55 = vpop.f32.mrf.mxu2 }
 0x1d2   :  { %v614_v27 = vsel %vm488_vm2, %v10584_v55, -inf }
 0x1d9   :  { %v609_v56 = vpop.f32.mrf.mxu2 }
 0x1e7   :  { %v494_v57 = vpop.xlane.xlu0 %493 }
 0x1e8   :  { %v496_v58 = vsub.f32 %v484_v52, %v494_v57 }
 0x1ea   :  { %v499_v59 = vmul.f32 1.442695, %v496_v58 }
 0x1ec   :  { %10024 = vpow2.f32 %v499_v59  ;;  %v9418_v59 = vld [vmem:[#allocation8 + $0x10] sm:$0xff] }
 0x1f2   :  { %v10025_v61 = vpop.eup %10024 }
 0x1f3   :  { %v504_v62 = vsel %vm488_vm2, %v10025_v61, 0.0 }
 0x1f4   :  { %505 = vadd.xlane.f32.xlu0 %v504_v62 }
 0x1fc   :  { %490 = vmax.xlane.f32.xlu0 %v489_v0 }
 0x210   :  { %638 = vrot.lane.b32.xlu0 %v10588_v3, %s10410_s13 }
 0x267   :  { %v506_v5 = vpop.xlane.xlu0 %505 }
 0x268   :  { %10026 = vrcp.f32 %v506_v5 }
 0x26e   :  { %v10027_v6 = vpop.eup %10026 }
 0x26f   :  { %v510_v7 = vmul.f32 %v10027_v6, %v10025_v61  ;;  %v491_v8 = vpop.xlane.xlu0 %490 }
 0x270   :  { %v495_v9 = vsub.f32 %v465_v50, %v491_v8 }
 0x271   :  { %v512_v10 = vpack.c.bf16 %v510_v7, %v510_v7 }
 0x272   :  { %v497_v11 = vmul.f32 1.442695, %v495_v9 }
 0x273   :  { %7078 = vmatmul.msk.bf16.vlgmr.msrb.gmra.mxu1 %vm488_vm2, %v512_v10 }
 0x274   :  { %10028 = vpow2.f32 %v497_v11 }
 0x27a   :  { %v10029_v12 = vpop.eup %10028 }
 0x27b   :  { %v501_v13 = vsel %vm488_vm2, %v10029_v12, 0.0 }
 0x27c   :  { %502 = vadd.xlane.f32.xlu2 %v501_v13 }
 0x282   :  { %v639_v15 = vpop.permute.xlu0 %638 }
 0x283   :  { %7079 = vmatmul.msk.bf16.vlgmr.msra.gmra.mxu1 %vm449_vm0, %v557_v14  ;;  %v644_v16 = vsel %vm516_vm1, %v639_v15, 0 }
 0x284   :  { %653 = vmatpush.bf16.msra.mxu3 %v644_v16 }
 0x294   :  { %742 = vrot.lane.b32.xlu2 %v10563_v33, %s10392_s22 }
 0x29c   :  { %767 = vrot.lane.b32.xlu2 %v10565_v35, %s10392_s22 }
 0x2a4   :  { %765 = vrot.lane.b32.xlu2 %v10572_v37, %s10392_s22 }
 0x2ef   :  { %v503_v17 = vpop.xlane.xlu2 %502 }
 0x2f0   :  { %10030 = vrcp.f32 %v503_v17  ;;  %v548_v18 = vpop.f32.mrf.mxu1 }
 0x2f6   :  { %v10031_v19 = vpop.eup %10030 }
 0x2f7   :  { %v509_v20 = vmul.f32 %v10031_v19, %v10029_v12  ;;  %v743_v43 = vpop.permute.xlu2 %742 }
 0x2f8   :  { %v550_v21 = vpop.f32.mrf.mxu1 }
 0x2f9   :  { %v511_v22 = vpack.c.bf16 %v509_v20, %v509_v20 }
 0x2fb   :  { %7077 = vmatmul.msk.bf16.vlgmr.msrb.gmra.mxu3 %vm488_vm2, %v511_v22 }
 0x2ff   :  { %v768_v45 = vpop.permute.xlu2 %767 }
 0x300   :  { %v578_v24 = vpop.f32.mrf.mxu1  ;;  %v773_v48 = vsel %vm449_vm0, %v768_v45, 0 }
 0x301   :  { %v611_v25 = vsel %vm488_vm2, %v578_v24, -inf }
 0x302   :  { %612 = vmax.xlane.f32.xlu1 %v611_v25 }
 0x307   :  { %v766_v2 = vpop.permute.xlu2 %765 }
 0x308   :  { %v580_v26 = vpop.f32.mrf.mxu1 }
 0x30a   :  { %615 = vmax.xlane.f32.xlu1 %v614_v27 }
 0x323   :  { %662 = vrot.lane.b32.xlu1 %v10608_v29, %s10410_s13 }
 0x375   :  { %v613_v32 = vpop.xlane.xlu1 %612 }
 0x376   :  { %v617_v34 = vsub.f32 %v578_v24, %v613_v32 }
 0x378   :  { %v619_v36 = vmul.f32 1.442695, %v617_v34 }
 0x37a   :  { %10032 = vpow2.f32 %v619_v36 }
 0x37d   :  { %v616_v44 = vpop.xlane.xlu1 %615 }
 0x37e   :  { %v529_v38 = vpop.f32.mrf.mxu3  ;;  %v618_v49 = vsub.f32 %v10584_v55, %v616_v44 }
 0x37f   :  { %v552_v39 = vpack.c.bf16 %v548_v18, %v529_v38 }
 0x380   :  { %v10033_v40 = vpop.eup %10032  ;;  %v621_v50 = vmul.f32 1.442695, %v618_v49 }
 0x381   :  { %7100 = vmatmul.msk.bf16.vlgmr.msrb.gmra.mxu2 %vm449_vm0, %v552_v39  ;;  %v623_v41 = vsel %vm488_vm2, %v10033_v40, 0.0 }
 0x382   :  { %624 = vadd.xlane.f32.xlu0 %v623_v41  ;;  %10034 = vpow2.f32 %v621_v50 }
 0x386   :  { %v531_v42 = vpop.f32.mrf.mxu3 }
 0x388   :  { %v10035_v51 = vpop.eup %10034 }
 0x389   :  { %v626_v52 = vsel %vm488_vm2, %v10035_v51, 0.0 }
 0x395   :  { %v663_v46 = vpop.permute.xlu1 %662 }
 0x396   :  { %744 = vrot.lane.b32.xlu0 %v10557_v23, %s10392_s22  ;;  %v668_v47 = vsel %vm516_vm1, %v663_v46, 0 }
 0x397   :  { %677 = vmatpush.bf16.msrb.mxu0 %v668_v47 }
 0x39b   :  { %782 = vmatpush.bf16.xpose.msra.mxu0 %v773_v48 }
 0x3c0   :  { %627 = vadd.xlane.f32.xlu0 %v626_v52 }
 0x3d4   :  { %812 = vrot.lane.b32.xlu0 %v10588_v3, %s10392_s22 }
 0x3dc   :  { %888 = vrot.lane.b32.xlu0 %v10557_v23, %s10411_s15  ;;  %v9419_v23 = vld [vmem:[#allocation8 + $0x18] sm:$0xff] }
 0x3dd   :  { %705 = vmatpush.bf16.msrb.mxu1 %v9419_v23 }
 0x3e1   :  { %706 = vmatpush.bf16.msrb.mxu1 %v9418_v59 }
 0x3e4   :  { %911 = vrot.lane.b32.xlu0 %v10565_v35, %s10411_s15 }
 0x3ec   :  { %909 = vrot.lane.b32.xlu0 %v10572_v37, %s10411_s15 }
 0x3f5   :  { %v625_v53 = vpop.xlane.xlu0 %624 }
 0x3f6   :  { %10036 = vrcp.f32 %v625_v53 }
 0x3fc   :  { %v10037_v54 = vpop.eup %10036 }
 0x3fd   :  { %v631_v55 = vmul.f32 %v10037_v54, %v10033_v40 }
 0x3ff   :  { %v633_v56 = vpack.c.bf16 %v631_v55, %v631_v55 }
 0x401   :  { %7081 = vmatmul.msk.bf16.vlgmr.msra.gmra.mxu3 %vm488_vm2, %v633_v56 }
 0x408   :  { %v745_v57 = vpop.permute.xlu0 %744 }
 0x409   :  { %v750_v58 = vsel %vm449_vm0, %v745_v57, 0 }
 0x40a   :  { %759 = vmatpush.bf16.xpose.msrb.mxu3 %v750_v58 }
 0x411   :  { %7101 = vmatmul.msk.bf16.vlgmr.msrb.gmra.mxu3 %vm449_vm0, %v743_v43 }
 0x433   :  { %v628_v35 = vpop.xlane.xlu0 %627 }
 0x434   :  { %10038 = vrcp.f32 %v628_v35  ;;  %v9421_v35 = vld [vmem:[#allocation8 + $0x28] sm:$0xff] }
 0x435   :  { %876 = vmatpush.bf16.msra.mxu3 %v9421_v35  ;;  %v7457_v35 = vld [vmem:[#allocation11 + $0x288] sm:$0xf] }
 0x43a   :  { %v10039_v37 = vpop.eup %10038 }
 0x43b   :  { %v632_v61 = vmul.f32 %v10039_v37, %v10035_v51  ;;  %v9420_v37 = vld [vmem:[#allocation8 + $0x20] sm:$0xff] }
 0x43c   :  { %877 = vmatpush.bf16.msra.mxu3 %v9420_v37 }
 0x43d   :  { %v634_v62 = vpack.c.bf16 %v632_v61, %v632_v61  ;;  %v737_v61 = vpop.f32.mrf.mxu2 }
 0x43f   :  { %7082 = vmatmul.msk.bf16.vlgmr.msrb.gmra.mxu0 %vm488_vm2, %v634_v62 }
 0x446   :  { %v813_v0 = vpop.permute.xlu0 %812 }
 0x447   :  { %v818_v1 = vsel %vm516_vm1, %v813_v0, 0 }
 0x448   :  { %827 = vmatpush.bf16.msra.mxu1 %v818_v1  ;;  %v10658_v1 = vpop.f32.mrf.mxu2 }
 0x44e   :  { %v889_v4 = vpop.permute.xlu0 %888 }
 0x44f   :  { %v894_v5 = vsel %vm449_vm0, %v889_v4, 0  ;;  %7102 = vmatmul.msk.bf16.vlgmr.msra.gmra.mxu0 %vm449_vm0, %v766_v2 }
 0x450   :  { %903 = vmatpush.bf16.xpose.msrb.mxu0 %v894_v5 }
 0x456   :  { %v912_v11 = vpop.permute.xlu0 %911 }
 0x457   :  { %v917_v14 = vsel %vm449_vm0, %v912_v11, 0 }
 0x45e   :  { %v910_v42 = vpop.permute.xlu0 %909 }
 0x484   :  { %v655_v6 = vpop.f32.mrf.mxu3 }
 0x48c   :  { %v657_v7 = vpop.f32.mrf.mxu3 }
 0x494   :  { %v761_v8 = vpop.f32.mrf.mxu3 }
 0x495   :  { %v788_v9 = vsel %vm488_vm2, %v761_v8, -inf }
 0x496   :  { %789 = vmax.xlane.f32.xlu1 %v788_v9 }
 0x49c   :  { %v763_v10 = vpop.f32.mrf.mxu3 }
 0x4af   :  { %886 = vrot.lane.b32.xlu1 %v10563_v33, %s10411_s15 }
 0x4bc   :  { %v679_v12 = vpop.f32.mrf.mxu0 }
 0x4bd   :  { %v683_v13 = vpack.c.bf16 %v679_v12, %v655_v6 }
 0x4bf   :  { %7091 = vmatmul.msk.bf16.vlgmr.msrb.gmra.mxu1 %vm449_vm0, %v683_v13  ;;  %v9423_v13 = vld [vmem:[#allocation8 + $0x38] sm:$0xff] }
 0x4c0   :  { %926 = vmatpush.bf16.xpose.msrb.mxu1 %v917_v14  ;;  %1020 = vmatpush.bf16.msra.mxu0 %v9423_v13  ;;  %v7395_v13 = vld [vmem:[#allocation11 + $0x248] sm:$0xf0] }
 0x4c4   :  { %v681_v15 = vpop.f32.mrf.mxu0 }
 0x4cc   :  { %v784_v16 = vpop.f32.mrf.mxu0 }
 0x4cd   :  { %v791_v33 = vsel %vm488_vm2, %v784_v16, -inf }
 0x4d4   :  { %v786_v17 = vpop.f32.mrf.mxu0 }
 0x509   :  { %v790_v18 = vpop.xlane.xlu1 %789 }
 0x50a   :  { %v794_v19 = vsub.f32 %v761_v8, %v790_v18 }
 0x50c   :  { %v796_v20 = vmul.f32 1.442695, %v794_v19 }
 0x50e   :  { %10040 = vpow2.f32 %v796_v20 }
 0x514   :  { %v10041_v21 = vpop.eup %10040 }
 0x515   :  { %v800_v22 = vsel %vm488_vm2, %v10041_v21, 0.0 }
 0x516   :  { %801 = vadd.xlane.f32.xlu2 %v800_v22 }
 0x51e   :  { %792 = vmax.xlane.f32.xlu2 %v791_v33 }
 0x521   :  { %v887_v24 = vpop.permute.xlu1 %886 }
 0x522   :  { %7114 = vmatmul.msk.bf16.vlgmr.msrb.gmra.mxu0 %vm449_vm0, %v887_v24 }
 0x536   :  { %833 = vrot.lane.b32.xlu2 %v10608_v29, %s10392_s22 }
 0x53c   :  { %v708_v44 = vpop.f32.mrf.mxu1 }
 0x544   :  { %v10652_v45 = vpop.f32.mrf.mxu1 }
 0x589   :  { %v802_v25 = vpop.xlane.xlu2 %801 }
 0x58a   :  { %10042 = vrcp.f32 %v802_v25 }
 0x590   :  { %v10043_v26 = vpop.eup %10042 }
 0x591   :  { %v808_v27 = vmul.f32 %v10043_v26, %v10041_v21  ;;  %v793_v28 = vpop.xlane.xlu2 %792 }
 0x592   :  { %v795_v30 = vsub.f32 %v784_v16, %v793_v28  ;;  %v738_v16 = vadd.f32 %v737_v61, %v708_v44  ;;  %v7513_v44 = vld [vmem:[#allocation11 + $0x300] sm:$0xf]  ;;  %v9513_v61 = vld [vmem:[#allocation11 + $0x2c4] sm:$0xf0] }
 0x593   :  { %v810_v31 = vpack.c.bf16 %v808_v27, %v808_v27 }
 0x594   :  { %v798_v32 = vmul.f32 1.442695, %v795_v30  ;;  %v7577_v30 = vld [vmem:[#allocation11 + $0x380] sm:$0xf] }
 0x595   :  { %7103 = vmatmul.msk.bf16.vlgmr.msra.gmra.mxu1 %vm488_vm2, %v810_v31  ;;  %v9544_v31 = vld [vmem:[#allocation11 + $0x3bc] sm:$0xf0] }
 0x596   :  { %10044 = vpow2.f32 %v798_v32  ;;  %v9536_v32 = vld [vmem:[#allocation11 + $0x384] sm:$0xf] }
 0x599   :  { %v834_v34 = vpop.permute.xlu2 %833 }
 0x59a   :  { %v839_v36 = vsel %vm516_vm1, %v834_v34, 0  ;;  %v7578_v34 = vor.u32 %v9544_v31, %v7577_v30  ;;  %v9472_v31 = vld [vmem:[#allocation11 + $0x184] sm:$0xf] }
 0x59b   :  { %848 = vmatpush.bf16.msra.mxu2 %v839_v36  ;;  %v7579_v36 = vld [vmem:[#allocation11 + $0x3c0] sm:$0xf0] }
 0x59c   :  { %v10045_v38 = vpop.eup %10044  ;;  %1906 = vmatpush.bf16.msra.mxu1 %v7578_v34  ;;  %v7323_v34 = vld [vmem:[#allocation11 + $0x1c0] sm:$0xf0] }
 0x59d   :  { %v803_v39 = vsel %vm488_vm2, %v10045_v38, 0.0 }
 0x59e   :  { %804 = vadd.xlane.f32.xlu0 %v803_v39  ;;  %v9545_v39 = vld [vmem:[#allocation11 + $0x3c4] sm:$0xf0] }
 0x59f   :  { %v905_v40 = vpop.f32.mrf.mxu0 }
 0x5a0   :  { %v932_v41 = vsel %vm488_vm2, %v905_v40, -inf }
 0x5a1   :  { %933 = vmax.xlane.f32.xlu1 %v932_v41 }
 0x5a5   :  { %7115 = vmatmul.msk.bf16.vlgmr.msrb.gmra.mxu1 %vm449_vm0, %v910_v42  ;;  %v9537_v42 = vld [vmem:[#allocation11 + $0x38c] sm:$0xf] }
 0x5a7   :  { %v907_v43 = vpop.f32.mrf.mxu0 }
 0x5a8   :  { %v7587_v43 = vld [vmem:[#allocation11 + $0x3c8] sm:$0xf0] }
 0x5ba   :  { %956 = vrot.lane.b32.xlu1 %v10588_v3, %s10411_s15 }
 0x611   :  { %v805_v46 = vpop.xlane.xlu0 %804 }
 0x612   :  { %10046 = vrcp.f32 %v805_v46  ;;  %v829_v47 = vpop.f32.mrf.mxu1  ;;  %v7590_v46 = vor.u32 %v9537_v42, %v7587_v43 }
 0x614   :  { %v934_v48 = vpop.xlane.xlu1 %933 }
 0x615   :  { %v938_v49 = vsub.f32 %v905_v40, %v934_v48  ;;  %v7582_v40 = vor.u32 %v9536_v32, %v7579_v36  ;;  %v9520_v48 = vld [vmem:[#allocation11 + $0x304] sm:$0xf]  ;;  %v7329_v36 = vld [vmem:[#allocation11 + $0x188] sm:$0xf] }
 0x617   :  { %v940_v50 = vmul.f32 1.442695, %v938_v49  ;;  %v7515_v49 = vld [vmem:[#allocation11 + $0x340] sm:$0xf0] }
 0x618   :  { %v10047_v51 = vpop.eup %10046 }
 0x619   :  { %v809_v52 = vmul.f32 %v10047_v51, %v10045_v38  ;;  %10048 = vpow2.f32 %v940_v50  ;;  %v7585_v38 = vld [vmem:[#allocation11 + $0x388] sm:$0xf]  ;;  %v7518_v51 = vor.u32 %v9520_v48, %v7515_v49  ;;  %v7259_v48 = vld [vmem:[#allocation11 + $0x140] sm:$0xf0] }
 0x61a   :  { %v831_v53 = vpop.f32.mrf.mxu1  ;;  %v7586_v41 = vor.u32 %v9545_v39, %v7585_v38  ;;  %v9481_v38 = vld [vmem:[#allocation11 + $0x1c4] sm:$0xf0]  ;;  %v7326_v39 = vor.u32 %v9472_v31, %v7323_v34  ;;  %v9522_v34 = vld [vmem:[#allocation11 + $0x314] sm:$0xf] }
 0x61b   :  { %v811_v54 = vpack.c.bf16 %v809_v52, %v809_v52  ;;  %v7521_v52 = vld [vmem:[#allocation11 + $0x308] sm:$0xf] }
 0x61c   :  { %v9529_v53 = vld [vmem:[#allocation11 + $0x344] sm:$0xf0] }
 0x61d   :  { %7104 = vmatmul.msk.bf16.vlgmr.msra.gmra.mxu2 %vm488_vm2, %v811_v54  ;;  %v9521_v54 = vld [vmem:[#allocation11 + $0x30c] sm:$0xf] }
 0x61f   :  { %v10049_v55 = vpop.eup %10048 }
 0x620   :  { %v944_v56 = vsel %vm488_vm2, %v10049_v55, 0.0 }
 0x621   :  { %945 = vadd.xlane.f32.xlu0 %v944_v56  ;;  %v7523_v56 = vld [vmem:[#allocation11 + $0x348] sm:$0xf0] }
 0x622   :  { %v928_v3 = vpop.f32.mrf.mxu1 }
 0x623   :  { %v935_v57 = vsel %vm488_vm2, %v928_v3, -inf }
 0x624   :  { %936 = vmax.xlane.f32.xlu2 %v935_v57  ;;  %v9512_v57 = vld [vmem:[#allocation11 + $0x2bc] sm:$0xf0] }
 0x62a   :  { %v930_v58 = vpop.f32.mrf.mxu1 }
 0x62b   :  { %v7526_v58 = vor.u32 %v9521_v54, %v7523_v56  ;;  %v7267_v56 = vld [vmem:[#allocation11 + $0x148] sm:$0xf0] }
 0x62c   :  { %v957_v23 = vpop.permute.xlu1 %956 }
 0x62d   :  { %v962_v59 = vsel %vm516_vm1, %v957_v23, 0  ;;  %v9504_v23 = vld [vmem:[#allocation11 + $0x284] sm:$0xf] }
 0x62e   :  { %971 = vmatpush.bf16.msrb.mxu2 %v962_v59  ;;  %v7451_v59 = vld [vmem:[#allocation11 + $0x2c0] sm:$0xf0] }
 0x632   :  { %1920 = vmatpush.bf16.msra.mxu2 %v7582_v40  ;;  %v7330_v40 = vor.u32 %v9481_v38, %v7329_v36  ;;  %v7531_v36 = vld [vmem:[#allocation11 + $0x350] sm:$0xf0]  ;;  %v7537_v38 = vld [vmem:[#allocation11 + $0x318] sm:$0xf] }
 0x636   :  { %1921 = vmatpush.bf16.msra.mxu2 %v7518_v51  ;;  %v7265_v51 = vld [vmem:[#allocation11 + $0x108] sm:$0xf] }
 0x694   :  { %v946_v62 = vpop.xlane.xlu0 %945 }
 0x695   :  { %10050 = vrcp.f32 %v946_v62  ;;  %v9505_v62 = vld [vmem:[#allocation11 + $0x28c] sm:$0xf] }
 0x697   :  { %v937_v0 = vpop.xlane.xlu2 %936 }
 0x698   :  { %v939_v2 = vsub.f32 %v928_v3, %v937_v0  ;;  %v7449_v3 = vld [vmem:[#allocation11 + $0x280] sm:$0xf]  ;;  %v7459_v0 = vld [vmem:[#allocation11 + $0x2c8] sm:$0xf0] }
 0x699   :  { %v7450_v37 = vor.u32 %v9512_v57, %v7449_v3  ;;  %v7193_v57 = vld [vmem:[#allocation11 + $0x80] sm:$0xf] }
 0x69a   :  { %v942_v4 = vmul.f32 1.442695, %v939_v2  ;;  %v7454_v2 = vor.u32 %v9504_v23, %v7451_v59  ;;  %v9440_v23 = vld [vmem:[#allocation11 + $0x84] sm:$0xf] }
 0x69b   :  { %v10051_v5 = vpop.eup %10050 }
 0x69c   :  { %v952_v6 = vmul.f32 %v10051_v5, %v10049_v55  ;;  %10052 = vpow2.f32 %v942_v4  ;;  %v7522_v55 = vor.u32 %v9529_v53, %v7521_v52  ;;  %v7458_v4 = vor.u32 %v9513_v61, %v7457_v35  ;;  %v7385_v5 = vld [vmem:[#allocation11 + $0x200] sm:$0xf]  ;;  %1922 = vmatpush.bf16.msra.mxu2 %v7454_v2  ;;  %v9465_v52 = vld [vmem:[#allocation11 + $0x144] sm:$0xf0]  ;;  %v9457_v53 = vld [vmem:[#allocation11 + $0x10c] sm:$0xf] }
 0x69d   :  { %v7270_v3 = vor.u32 %v9457_v53, %v7267_v56  ;;  %v7195_v35 = vld [vmem:[#allocation11 + $0xc0] sm:$0xf0]  ;;  %v9449_v61 = vld [vmem:[#allocation11 + $0xc4] sm:$0xf0]  ;;  %v9441_v2 = vld [vmem:[#allocation11 + $0x8c] sm:$0xf] }
 0x69e   :  { %v954_v7 = vpack.c.bf16 %v952_v6, %v952_v6  ;;  %v9496_v6 = vld [vmem:[#allocation11 + $0x23c] sm:$0xf0]  ;;  %v9507_v56 = vld [vmem:[#allocation11 + $0x29c] sm:$0xf] }
 0x6a0   :  { %v850_v8 = vpop.f32.mrf.mxu2  ;;  %7116 = vmatmul.msk.bf16.vlgmr.msrb.gmra.mxu2 %vm488_vm2, %v954_v7  ;;  %v9488_v7 = vld [vmem:[#allocation11 + $0x204] sm:$0xf] }
 0x6a1   :  { %v854_v9 = vpack.c.bf16 %v850_v8, %v829_v47  ;;  %v9528_v47 = vld [vmem:[#allocation11 + $0x33c] sm:$0xf0]  ;;  %v7462_v8 = vor.u32 %v9505_v62, %v7459_v0  ;;  %v7198_v62 = vor.u32 %v9440_v23, %v7195_v35  ;;  %v9498_v23 = vld [vmem:[#allocation11 + $0x24c] sm:$0xf0] }
 0x6a2   :  { %v10053_v10 = vpop.eup %10052  ;;  %v7514_v50 = vor.u32 %v9528_v47, %v7513_v44  ;;  %v7257_v44 = vld [vmem:[#allocation11 + $0x100] sm:$0xf]  ;;  %v9456_v47 = vld [vmem:[#allocation11 + $0x104] sm:$0xf] }
 0x6a3   :  { %7113 = vmatmul.msk.bf16.vlgmr.msra.gmra.mxu3 %vm449_vm0, %v854_v9  ;;  %v947_v11 = vsel %vm488_vm2, %v10053_v10, 0.0  ;;  %v7387_v9 = vld [vmem:[#allocation11 + $0x240] sm:$0xf0] }
 0x6a4   :  { %948 = vadd.xlane.f32.xlu0 %v947_v11  ;;  %1907 = vmatpush.bf16.msra.mxu1 %v7514_v50  ;;  %v9497_v11 = vld [vmem:[#allocation11 + $0x244] sm:$0xf0]  ;;  %v7262_v50 = vor.u32 %v9456_v47, %v7259_v48  ;;  %v9514_v47 = vld [vmem:[#allocation11 + $0x2cc] sm:$0xf0]  ;;  %v9506_v48 = vld [vmem:[#allocation11 + $0x294] sm:$0xf] }
 0x6a8   :  { %v852_v12 = vpop.f32.mrf.mxu2  ;;  %1908 = vmatpush.bf16.msra.mxu1 %v7450_v37  ;;  %v7201_v37 = vld [vmem:[#allocation11 + $0x88] sm:$0xf] }
 0x6a9   :  { %v9489_v12 = vld [vmem:[#allocation11 + $0x20c] sm:$0xf]  ;;  %v7202_v0 = vor.u32 %v9449_v61, %v7201_v37  ;;  %v7403_v37 = vld [vmem:[#allocation11 + $0x250] sm:$0xf0]  ;;  %v7409_v61 = vld [vmem:[#allocation11 + $0x218] sm:$0xf] }
 0x6b8   :  { %977 = vrot.lane.b32.xlu0 %v10608_v29, %s10411_s15  ;;  %v9422_v29 = vld [vmem:[#allocation8 + $0x30] sm:$0xff] }
 0x6b9   :  { %1021 = vmatpush.bf16.msra.mxu0 %v9422_v29 }
 0x6bd   :  { %1948 = vmatpush.bf16.msrb.mxu0 %v7590_v46  ;;  %v9464_v46 = vld [vmem:[#allocation11 + $0x13c] sm:$0xf0] }
 0x6be   :  { %v7258_v49 = vor.u32 %v9464_v46, %v7257_v44  ;;  %v7465_v46 = vld [vmem:[#allocation11 + $0x290] sm:$0xf] }
 0x6c1   :  { %1949 = vmatpush.bf16.msrb.mxu0 %v7526_v58  ;;  %v9448_v58 = vld [vmem:[#allocation11 + $0xbc] sm:$0xf0] }
 0x6c2   :  { %v7194_v59 = vor.u32 %v9448_v58, %v7193_v57  ;;  %v7401_v58 = vld [vmem:[#allocation11 + $0x210] sm:$0xf] }
 0x6c3   :  { %v7402_v35 = vor.u32 %v9498_v23, %v7401_v58  ;;  %v7147_v23 = vld [vmem:[#allocation11 + $0x50] sm:$0xf0] }
 0x6c5   :  { %1950 = vmatpush.bf16.msrb.mxu0 %v7462_v8  ;;  %v9432_v8 = vld [vmem:[#allocation11 + $0x3c] sm:$0xf0] }
 0x717   :  { %v949_v14 = vpop.xlane.xlu0 %948 }
 0x718   :  { %10054 = vrcp.f32 %v949_v14  ;;  %v7386_v14 = vor.u32 %v9496_v6, %v7385_v5 }
 0x71a   :  { %1909 = vmatpush.bf16.msra.mxu1 %v7386_v14 }
 0x71e   :  { %v10055_v17 = vpop.eup %10054 }
 0x71f   :  { %v953_v20 = vmul.f32 %v10055_v17, %v10053_v10  ;;  %v7393_v10 = vld [vmem:[#allocation11 + $0x208] sm:$0xf]  ;;  %v7398_v17 = vor.u32 %v9489_v12, %v7395_v13 }
 0x720   :  { %v7137_v12 = vld [vmem:[#allocation11 + $0x8] sm:$0xf] }
 0x721   :  { %v955_v24 = vpack.c.bf16 %v953_v20, %v953_v20  ;;  %1951 = vmatpush.bf16.msrb.mxu0 %v7398_v17  ;;  %v9433_v13 = vld [vmem:[#allocation11 + $0x44] sm:$0xf0]  ;;  %v7139_v17 = vld [vmem:[#allocation11 + $0x48] sm:$0xf0] }
 0x723   :  { %v973_v15 = vpop.f32.mrf.mxu2 }
 0x726   :  { %v879_v18 = vpop.f32.mrf.mxu3 }
 0x727   :  { %v10665_v19 = vadd.f32 %v879_v18, %v738_v16  ;;  %v7394_v16 = vor.u32 %v9497_v11, %v7393_v10  ;;  %v7131_v11 = vld [vmem:[#allocation11 + $0x40] sm:$0xf0] }
 0x72a   :  { %v978_v21 = vpop.permute.xlu0 %977 }
 0x72b   :  { %v983_v22 = vsel %vm516_vm1, %v978_v21, 0  ;;  %v975_v33 = vpop.f32.mrf.mxu2  ;;  %v10010_v21 = vld [vmem:[%s11038_s4] ss:$0 sm:$0xff] }
 0x72c   :  { %992 = vmatpush.bf16.msrb.mxu3 %v983_v22  ;;  %v740_v33 = vadd.f32 %v10658_v1, %v10652_v45  ;;  %v10412_v45 = vmov 128.0   ;;  %v7321_v1 = vld [vmem:[#allocation11 + $0x180] sm:$0xf] }
 0x72d   :  { %10056 = vrcp.f32 %v10412_v45  ;;  %v7603_v45 = vld [vmem:[#allocation11 + $0x3d8] sm:$0xf0] }
 0x72e   :  { %v10669_v25 = vpop.f32.mrf.mxu3 }
 0x72f   :  { %7117 = vmatmul.msk.bf16.vlgmr.msrb.gmra.mxu3 %vm488_vm2, %v955_v24  ;;  %v885_v29 = vadd.f32 %v10669_v25, %v740_v33  ;;  %v9480_v25 = vld [vmem:[#allocation11 + $0x1bc] sm:$0xf0]  ;;  %v7595_v33 = vld [vmem:[#allocation11 + $0x3d0] sm:$0xf0] }
 0x730   :  { %1934 = vmatpush.bf16.msra.mxu3 %v7586_v41  ;;  %v7322_v32 = vor.u32 %v9480_v25, %v7321_v1  ;;  %v7331_v41 = vld [vmem:[#allocation11 + $0x1c8] sm:$0xf0]  ;;  %v7529_v1 = vld [vmem:[#allocation11 + $0x310] sm:$0xf] }
 0x731   :  { %v9530_v25 = vld [vmem:[#allocation11 + $0x34c] sm:$0xf0] }
 0x732   :  { %1910 = vmatpush.bf16.msra.mxu1 %v7322_v32  ;;  %v7530_v32 = vor.u32 %v9530_v25, %v7529_v1 }
 0x733   :  { %v10691_v43 = vpop.eup %10056 }
 0x734   :  { %1935 = vmatpush.bf16.msra.mxu3 %v7522_v55  ;;  %v10694_v54 = vmul.f32 128.0, %v10691_v43  ;;  %v7266_v55 = vor.u32 %v9465_v52, %v7265_v51  ;;  %v7473_v51 = vld [vmem:[#allocation11 + $0x298] sm:$0xf]  ;;  %vm1049_vm3 = vweird.f32 %v10691_v43 }
 0x735   :  { %v9515_v52 = vld [vmem:[#allocation11 + $0x2d4] sm:$0xf0] }
 0x736   :  { %1911 = vmatpush.bf16.msra.mxu1 %v7258_v49  ;;  %v1046_v5 = vsub.f32 1.0, %v10694_v54  ;;  %v7466_v49 = vor.u32 %v9514_v47, %v7465_v46  ;;  %v7217_v46 = vld [vmem:[#allocation11 + $0x98] sm:$0xf] }
 0x737   :  { %v9451_v47 = vld [vmem:[#allocation11 + $0xd4] sm:$0xf0] }
 0x738   :  { %1936 = vmatpush.bf16.msra.mxu3 %v7458_v4  ;;  %v7203_v4 = vld [vmem:[#allocation11 + $0xc8] sm:$0xf0]  ;;  %v1047_v53 = vmul.f32 %v10691_v43, %v1046_v5  ;;  %v9491_v5 = vld [vmem:[#allocation11 + $0x21c] sm:$0xf] }
 0x739   :  { %v7206_v6 = vor.u32 %v9441_v2, %v7203_v4 }
 0x73a   :  { %1912 = vmatpush.bf16.msra.mxu1 %v7194_v59  ;;  %v9490_v59 = vld [vmem:[#allocation11 + $0x214] sm:$0xf] }
 0x73b   :  { %v7406_v2 = vor.u32 %v9490_v59, %v7403_v37  ;;  %v7153_v59 = vld [vmem:[#allocation11 + $0x18] sm:$0xf] }
 0x73c   :  { %1937 = vmatpush.bf16.msra.mxu3 %v7394_v16  ;;  %v9425_v16 = vld [vmem:[#allocation11 + $0xc] sm:$0xf] }
 0x740   :  { %1938 = vmatpush.bf16.msra.mxu3 %v7330_v40  ;;  %v9531_v40 = vld [vmem:[#allocation11 + $0x354] sm:$0xf0] }
 0x744   :  { %1939 = vmatpush.bf16.msra.mxu3 %v7266_v55  ;;  %v7474_v55 = vor.u32 %v9515_v52, %v7473_v51  ;;  %v7219_v51 = vld [vmem:[#allocation11 + $0xd8] sm:$0xf0] }
 0x748   :  { %1940 = vmatpush.bf16.msra.mxu3 %v7202_v0  ;;  %v1048_v0 = vadd.f32 %v10691_v43, %v1047_v53 }
 0x7b2   :  { %v994_v26 = vpop.f32.mrf.mxu3 }
 0x7b3   :  { %v998_v27 = vpack.c.bf16 %v994_v26, %v973_v15  ;;  %v7390_v15 = vor.u32 %v9488_v7, %v7387_v9  ;;  %v7129_v7 = vld [vmem:[#allocation11] sm:$0xf]  ;;  %v9424_v9 = vld [vmem:[#allocation11 + $0x4] sm:$0xf] }
 0x7b4   :  { %v7130_v10 = vor.u32 %v9432_v8, %v7129_v7  ;;  %v7134_v14 = vor.u32 %v9424_v9, %v7131_v11  ;;  %v7337_v8 = vld [vmem:[#allocation11 + $0x190] sm:$0xf] }
 0x7b5   :  { %7126 = vmatmul.msk.bf16.vlgmr.msra.gmra.mxu0 %vm449_vm0, %v998_v27  ;;  %1923 = vmatpush.bf16.msra.mxu2 %v7390_v15  ;;  %v7138_v15 = vor.u32 %v9433_v13, %v7137_v12  ;;  %v9482_v9 = vld [vmem:[#allocation11 + $0x1cc] sm:$0xf0]  ;;  %v7339_v12 = vld [vmem:[#allocation11 + $0x1d0] sm:$0xf0]  ;;  %v7345_v13 = vld [vmem:[#allocation11 + $0x198] sm:$0xf] }
 0x7b6   :  { %1913 = vmatpush.bf16.msra.mxu1 %v7130_v10  ;;  %v9474_v10 = vld [vmem:[#allocation11 + $0x194] sm:$0xf]  ;;  %v7338_v11 = vor.u32 %v9482_v9, %v7337_v8 }
 0x7b7   :  { %1941 = vmatpush.bf16.msra.mxu3 %v7138_v15  ;;  %v10701_v15 = vsel %vm1049_vm3, %v10691_v43, %v1048_v0  ;;  %v7281_v43 = vld [vmem:[#allocation11 + $0x118] sm:$0xf]  ;;  %v9427_v0 = vld [vmem:[#allocation11 + $0x1c] sm:$0xf] }
 0x7b9   :  { %1924 = vmatpush.bf16.msra.mxu2 %v7326_v39  ;;  %v7534_v39 = vor.u32 %v9522_v34, %v7531_v36 }
 0x7ba   :  { %v996_v28 = vpop.f32.mrf.mxu3 }
 0x7bd   :  { %1925 = vmatpush.bf16.msra.mxu2 %v7262_v50  ;;  %v7467_v50 = vld [vmem:[#allocation11 + $0x2d0] sm:$0xf0] }
 0x7be   :  { %v7470_v54 = vor.u32 %v9506_v48, %v7467_v50  ;;  %v9443_v50 = vld [vmem:[#allocation11 + $0x9c] sm:$0xf] }
 0x7bf   :  { %v7222_v53 = vor.u32 %v9443_v50, %v7219_v51  ;;  %v7547_v50 = vld [vmem:[#allocation11 + $0x360] sm:$0xf0]  ;;  %v7553_v51 = vld [vmem:[#allocation11 + $0x328] sm:$0xf] }
 0x7c1   :  { %1926 = vmatpush.bf16.msra.mxu2 %v7198_v62  ;;  %v9499_v62 = vld [vmem:[#allocation11 + $0x254] sm:$0xf0] }
 0x7c2   :  { %v7410_v4 = vor.u32 %v9499_v62, %v7409_v61 }
 0x7c5   :  { %1927 = vmatpush.bf16.msra.mxu2 %v7134_v14  ;;  %v9483_v14 = vld [vmem:[#allocation11 + $0x1d4] sm:$0xf0] }
 0x832   :  { %v1023_v18 = vpop.f32.mrf.mxu0 }
 0x833   :  { %v1028_v20 = vadd.f32 %v1023_v18, %v10665_v19  ;;  %v7593_v18 = vld [vmem:[#allocation11 + $0x390] sm:$0xf] }
 0x835   :  { %v1030_v22 = vadd.f32 %v1028_v20, %v10550_v60  ;;  %v7142_v20 = vor.u32 %v9425_v16, %v7139_v17  ;;  %v7342_v16 = vor.u32 %v9474_v10, %v7339_v12  ;;  %v7346_v17 = vor.u32 %v9483_v14, %v7345_v13 }
 0x837   :  { %v10679_v24 = vadd.f32 %v10010_v21, %v1030_v22  ;;  %v9538_v22 = vld [vmem:[#allocation11 + $0x394] sm:$0xf] }
 0x839   :  { %1040 = vadd.xlane.f32.xlu2 %v10679_v24  ;;  %v1053_v19 = vmul.f32 %v10679_v24, %v10679_v24 }
 0x83a   :  { %v1025_v26 = vpop.f32.mrf.mxu0 }
 0x83b   :  { %v1029_v27 = vadd.f32 %v1025_v26, %v885_v29  ;;  %1055 = vadd.xlane.f32.xlu0 %v1053_v19  ;;  %v7598_v19 = vor.u32 %v9538_v22, %v7595_v33  ;;  %v7601_v26 = vld [vmem:[#allocation11 + $0x398] sm:$0xf]  ;;  %v7273_v33 = vld [vmem:[#allocation11 + $0x110] sm:$0xf] }
 0x83d   :  { %v1031_v28 = vadd.f32 %v1029_v27, %v10552_v63  ;;  %v9473_v63 = vld [vmem:[#allocation11 + $0x18c] sm:$0xf]  ;;  %v9547_v27 = vld [vmem:[#allocation11 + $0x3d4] sm:$0xf0]  ;;  %1976 = vmatpush.bf16.msrb.mxu2 %v7598_v19  ;;  %v9458_v19 = vld [vmem:[#allocation11 + $0x114] sm:$0xf] }
 0x83e   :  { %v7334_v42 = vor.u32 %v9473_v63, %v7331_v41  ;;  %v9523_v63 = vld [vmem:[#allocation11 + $0x31c] sm:$0xf] }
 0x83f   :  { %v10686_v30 = vadd.f32 %v10010_v21, %v1031_v28  ;;  %v9546_v21 = vld [vmem:[#allocation11 + $0x3cc] sm:$0xf0]  ;;  %v9539_v28 = vld [vmem:[#allocation11 + $0x39c] sm:$0xf] }
 0x840   :  { %1952 = vmatpush.bf16.msrb.mxu0 %v7334_v42  ;;  %v7594_v29 = vor.u32 %v9546_v21, %v7593_v18  ;;  %v7606_v31 = vor.u32 %v9539_v28, %v7603_v45  ;;  %v7539_v41 = vld [vmem:[#allocation11 + $0x358] sm:$0xf0]  ;;  %v7538_v42 = vor.u32 %v9531_v40, %v7537_v38  ;;  %v7275_v28 = vld [vmem:[#allocation11 + $0x150] sm:$0xf0]  ;;  %v9450_v40 = vld [vmem:[#allocation11 + $0xcc] sm:$0xf0] }
 0x841   :  { %1042 = vadd.xlane.f32.xlu2 %v10686_v30  ;;  %v1054_v60 = vmul.f32 %v10686_v30, %v10686_v30  ;;  %v7542_v44 = vor.u32 %v9523_v63, %v7539_v41  ;;  %1977 = vmatpush.bf16.msrb.mxu2 %v7534_v39  ;;  %v9475_v18 = vld [vmem:[#allocation11 + $0x19c] sm:$0xf]  ;;  %v7278_v1 = vor.u32 %v9458_v19, %v7275_v28  ;;  %v7209_v39 = vld [vmem:[#allocation11 + $0x90] sm:$0xf]  ;;  %v9442_v63 = vld [vmem:[#allocation11 + $0x94] sm:$0xf] }
 0x842   :  { %1962 = vmatpush.bf16.msrb.mxu1 %v7594_v29  ;;  %v9466_v29 = vld [vmem:[#allocation11 + $0x14c] sm:$0xf0] }
 0x843   :  { %1057 = vadd.xlane.f32.xlu1 %v1054_v60  ;;  %v7602_v60 = vor.u32 %v9547_v27, %v7601_v26  ;;  %v7274_v27 = vor.u32 %v9466_v29, %v7273_v33  ;;  %v10011_v29 = vld [vmem:[%s11039_s5] ss:$0 sm:$0xff] }
 0x844   :  { %1953 = vmatpush.bf16.msrb.mxu0 %v7270_v3  ;;  %v7475_v3 = vld [vmem:[#allocation11 + $0x2d8] sm:$0xf0] }
 0x845   :  { %1990 = vmatpush.bf16.msrb.mxu3 %v7602_v60  ;;  %v7478_v57 = vor.u32 %v9507_v56, %v7475_v3  ;;  %1978 = vmatpush.bf16.msrb.mxu2 %v7470_v54  ;;  %v9467_v60 = vld [vmem:[#allocation11 + $0x154] sm:$0xf0]  ;;  %v9434_v56 = vld [vmem:[#allocation11 + $0x4c] sm:$0xf0]  ;;  %v9426_v3 = vld [vmem:[#allocation11 + $0x14] sm:$0xf] }
 0x846   :  { %1963 = vmatpush.bf16.msrb.mxu1 %v7530_v32  ;;  %v7282_v25 = vor.u32 %v9467_v60, %v7281_v43  ;;  %v7283_v32 = vld [vmem:[#allocation11 + $0x158] sm:$0xf0]  ;;  %v7150_v61 = vor.u32 %v9426_v3, %v7147_v23  ;;  %v7481_v3 = vld [vmem:[#allocation11 + $0x2a0] sm:$0xf] }
 0x847   :  { %v10012_v60 = vld [vmem:[#allocation10] ss:$0 sm:$0xff] }
 0x848   :  { %1954 = vmatpush.bf16.msrb.mxu0 %v7206_v6  ;;  %v7411_v6 = vld [vmem:[#allocation11 + $0x258] sm:$0xf0] }
 0x849   :  { %1991 = vmatpush.bf16.msrb.mxu3 %v7538_v42  ;;  %v7414_v7 = vor.u32 %v9491_v5, %v7411_v6  ;;  %1979 = vmatpush.bf16.msrb.mxu2 %v7406_v2  ;;  %v7210_v42 = vor.u32 %v9450_v40, %v7209_v39  ;;  %v7155_v2 = vld [vmem:[#allocation11 + $0x58] sm:$0xf0]  ;;  %v9549_v39 = vld [vmem:[#allocation11 + $0x3e4] sm:$0xf0]  ;;  %v9541_v40 = vld [vmem:[#allocation11 + $0x3ac] sm:$0xf] }
 0x84a   :  { %1964 = vmatpush.bf16.msrb.mxu1 %v7466_v49  ;;  %v7218_v49 = vor.u32 %v9451_v47, %v7217_v46  ;;  %v7158_v6 = vor.u32 %v9427_v0, %v7155_v2  ;;  %v9532_v46 = vld [vmem:[#allocation11 + $0x35c] sm:$0xf0]  ;;  %v7491_v0 = vld [vmem:[#allocation11 + $0x2e8] sm:$0xf0] }
 0x84c   :  { %1955 = vmatpush.bf16.msrb.mxu0 %v7142_v20  ;;  %v7347_v20 = vld [vmem:[#allocation11 + $0x1d8] sm:$0xf0] }
 0x84d   :  { %1992 = vmatpush.bf16.msrb.mxu3 %v7474_v55  ;;  %v7350_v21 = vor.u32 %v9475_v18, %v7347_v20  ;;  %1980 = vmatpush.bf16.msrb.mxu2 %v7342_v16  ;;  %v7145_v55 = vld [vmem:[#allocation11 + $0x10] sm:$0xf] }
 0x84e   :  { %1965 = vmatpush.bf16.msrb.mxu1 %v7402_v35  ;;  %v7146_v58 = vor.u32 %v9434_v56, %v7145_v55  ;;  %v9435_v35 = vld [vmem:[#allocation11 + $0x54] sm:$0xf0] }
 0x84f   :  { %v7154_v62 = vor.u32 %v9435_v35, %v7153_v59  ;;  %v9508_v59 = vld [vmem:[#allocation11 + $0x2a4] sm:$0xf] }
 0x850   :  { %2004 = vmatpush.bf16.msra.mxu0 %v7606_v31  ;;  %v9459_v31 = vld [vmem:[#allocation11 + $0x11c] sm:$0xf]  ;;  %v7483_v35 = vld [vmem:[#allocation11 + $0x2e0] sm:$0xf0] }
 0x851   :  { %1993 = vmatpush.bf16.msrb.mxu3 %v7410_v4  ;;  %v7286_v38 = vor.u32 %v9459_v31, %v7283_v32  ;;  %1981 = vmatpush.bf16.msrb.mxu2 %v7278_v1  ;;  %v7609_v31 = vld [vmem:[#allocation11 + $0x3a0] sm:$0xf] }
 0x852   :  { %1966 = vmatpush.bf16.msrb.mxu1 %v7338_v11  ;;  %v9548_v32 = vld [vmem:[#allocation11 + $0x3dc] sm:$0xf0] }
 0x854   :  { %2005 = vmatpush.bf16.msra.mxu0 %v7542_v44  ;;  %v7211_v44 = vld [vmem:[#allocation11 + $0xd0] sm:$0xf0] }
 0x855   :  { %1994 = vmatpush.bf16.msrb.mxu3 %v7346_v17  ;;  %v7214_v48 = vor.u32 %v9442_v63, %v7211_v44  ;;  %v7619_v63 = vld [vmem:[#allocation11 + $0x3e8] sm:$0xf0]  ;;  %v7545_v44 = vld [vmem:[#allocation11 + $0x320] sm:$0xf] }
 0x856   :  { %1967 = vmatpush.bf16.msrb.mxu1 %v7274_v27  ;;  %v7546_v55 = vor.u32 %v9532_v46, %v7545_v44  ;;  %v7225_v44 = vld [vmem:[#allocation11 + $0xa0] sm:$0xf] }
 0x857   :  { %1982 = vmatpush.bf16.msrb.mxu2 %v7214_v48  ;;  %v7622_v48 = vor.u32 %v9541_v40, %v7619_v63  ;;  %v9461_v40 = vld [vmem:[#allocation11 + $0x12c] sm:$0xf]  ;;  %v9452_v46 = vld [vmem:[#allocation11 + $0xdc] sm:$0xf0] }
 0x858   :  { %2006 = vmatpush.bf16.msra.mxu0 %v7478_v57  ;;  %v7299_v63 = vld [vmem:[#allocation11 + $0x168] sm:$0xf0] }
 0x859   :  { %1995 = vmatpush.bf16.msrb.mxu3 %v7282_v25 }
 0x85a   :  { %1968 = vmatpush.bf16.msrb.mxu1 %v7210_v42 }
 0x85b   :  { %1983 = vmatpush.bf16.msrb.mxu2 %v7150_v61  ;;  %v9517_v61 = vld [vmem:[#allocation11 + $0x2e4] sm:$0xf0] }
 0x85c   :  { %2007 = vmatpush.bf16.msra.mxu0 %v7414_v7 }
 0x85d   :  { %1996 = vmatpush.bf16.msrb.mxu3 %v7218_v49  ;;  %v9524_v49 = vld [vmem:[#allocation11 + $0x324] sm:$0xf] }
 0x85e   :  { %1969 = vmatpush.bf16.msrb.mxu1 %v7146_v58  ;;  %v7550_v56 = vor.u32 %v9524_v49, %v7547_v50  ;;  %v9444_v49 = vld [vmem:[#allocation11 + $0xa4] sm:$0xf] }
 0x85f   :  { %v7227_v50 = vld [vmem:[#allocation11 + $0xe0] sm:$0xf0] }
 0x860   :  { %2008 = vmatpush.bf16.msra.mxu0 %v7350_v21 }
 0x861   :  { %1997 = vmatpush.bf16.msrb.mxu3 %v7154_v62  ;;  %v9509_v62 = vld [vmem:[#allocation11 + $0x2ac] sm:$0xf] }
 0x864   :  { %2009 = vmatpush.bf16.msra.mxu0 %v7286_v38 }
 0x868   :  { %2010 = vmatpush.bf16.msra.mxu0 %v7222_v53  ;;  %v9525_v53 = vld [vmem:[#allocation11 + $0x32c] sm:$0xf] }
 0x86c   :  { %2011 = vmatpush.bf16.msra.mxu0 %v7158_v6  ;;  %v9500_v6 = vld [vmem:[#allocation11 + $0x25c] sm:$0xf0] }
 0x8ac   :  { %v1041_v22 = vpop.xlane.xlu2 %1040 }
 0x8ad   :  { %v10704_v26 = vmul.f32 %v10701_v15, %v1041_v22 }
 0x8ae   :  { %v1056_v45 = vpop.xlane.xlu0 %1055 }
 0x8af   :  { %v1061_v34 = vmul.f32 %v10704_v26, %v10704_v26  ;;  %v1059_v36 = vmul.f32 %v1056_v45, %v10701_v15  ;;  %v1065_v22 = vsub.f32 %v10679_v24, %v10704_v26  ;;  %v9540_v24 = vld [vmem:[#allocation11 + $0x3a4] sm:$0xf] }
 0x8b0   :  { %v7611_v26 = vld [vmem:[#allocation11 + $0x3e0] sm:$0xf0] }
 0x8b1   :  { %v1063_v41 = vsub.f32 %v1059_v36, %v1061_v34  ;;  %v7617_v34 = vld [vmem:[#allocation11 + $0x3a8] sm:$0xf]  ;;  %v7614_v42 = vor.u32 %v9540_v24, %v7611_v26  ;;  %v9460_v24 = vld [vmem:[#allocation11 + $0x124] sm:$0xf] }
 0x8b2   :  { %v7618_v47 = vor.u32 %v9549_v39, %v7617_v34  ;;  %v7291_v26 = vld [vmem:[#allocation11 + $0x160] sm:$0xf0]  ;;  %v7297_v34 = vld [vmem:[#allocation11 + $0x128] sm:$0xf] }
 0x8b3   :  { %v1067_v52 = vadd.f32 1e-05, %v1063_v41  ;;  %v7610_v41 = vor.u32 %v9548_v32, %v7609_v31  ;;  %v9469_v39 = vld [vmem:[#allocation11 + $0x164] sm:$0xf0] }
 0x8b4   :  { %v1043_v54 = vpop.xlane.xlu2 %1042 }
 0x8b5   :  { %10058 = vrsqrt.f32 %v1067_v52  ;;  %v1052_v57 = vmul.f32 %v10701_v15, %v1043_v54  ;;  %vm1075_vm5 = vweird.f32 %v1067_v52  ;;  %v7555_v54 = vld [vmem:[#allocation11 + $0x368] sm:$0xf0] }
 0x8b6   :  { %v1058_v37 = vpop.xlane.xlu1 %1057  ;;  %v7558_v23 = vor.u32 %v9525_v53, %v7555_v54  ;;  %v9445_v53 = vld [vmem:[#allocation11 + $0xac] sm:$0xf] }
 0x8b7   :  { %v1062_v4 = vmul.f32 %v1052_v57, %v1052_v57  ;;  %v1060_v5 = vmul.f32 %v1058_v37, %v10701_v15  ;;  %v1066_v28 = vsub.f32 %v10686_v30, %v1052_v57  ;;  %v9516_v57 = vld [vmem:[#allocation11 + $0x2dc] sm:$0xf0]  ;;  %v7489_v37 = vld [vmem:[#allocation11 + $0x2a8] sm:$0xf]  ;;  %v7235_v54 = vld [vmem:[#allocation11 + $0xe8] sm:$0xf0] }
 0x8b8   :  { %v7482_v2 = vor.u32 %v9516_v57, %v7481_v3  ;;  %v7230_v3 = vor.u32 %v9444_v49, %v7227_v50  ;;  %v9436_v57 = vld [vmem:[#allocation11 + $0x5c] sm:$0xf0]  ;;  %v9494_v49 = vld [vmem:[#allocation11 + $0x234] sm:$0xf] }
 0x8b9   :  { %v1064_v7 = vsub.f32 %v1060_v5, %v1062_v4  ;;  %v7486_v4 = vor.u32 %v9508_v59, %v7483_v35  ;;  %v7417_v5 = vld [vmem:[#allocation11 + $0x220] sm:$0xf]  ;;  %v7238_v35 = vor.u32 %v9445_v53, %v7235_v54  ;;  %v7435_v50 = vld [vmem:[#allocation11 + $0x270] sm:$0xf0]  ;;  %v9495_v53 = vld [vmem:[#allocation11 + $0x23c] sm:$0xf] }
 0x8ba   :  { %v7443_v54 = vld [vmem:[#allocation11 + $0x278] sm:$0xf0] }
 0x8bb   :  { %v10059_v8 = vpop.eup %10058  ;;  %v1068_v9 = vadd.f32 1e-05, %v1064_v7  ;;  %v7490_v7 = vor.u32 %v9517_v61, %v7489_v37  ;;  %v7169_v37 = vld [vmem:[#allocation11 + $0x28] sm:$0xf] }
 0x8bc   :  { %v1070_v10 = vmul.f32 %v10059_v8, %v1067_v52  ;;  %vm1076_vm4 = vweird.f32 %v10059_v8  ;;  %v9533_v52 = vld [vmem:[#allocation11 + $0x364] sm:$0xf0] }
 0x8bd   :  { %10060 = vrsqrt.f32 %v1068_v9  ;;  %vm1077_vm6 = vmor %vm1075_vm5, %vm1076_vm4  ;;  %vm1085_vm8 = vweird.f32 %v1068_v9  ;;  %v7554_v58 = vor.u32 %v9533_v52, %v7553_v51  ;;  %v7233_v51 = vld [vmem:[#allocation11 + $0xa8] sm:$0xf] }
 0x8be   :  { %v1071_v11 = vmul.f32 %v10059_v8, %v1070_v10  ;;  %v7419_v10 = vld [vmem:[#allocation11 + $0x260] sm:$0xf0]  ;;  %v9453_v52 = vld [vmem:[#allocation11 + $0xe4] sm:$0xf0] }
 0x8bf   :  { %v7234_v59 = vor.u32 %v9453_v52, %v7233_v51  ;;  %v9437_v61 = vld [vmem:[#allocation11 + $0x64] sm:$0xf0]  ;;  %v7441_v51 = vld [vmem:[#allocation11 + $0x238] sm:$0xf] }
 0x8c0   :  { %v1072_v12 = vmul.f32 0.5, %v1071_v11  ;;  %v7425_v11 = vld [vmem:[#allocation11 + $0x228] sm:$0xf]  ;;  %v9503_v52 = vld [vmem:[#allocation11 + $0x274] sm:$0xf0] }
 0x8c2   :  { %v1073_v13 = vsub.f32 1.5, %v1072_v12  ;;  %v9501_v12 = vld [vmem:[#allocation11 + $0x264] sm:$0xf0] }
 0x8c3   :  { %v10061_v14 = vpop.eup %10060 }
 0x8c4   :  { %v1074_v16 = vmul.f32 %v10059_v8, %v1073_v13  ;;  %v1080_v17 = vmul.f32 %v10061_v14, %v1068_v9  ;;  %vm1086_vm7 = vweird.f32 %v10061_v14  ;;  %v9492_v9 = vld [vmem:[#allocation11 + $0x224] sm:$0xf]  ;;  %v9493_v13 = vld [vmem:[#allocation11 + $0x22c] sm:$0xf] }
 0x8c5   :  { %vm1087_vm9 = vmor %vm1085_vm8, %vm1086_vm7 }
 0x8c6   :  { %v1081_v18 = vmul.f32 %v10061_v14, %v1080_v17  ;;  %v1078_v20 = vsel %vm1077_vm6, %v10059_v8, %v1074_v16  ;;  %v7494_v8 = vor.u32 %v9509_v62, %v7491_v0  ;;  %v7418_v16 = vor.u32 %v9500_v6, %v7417_v5  ;;  %v9429_v62 = vld [vmem:[#allocation11 + $0x2c] sm:$0xf]  ;;  %v9542_v5 = vld [vmem:[#allocation11 + $0x3b4] sm:$0xf] }
 0x8c7   :  { %v1089_v19 = vmul.f32 %v1078_v20, %v1065_v22  ;;  %v7422_v17 = vor.u32 %v9492_v9, %v7419_v10  ;;  %v9484_v20 = vld [vmem:[#allocation11 + $0x1dc] sm:$0xf0]  ;;  %v7171_v0 = vld [vmem:[#allocation11 + $0x68] sm:$0xf0]  ;;  %v7627_v6 = vld [vmem:[#allocation11 + $0x3f0] sm:$0xf0] }
 0x8c8   :  { %v1082_v21 = vmul.f32 0.5, %v1081_v18  ;;  %v7353_v18 = vld [vmem:[#allocation11 + $0x1a0] sm:$0xf]  ;;  %v9551_v10 = vld [vmem:[#allocation11 + $0x3f4] sm:$0xf0] }
 0x8c9   :  { %v1094_v45 = vmul.f32 %v10011_v29, %v1089_v19  ;;  %v7361_v19 = vld [vmem:[#allocation11 + $0x1a8] sm:$0xf] }
 0x8ca   :  { %v1083_v33 = vsub.f32 1.5, %v1082_v21  ;;  %v7426_v21 = vor.u32 %v9501_v12, %v7425_v11  ;;  %v9543_v11 = vld [vmem:[#allocation11 + $0x3bc] sm:$0xf] }
 0x8cb   :  { %v10717_v36 = vadd.f32 %v10012_v60, %v1094_v45  ;;  %v7635_v12 = vld [vmem:[#allocation11 + $0x3f8] sm:$0xf0] }
 0x8cc   :  { %v1084_v27 = vmul.f32 %v10061_v14, %v1083_v33  ;;  %v9476_v33 = vld [vmem:[#allocation11 + $0x1a4] sm:$0xf] }
 0x8ce   :  { %v1088_v43 = vsel %vm1087_vm9, %v10061_v14, %v1084_v27  ;;  %v7427_v14 = vld [vmem:[#allocation11 + $0x268] sm:$0xf0]  ;;  %v9485_v27 = vld [vmem:[#allocation11 + $0x1e4] sm:$0xf0] }
 0x8cf   :  { %v1090_v1 = vmul.f32 %v1088_v43, %v1066_v28  ;;  %v7430_v22 = vor.u32 %v9493_v13, %v7427_v14  ;;  %v9477_v28 = vld [vmem:[#allocation11 + $0x1ac] sm:$0xf]  ;;  %v7362_v31 = vor.u32 %v9485_v27, %v7361_v19  ;;  %v7170_v13 = vor.u32 %v9437_v61, %v7169_v37  ;;  %v7569_v19 = vld [vmem:[#allocation11 + $0x338] sm:$0xf] }
 0x8d0   :  { %v7363_v43 = vld [vmem:[#allocation11 + $0x1e8] sm:$0xf0]  ;;  %v7174_v14 = vor.u32 %v9429_v62, %v7171_v0  ;;  %v9535_v27 = vld [vmem:[#allocation11 + $0x374] sm:$0xf0]  ;;  %v9479_v62 = vld [vmem:[#allocation11 + $0x1bc] sm:$0xf] }
 0x8d1   :  { %v1095_v25 = vmul.f32 %v10011_v29, %v1090_v1  ;;  %v7355_v29 = vld [vmem:[#allocation11 + $0x1e0] sm:$0xf0]  ;;  %v7289_v1 = vld [vmem:[#allocation11 + $0x120] sm:$0xf]  ;;  %v7366_v32 = vor.u32 %v9477_v28, %v7363_v43  ;;  %v9527_v28 = vld [vmem:[#allocation11 + $0x33c] sm:$0xf] }
 0x8d2   :  { %v7358_v45 = vor.u32 %v9476_v33, %v7355_v29  ;;  %v9526_v33 = vld [vmem:[#allocation11 + $0x334] sm:$0xf]  ;;  %v7571_v43 = vld [vmem:[#allocation11 + $0x378] sm:$0xf0]  ;;  %v7377_v37 = vld [vmem:[#allocation11 + $0x1b8] sm:$0xf] }
 0x8d3   :  { %v10719_v38 = vadd.f32 %v10012_v60, %v1095_v25  ;;  %v7354_v60 = vor.u32 %v9484_v20, %v7353_v18  ;;  %v9468_v25 = vld [vmem:[#allocation11 + $0x15c] sm:$0xf0]  ;;  %v7561_v18 = vld [vmem:[#allocation11 + $0x330] sm:$0xf]  ;;  %v7563_v29 = vld [vmem:[#allocation11 + $0x370] sm:$0xf0] }
 0x8d4   :  { %v9534_v20 = vld [vmem:[#allocation11 + $0x36c] sm:$0xf0]  ;;  %v9487_v61 = vld [vmem:[#allocation11 + $0x1f4] sm:$0xf0]  ;;  %v7379_v0 = vld [vmem:[#allocation11 + $0x1f8] sm:$0xf0] }
 0x8d5   :  { %v10723_v30 = vpack.c.bf16 %v10719_v38, %v10717_v36 }
 0x8d7   :  { %1914 = vmatmul.bf16.vlgmr.msra.gmra.mxu1 %v10723_v30  ;;  %1928 = vmatmul.bf16.vlgmr.msra.gmra.mxu2 %v10723_v30 }
 0x8d8   :  { %1942 = vmatmul.bf16.vlgmr.msra.gmra.mxu3 %v10723_v30  ;;  %1956 = vmatmul.bf16.vlgmr.msrb.gmra.mxu0 %v10723_v30 }
 0x8d9   :  { %2018 = vmatpush.bf16.msra.mxu1 %v7610_v41  ;;  %2032 = vmatpush.bf16.msra.mxu2 %v7614_v42  ;;  %v7290_v41 = vor.u32 %v9468_v25, %v7289_v1  ;;  %v7294_v42 = vor.u32 %v9460_v24, %v7291_v26  ;;  %v7497_v1 = vld [vmem:[#allocation11 + $0x2b0] sm:$0xf]  ;;  %v9510_v24 = vld [vmem:[#allocation11 + $0x2b4] sm:$0xf] }
 0x8da   :  { %2046 = vmatpush.bf16.msra.mxu3 %v7618_v47  ;;  %2060 = vmatpush.bf16.msrb.mxu0 %v7622_v48  ;;  %v7298_v47 = vor.u32 %v9469_v39, %v7297_v34  ;;  %v7302_v48 = vor.u32 %v9461_v40, %v7299_v63  ;;  %v9518_v25 = vld [vmem:[#allocation11 + $0x2ec] sm:$0xf0]  ;;  %v7499_v26 = vld [vmem:[#allocation11 + $0x2f0] sm:$0xf0]  ;;  %v7505_v34 = vld [vmem:[#allocation11 + $0x2b8] sm:$0xf] }
 0x8db   :  { %v9519_v39 = vld [vmem:[#allocation11 + $0x2f4] sm:$0xf0]  ;;  %v9511_v40 = vld [vmem:[#allocation11 + $0x2bc] sm:$0xf] }
 0x8dc   :  { %v7507_v63 = vld [vmem:[#allocation11 + $0x2f8] sm:$0xf0] }
 0x8dd   :  { %2019 = vmatpush.bf16.msra.mxu1 %v7546_v55  ;;  %2033 = vmatpush.bf16.msra.mxu2 %v7550_v56  ;;  %v7161_v55 = vld [vmem:[#allocation11 + $0x20] sm:$0xf]  ;;  %v7226_v56 = vor.u32 %v9452_v46, %v7225_v44  ;;  %v7433_v44 = vld [vmem:[#allocation11 + $0x230] sm:$0xf] }
 0x8de   :  { %2047 = vmatpush.bf16.msra.mxu3 %v7554_v58  ;;  %2061 = vmatpush.bf16.msrb.mxu0 %v7558_v23  ;;  %v9428_v58 = vld [vmem:[#allocation11 + $0x24] sm:$0xf]  ;;  %v9502_v46 = vld [vmem:[#allocation11 + $0x26c] sm:$0xf0] }
 0x8df   :  { %v7163_v23 = vld [vmem:[#allocation11 + $0x60] sm:$0xf0] }
 0x8e0   :  { %v7166_v9 = vor.u32 %v9428_v58, %v7163_v23  ;;  %v7442_v58 = vor.u32 %v9503_v52, %v7441_v51  ;;  %v7446_v23 = vor.u32 %v9495_v53, %v7443_v54  ;;  %v9558_v51 = vld [vmem:[#allocation14 + $0x30] sm:$0xff] }
 0x8e1   :  { %2020 = vmatpush.bf16.msra.mxu1 %v7482_v2  ;;  %2034 = vmatpush.bf16.msra.mxu2 %v7486_v4  ;;  %v7625_v2 = vld [vmem:[#allocation11 + $0x3b0] sm:$0xf] }
 0x8e2   :  { %2048 = vmatpush.bf16.msra.mxu3 %v7490_v7  ;;  %2062 = vmatpush.bf16.msrb.mxu0 %v7494_v8  ;;  %v9550_v4 = vld [vmem:[#allocation11 + $0x3ec] sm:$0xf0]  ;;  %v7633_v7 = vld [vmem:[#allocation11 + $0x3b8] sm:$0xf]  ;;  %v7162_v8 = vor.u32 %v9436_v57, %v7161_v55  ;;  %v7434_v55 = vor.u32 %v9502_v46, %v7433_v44 }
 0x8e3   :  { %v9486_v57 = vld [vmem:[#allocation11 + $0x1ec] sm:$0xf0] }
 0x8e4   :  { %v9582_v52 = vld [vmem:[#allocation14 + $0xf0] sm:$0xff] }
 0x8e5   :  { %2021 = vmatpush.bf16.msra.mxu1 %v7418_v16  ;;  %2035 = vmatpush.bf16.msra.mxu2 %v7422_v17  ;;  %v7626_v16 = vor.u32 %v9550_v4, %v7625_v2  ;;  %v7630_v17 = vor.u32 %v9542_v5, %v7627_v6  ;;  %v7305_v5 = vld [vmem:[#allocation11 + $0x130] sm:$0xf] }
 0x8e6   :  { %2049 = vmatpush.bf16.msra.mxu3 %v7426_v21  ;;  %2063 = vmatpush.bf16.msrb.mxu0 %v7430_v22  ;;  %v7634_v21 = vor.u32 %v9551_v10, %v7633_v7  ;;  %v7638_v22 = vor.u32 %v9543_v11, %v7635_v12  ;;  %v9470_v6 = vld [vmem:[#allocation11 + $0x16c] sm:$0xf0]  ;;  %v7378_v7 = vor.u32 %v9487_v61, %v7377_v37  ;;  %v7307_v10 = vld [vmem:[#allocation11 + $0x170] sm:$0xf0]  ;;  %v7313_v11 = vld [vmem:[#allocation11 + $0x138] sm:$0xf] }
 0x8e7   :  { %1970 = vmatmul.bf16.vlgmr.msrb.gmra.mxu1 %v10723_v30  ;;  %1984 = vmatmul.bf16.vlgmr.msrb.gmra.mxu2 %v10723_v30  ;;  %v9471_v12 = vld [vmem:[#allocation11 + $0x174] sm:$0xf0]  ;;  %v9566_v53 = vld [vmem:[#allocation14 + $0x70] sm:$0xff] }
 0x8e8   :  { %1998 = vmatmul.bf16.vlgmr.msrb.gmra.mxu3 %v10723_v30  ;;  %2012 = vmatmul.bf16.vlgmr.msra.gmra.mxu0 %v10723_v30  ;;  %v9574_v54 = vld [vmem:[#allocation14 + $0xb0] sm:$0xff]  ;;  %v9579_v37 = vld [vmem:[#allocation14 + $0xd8] sm:$0xff] }
 0x8e9   :  { %2022 = vmatpush.bf16.msra.mxu1 %v7354_v60  ;;  %2036 = vmatpush.bf16.msra.mxu2 %v7358_v45  ;;  %v7562_v60 = vor.u32 %v9534_v20, %v7561_v18  ;;  %v7566_v45 = vor.u32 %v9526_v33, %v7563_v29  ;;  %v7241_v18 = vld [vmem:[#allocation11 + $0xb0] sm:$0xf]  ;;  %v9446_v33 = vld [vmem:[#allocation11 + $0xb4] sm:$0xf]  ;;  %v9563_v61 = vld [vmem:[#allocation14 + $0x58] sm:$0xff] }
 0x8ea   :  { %2050 = vmatpush.bf16.msra.mxu3 %v7362_v31  ;;  %2064 = vmatpush.bf16.msrb.mxu0 %v7366_v32  ;;  %v7570_v31 = vor.u32 %v9535_v27, %v7569_v19  ;;  %v7574_v32 = vor.u32 %v9527_v28, %v7571_v43  ;;  %v9454_v20 = vld [vmem:[#allocation11 + $0xec] sm:$0xf0]  ;;  %v7243_v29 = vld [vmem:[#allocation11 + $0xf0] sm:$0xf0]  ;;  %v7249_v19 = vld [vmem:[#allocation11 + $0xb8] sm:$0xf] }
 0x8eb   :  { %v9455_v27 = vld [vmem:[#allocation11 + $0xf4] sm:$0xf0]  ;;  %v9447_v28 = vld [vmem:[#allocation11 + $0xbc] sm:$0xf] }
 0x8ec   :  { %v7251_v43 = vld [vmem:[#allocation11 + $0xf8] sm:$0xf0] }
 0x8ed   :  { %2023 = vmatpush.bf16.msra.mxu1 %v7290_v41  ;;  %2037 = vmatpush.bf16.msra.mxu2 %v7294_v42  ;;  %v7498_v41 = vor.u32 %v9518_v25, %v7497_v1  ;;  %v7502_v42 = vor.u32 %v9510_v24, %v7499_v26  ;;  %v7177_v1 = vld [vmem:[#allocation11 + $0x30] sm:$0xf]  ;;  %v9430_v24 = vld [vmem:[#allocation11 + $0x34] sm:$0xf] }
 0x8ee   :  { %2051 = vmatpush.bf16.msra.mxu3 %v7298_v47  ;;  %2065 = vmatpush.bf16.msrb.mxu0 %v7302_v48  ;;  %v7506_v47 = vor.u32 %v9519_v39, %v7505_v34  ;;  %v7510_v48 = vor.u32 %v9511_v40, %v7507_v63  ;;  %v9438_v25 = vld [vmem:[#allocation11 + $0x6c] sm:$0xf0]  ;;  %v7179_v26 = vld [vmem:[#allocation11 + $0x70] sm:$0xf0]  ;;  %v7185_v34 = vld [vmem:[#allocation11 + $0x38] sm:$0xf] }
 0x8ef   :  { %v9439_v39 = vld [vmem:[#allocation11 + $0x74] sm:$0xf0]  ;;  %v9431_v40 = vld [vmem:[#allocation11 + $0x3c] sm:$0xf] }
 0x8f0   :  { %v7187_v63 = vld [vmem:[#allocation11 + $0x78] sm:$0xf0]  ;;  %v7186_v44 = vor.u32 %v9439_v39, %v7185_v34  ;;  %v9610_v34 = vld [vmem:[#allocation14 + $0x1d0] sm:$0xff] }
 0x8f1   :  { %2024 = vmatpush.bf16.msra.mxu1 %v7226_v56  ;;  %2038 = vmatpush.bf16.msra.mxu2 %v7230_v3  ;;  %v7438_v56 = vor.u32 %v9494_v49, %v7435_v50  ;;  %v7369_v3 = vld [vmem:[#allocation11 + $0x1b0] sm:$0xf]  ;;  %v7190_v46 = vor.u32 %v9431_v40, %v7187_v63  ;;  %v9567_v49 = vld [vmem:[#allocation14 + $0x78] sm:$0xff]  ;;  %v9585_v63 = vld [vmem:[#allocation14 + $0x108] sm:$0xff] }
 0x8f2   :  { %2052 = vmatpush.bf16.msra.mxu3 %v7234_v59  ;;  %2066 = vmatpush.bf16.msrb.mxu0 %v7238_v35  ;;  %v9478_v59 = vld [vmem:[#allocation11 + $0x1b4] sm:$0xf]  ;;  %v7370_v2 = vor.u32 %v9486_v57, %v7369_v3  ;;  %v9575_v50 = vld [vmem:[#allocation14 + $0xb8] sm:$0xff]  ;;  %v9565_v3 = vld [vmem:[#allocation14 + $0x68] sm:$0xff] }
 0x8f3   :  { %v7371_v35 = vld [vmem:[#allocation11 + $0x1f0] sm:$0xf0]  ;;  %v9573_v57 = vld [vmem:[#allocation14 + $0xa8] sm:$0xff] }
 0x8f4   :  { %v7374_v4 = vor.u32 %v9478_v59, %v7371_v35  ;;  %v9564_v59 = vld [vmem:[#allocation14 + $0x60] sm:$0xff]  ;;  %v9555_v35 = vld [vmem:[#allocation14 + $0x18] sm:$0xff]  ;;  %v9594_v39 = vld [vmem:[#allocation14 + $0x150] sm:$0xff] }
 0x8f5   :  { %2025 = vmatpush.bf16.msra.mxu1 %v7162_v8  ;;  %2039 = vmatpush.bf16.msra.mxu2 %v7166_v9  ;;  %v7382_v8 = vor.u32 %v9479_v62, %v7379_v0  ;;  %v9462_v9 = vld [vmem:[#allocation11 + $0x134] sm:$0xf]  ;;  %v9571_v62 = vld [vmem:[#allocation14 + $0x98] sm:$0xff] }
 0x8f6   :  { %2053 = vmatpush.bf16.msra.mxu3 %v7170_v13  ;;  %2067 = vmatpush.bf16.msrb.mxu0 %v7174_v14  ;;  %v9463_v13 = vld [vmem:[#allocation11 + $0x13c] sm:$0xf]  ;;  %v9554_v0 = vld [vmem:[#allocation14 + $0x10] sm:$0xff] }
 0x8f7   :  { %v7315_v14 = vld [vmem:[#allocation11 + $0x178] sm:$0xf0]  ;;  %v9602_v40 = vld [vmem:[#allocation14 + $0x190] sm:$0xff] }
 0x8f8   :  { %2026 = vmatmul.bf16.vlgmr.msra.gmra.mxu1 %v10723_v30  ;;  %2040 = vmatmul.bf16.vlgmr.msra.gmra.mxu2 %v10723_v30 }
 0x8f9   :  { %2074 = vmatpush.bf16.msrb.mxu1 %v7626_v16  ;;  %2088 = vmatpush.bf16.msrb.mxu2 %v7630_v17  ;;  %v7306_v16 = vor.u32 %v9470_v6, %v7305_v5  ;;  %v7310_v17 = vor.u32 %v9462_v9, %v7307_v10  ;;  %v9570_v5 = vld [vmem:[#allocation14 + $0x90] sm:$0xff]  ;;  %v9553_v6 = vld [vmem:[#allocation14 + $0x8] sm:$0xff]  ;;  %v9552_v10 = vld [vmem:[#allocation14] sm:$0xff] }
 0x8fa   :  { %2102 = vmatpush.bf16.msrb.mxu3 %v7634_v21  ;;  %2116 = vmatpush.bf16.msra.mxu0 %v7638_v22  ;;  %v7314_v21 = vor.u32 %v9471_v12, %v7313_v11  ;;  %v7318_v22 = vor.u32 %v9463_v13, %v7315_v14  ;;  %v9569_v9 = vld [vmem:[#allocation14 + $0x88] sm:$0xff]  ;;  %v9576_v11 = vld [vmem:[#allocation14 + $0xc0] sm:$0xff]  ;;  %v9591_v12 = vld [vmem:[#allocation14 + $0x138] sm:$0xff] }
 0x8fb   :  { %2054 = vmatmul.bf16.vlgmr.msra.gmra.mxu3 %v10723_v30  ;;  %2068 = vmatmul.bf16.vlgmr.msrb.gmra.mxu0 %v10723_v30  ;;  %v9615_v13 = vld [vmem:[#allocation14 + $0x1f8] sm:$0xff]  ;;  %v9560_v14 = vld [vmem:[#allocation14 + $0x40] sm:$0xff] }
 0x8fd   :  { %2075 = vmatpush.bf16.msrb.mxu1 %v7562_v60  ;;  %2089 = vmatpush.bf16.msrb.mxu2 %v7566_v45  ;;  %v7242_v60 = vor.u32 %v9454_v20, %v7241_v18  ;;  %v7246_v45 = vor.u32 %v9446_v33, %v7243_v29  ;;  %v9607_v18 = vld [vmem:[#allocation14 + $0x1b8] sm:$0xff]  ;;  %v9590_v20 = vld [vmem:[#allocation14 + $0x130] sm:$0xff]  ;;  %v9589_v29 = vld [vmem:[#allocation14 + $0x128] sm:$0xff] }
 0x8fe   :  { %2103 = vmatpush.bf16.msrb.mxu3 %v7570_v31  ;;  %2117 = vmatpush.bf16.msra.mxu0 %v7574_v32  ;;  %v7250_v31 = vor.u32 %v9455_v27, %v7249_v19  ;;  %v7254_v32 = vor.u32 %v9447_v28, %v7251_v43  ;;  %v9606_v33 = vld [vmem:[#allocation14 + $0x1b0] sm:$0xff]  ;;  %v9613_v19 = vld [vmem:[#allocation14 + $0x1e8] sm:$0xff]  ;;  %v9588_v43 = vld [vmem:[#allocation14 + $0x120] sm:$0xff] }
 0x8ff   :  { %v9597_v27 = vld [vmem:[#allocation14 + $0x168] sm:$0xff] }
 0x900   :  { %v9605_v28 = vld [vmem:[#allocation14 + $0x1a8] sm:$0xff] }
 0x901   :  { %2076 = vmatpush.bf16.msrb.mxu1 %v7498_v41  ;;  %2090 = vmatpush.bf16.msrb.mxu2 %v7502_v42  ;;  %v7178_v41 = vor.u32 %v9438_v25, %v7177_v1  ;;  %v7182_v42 = vor.u32 %v9430_v24, %v7179_v26  ;;  %v9604_v1 = vld [vmem:[#allocation14 + $0x1a0] sm:$0xff]  ;;  %v9587_v25 = vld [vmem:[#allocation14 + $0x118] sm:$0xff]  ;;  %v9586_v26 = vld [vmem:[#allocation14 + $0x110] sm:$0xff] }
 0x902   :  { %2104 = vmatpush.bf16.msrb.mxu3 %v7506_v47  ;;  %2118 = vmatpush.bf16.msra.mxu0 %v7510_v48  ;;  %v9559_v47 = vld [vmem:[#allocation14 + $0x38] sm:$0xff] }
 0x903   :  { %v9583_v48 = vld [vmem:[#allocation14 + $0xf8] sm:$0xff] }
 0x904   :  { %v9603_v24 = vld [vmem:[#allocation14 + $0x198] sm:$0xff] }
 0x905   :  { %2077 = vmatpush.bf16.msrb.mxu1 %v7434_v55  ;;  %2091 = vmatpush.bf16.msrb.mxu2 %v7438_v56  ;;  %v9557_v55 = vld [vmem:[#allocation14 + $0x28] sm:$0xff] }
 0x906   :  { %2105 = vmatpush.bf16.msrb.mxu3 %v7442_v58  ;;  %2119 = vmatpush.bf16.msra.mxu0 %v7446_v23  ;;  %v9581_v56 = vld [vmem:[#allocation14 + $0xe8] sm:$0xff]  ;;  %v9556_v58 = vld [vmem:[#allocation14 + $0x20] sm:$0xff] }
 0x907   :  { %v9580_v23 = vld [vmem:[#allocation14 + $0xe0] sm:$0xff] }
 0x909   :  { %2078 = vmatpush.bf16.msrb.mxu1 %v7370_v2  ;;  %2092 = vmatpush.bf16.msrb.mxu2 %v7374_v4  ;;  %v9578_v2 = vld [vmem:[#allocation14 + $0xd0] sm:$0xff] }
 0x90a   :  { %2106 = vmatpush.bf16.msrb.mxu3 %v7378_v7  ;;  %2120 = vmatpush.bf16.msra.mxu0 %v7382_v8  ;;  %v9562_v4 = vld [vmem:[#allocation14 + $0x50] sm:$0xff]  ;;  %v9577_v7 = vld [vmem:[#allocation14 + $0xc8] sm:$0xff] }
 0x90b   :  { %v9561_v8 = vld [vmem:[#allocation14 + $0x48] sm:$0xff] }
 0x90d   :  { %2079 = vmatpush.bf16.msrb.mxu1 %v7306_v16  ;;  %2093 = vmatpush.bf16.msrb.mxu2 %v7310_v17  ;;  %v9568_v16 = vld [vmem:[#allocation14 + $0x80] sm:$0xff]  ;;  %v9599_v17 = vld [vmem:[#allocation14 + $0x178] sm:$0xff] }
 0x90e   :  { %2107 = vmatpush.bf16.msrb.mxu3 %v7314_v21  ;;  %2121 = vmatpush.bf16.msra.mxu0 %v7318_v22  ;;  %v9614_v21 = vld [vmem:[#allocation14 + $0x1f0] sm:$0xff] }
 0x90f   :  { %v9598_v22 = vld [vmem:[#allocation14 + $0x170] sm:$0xff] }
 0x911   :  { %2080 = vmatpush.bf16.msrb.mxu1 %v7242_v60  ;;  %2094 = vmatpush.bf16.msrb.mxu2 %v7246_v45  ;;  %v9612_v60 = vld [vmem:[#allocation14 + $0x1e0] sm:$0xff] }
 0x912   :  { %2108 = vmatpush.bf16.msrb.mxu3 %v7250_v31  ;;  %2122 = vmatpush.bf16.msra.mxu0 %v7254_v32  ;;  %v9596_v45 = vld [vmem:[#allocation14 + $0x160] sm:$0xff]  ;;  %v9611_v31 = vld [vmem:[#allocation14 + $0x1d8] sm:$0xff] }
 0x913   :  { %v9595_v32 = vld [vmem:[#allocation14 + $0x158] sm:$0xff] }
 0x915   :  { %2081 = vmatpush.bf16.msrb.mxu1 %v7178_v41  ;;  %2095 = vmatpush.bf16.msrb.mxu2 %v7182_v42  ;;  %v9609_v41 = vld [vmem:[#allocation14 + $0x1c8] sm:$0xff] }
 0x916   :  { %2109 = vmatpush.bf16.msrb.mxu3 %v7186_v44  ;;  %2123 = vmatpush.bf16.msra.mxu0 %v7190_v46  ;;  %v9593_v42 = vld [vmem:[#allocation14 + $0x148] sm:$0xff]  ;;  %v9584_v46 = vld [vmem:[#allocation14 + $0x100] sm:$0xff] }
 0x917   :  { %v9601_v44 = vld [vmem:[#allocation14 + $0x188] sm:$0xff] }
 0x918   :  { %2082 = vmatmul.bf16.vlgmr.msrb.gmra.mxu1 %v10723_v30  ;;  %2096 = vmatmul.bf16.vlgmr.msrb.gmra.mxu2 %v10723_v30 }
 0x919   :  { %3206 = vmatpush.bf16.msra.mxu1 %v9559_v47  ;;  %2110 = vmatmul.bf16.vlgmr.msrb.gmra.mxu3 %v10723_v30  ;;  %v9608_v47 = vld [vmem:[#allocation14 + $0x1c0] sm:$0xff] }
 0x91a   :  { %3248 = vmatpush.bf16.msrb.mxu0 %v9583_v48  ;;  %3220 = vmatpush.bf16.msra.mxu2 %v9567_v49  ;;  %v9592_v48 = vld [vmem:[#allocation14 + $0x140] sm:$0xff] }
 0x91b   :  { %2124 = vmatmul.bf16.vlgmr.msra.gmra.mxu0 %v10723_v30  ;;  %3234 = vmatpush.bf16.msra.mxu3 %v9575_v50  ;;  %v9572_v30 = vld [vmem:[#allocation14 + $0xa0] sm:$0xff] }
 0x91c   :  { %v9600_v49 = vld [vmem:[#allocation14 + $0x180] sm:$0xff] }
 0x91d   :  { %3207 = vmatpush.bf16.msra.mxu1 %v9558_v51  ;;  %v10741_v50 = vld [vmem:[#allocation13] sm:$0xff] }
 0x91e   :  { %3249 = vmatpush.bf16.msrb.mxu0 %v9582_v52  ;;  %3221 = vmatpush.bf16.msra.mxu2 %v9566_v53  ;;  %v1234_v53 = vperm.slane %v10741_v50, 0 }
 0x91f   :  { %3235 = vmatpush.bf16.msra.mxu3 %v9574_v54  ;;  %v1237_v54 = vperm.slane %v10741_v50, 3 }
 0x921   :  { %3208 = vmatpush.bf16.msra.mxu1 %v9557_v55 }
 0x922   :  { %3250 = vmatpush.bf16.msrb.mxu0 %v9581_v56  ;;  %3222 = vmatpush.bf16.msra.mxu2 %v9565_v3 }
 0x923   :  { %3236 = vmatpush.bf16.msra.mxu3 %v9573_v57 }
 0x925   :  { %3209 = vmatpush.bf16.msra.mxu1 %v9556_v58 }
 0x926   :  { %3251 = vmatpush.bf16.msrb.mxu0 %v9580_v23  ;;  %3223 = vmatpush.bf16.msra.mxu2 %v9564_v59  ;;  %v1235_v23 = vperm.slane %v10741_v50, 1 }
 0x927   :  { %3237 = vmatpush.bf16.msra.mxu3 %v9572_v30 }
 0x929   :  { %3210 = vmatpush.bf16.msra.mxu1 %v9555_v35  ;;  %v1236_v35 = vperm.slane %v10741_v50, 2 }
 0x92a   :  { %3252 = vmatpush.bf16.msrb.mxu0 %v9579_v37  ;;  %3224 = vmatpush.bf16.msra.mxu2 %v9563_v61 }
 0x92b   :  { %3238 = vmatpush.bf16.msra.mxu3 %v9571_v62 }
 0x92d   :  { %3211 = vmatpush.bf16.msra.mxu1 %v9554_v0 }
 0x92e   :  { %3253 = vmatpush.bf16.msrb.mxu0 %v9578_v2  ;;  %3225 = vmatpush.bf16.msra.mxu2 %v9562_v4  ;;  %v9623_v4 = vld [vmem:[#allocation14 + $0x238] sm:$0xff] }
 0x92f   :  { %3239 = vmatpush.bf16.msra.mxu3 %v9570_v5 }
 0x931   :  { %3212 = vmatpush.bf16.msra.mxu1 %v9553_v6 }
 0x932   :  { %3254 = vmatpush.bf16.msrb.mxu0 %v9577_v7  ;;  %3226 = vmatpush.bf16.msra.mxu2 %v9561_v8  ;;  %v9647_v7 = vld [vmem:[#allocation14 + $0x2f8] sm:$0xff] }
 0x933   :  { %3240 = vmatpush.bf16.msra.mxu3 %v9569_v9 }
 0x935   :  { %3213 = vmatpush.bf16.msra.mxu1 %v9552_v10 }
 0x936   :  { %3255 = vmatpush.bf16.msrb.mxu0 %v9576_v11  ;;  %3227 = vmatpush.bf16.msra.mxu2 %v9560_v14 }
 0x937   :  { %3241 = vmatpush.bf16.msra.mxu3 %v9568_v16  ;;  %v9622_v16 = vld [vmem:[#allocation14 + $0x230] sm:$0xff] }
 0x939   :  { %3262 = vmatpush.bf16.msrb.mxu1 %v9591_v12 }
 0x93a   :  { %3304 = vmatpush.bf16.msra.mxu0 %v9615_v13  ;;  %3276 = vmatpush.bf16.msrb.mxu2 %v9599_v17 }
 0x93b   :  { %3290 = vmatpush.bf16.msrb.mxu3 %v9607_v18 }
 0x93d   :  { %3263 = vmatpush.bf16.msrb.mxu1 %v9590_v20 }
 0x93e   :  { %3305 = vmatpush.bf16.msra.mxu0 %v9614_v21  ;;  %3277 = vmatpush.bf16.msrb.mxu2 %v9598_v22  ;;  %v9646_v21 = vld [vmem:[#allocation14 + $0x2f0] sm:$0xff] }
 0x93f   :  { %3291 = vmatpush.bf16.msrb.mxu3 %v9606_v33 }
 0x941   :  { %3264 = vmatpush.bf16.msrb.mxu1 %v9589_v29  ;;  %v9631_v29 = vld [vmem:[#allocation14 + $0x278] sm:$0xff] }
 0x942   :  { %3306 = vmatpush.bf16.msra.mxu0 %v9613_v19  ;;  %3278 = vmatpush.bf16.msrb.mxu2 %v9597_v27  ;;  %v1238_v27 = vperm.slane %v10741_v50, 4 }
 0x943   :  { %3292 = vmatpush.bf16.msrb.mxu3 %v9605_v28  ;;  %v9639_v28 = vld [vmem:[#allocation14 + $0x2b8] sm:$0xff] }
 0x945   :  { %3265 = vmatpush.bf16.msrb.mxu1 %v9588_v43 }
 0x946   :  { %3307 = vmatpush.bf16.msra.mxu0 %v9612_v60  ;;  %3279 = vmatpush.bf16.msrb.mxu2 %v9596_v45  ;;  %v1241_v60 = vperm.slane %v10741_v50, 7  ;;  %v9621_v45 = vld [vmem:[#allocation14 + $0x228] sm:$0xff] }
 0x947   :  { %3293 = vmatpush.bf16.msrb.mxu3 %v9604_v1  ;;  %v9645_v1 = vld [vmem:[#allocation14 + $0x2e8] sm:$0xff] }
 0x949   :  { %3266 = vmatpush.bf16.msrb.mxu1 %v9587_v25 }
 0x94a   :  { %3308 = vmatpush.bf16.msra.mxu0 %v9611_v31  ;;  %3280 = vmatpush.bf16.msrb.mxu2 %v9595_v32  ;;  %v9630_v31 = vld [vmem:[#allocation14 + $0x270] sm:$0xff] }
 0x94b   :  { %3294 = vmatpush.bf16.msrb.mxu3 %v9603_v24 }
 0x94d   :  { %3267 = vmatpush.bf16.msrb.mxu1 %v9586_v26  ;;  %v9638_v26 = vld [vmem:[#allocation14 + $0x2b0] sm:$0xff] }
 0x94e   :  { %3309 = vmatpush.bf16.msra.mxu0 %v9610_v34  ;;  %3281 = vmatpush.bf16.msrb.mxu2 %v9594_v39 }
 0x94f   :  { %3295 = vmatpush.bf16.msrb.mxu3 %v9602_v40  ;;  %v9620_v40 = vld [vmem:[#allocation14 + $0x220] sm:$0xff] }
 0x951   :  { %3268 = vmatpush.bf16.msrb.mxu1 %v9585_v63  ;;  %v1239_v63 = vperm.slane %v10741_v50, 5 }
 0x952   :  { %3310 = vmatpush.bf16.msra.mxu0 %v9609_v41  ;;  %3282 = vmatpush.bf16.msrb.mxu2 %v9593_v42 }
 0x953   :  { %3296 = vmatpush.bf16.msrb.mxu3 %v9601_v44  ;;  %v9644_v44 = vld [vmem:[#allocation14 + $0x2e0] sm:$0xff] }
 0x954   :  { %v1915_v51 = vpop.f32.mrf.mxu1 }
 0x955   :  { %3269 = vmatpush.bf16.msrb.mxu1 %v9584_v46  ;;  %v1957_v52 = vpop.f32.mrf.mxu0  ;;  %v1916_v56 = vadd.f32 %v1915_v51, %v1234_v53  ;;  %v1240_v46 = vperm.slane %v10741_v50, 6  ;;  %v9628_v50 = vld [vmem:[#allocation14 + $0x260] sm:$0xff] }
 0x956   :  { %3311 = vmatpush.bf16.msra.mxu0 %v9608_v47  ;;  %3283 = vmatpush.bf16.msrb.mxu2 %v9592_v48  ;;  %v1958_v57 = vadd.f32 %v1957_v52, %v1237_v54  ;;  %v9629_v48 = vld [vmem:[#allocation14 + $0x268] sm:$0xff] }
 0x957   :  { %3297 = vmatpush.bf16.msrb.mxu3 %v9600_v49  ;;  %v2130_v61 = vmax.f32 %v1916_v56, 0.0  ;;  %v9637_v52 = vld [vmem:[#allocation14 + $0x2a8] sm:$0xff] }
 0x958   :  { %v2133_v0 = vmax.f32 %v1958_v57, 0.0  ;;  %v9643_v57 = vld [vmem:[#allocation14 + $0x2d8] sm:$0xff] }
 0x95a   :  { %v1929_v55 = vpop.f32.mrf.mxu2 }
 0x95b   :  { %v1943_v3 = vpop.f32.mrf.mxu3  ;;  %v1930_v5 = vadd.f32 %v1929_v55, %v1235_v23  ;;  %v9619_v55 = vld [vmem:[#allocation14 + $0x218] sm:$0xff] }
 0x95c   :  { %v1917_v58 = vpop.f32.mrf.mxu1  ;;  %v1944_v8 = vadd.f32 %v1943_v3, %v1236_v35 }
 0x95d   :  { %v1918_v59 = vadd.f32 %v1917_v58, %v1234_v53  ;;  %v1959_v30 = vpop.f32.mrf.mxu0  ;;  %v2131_v17 = vmax.f32 %v1930_v5, 0.0 }
 0x95e   :  { %v1960_v37 = vadd.f32 %v1959_v30, %v1237_v54  ;;  %v2132_v22 = vmax.f32 %v1944_v8, 0.0 }
 0x95f   :  { %v2146_v62 = vmax.f32 %v1918_v59, 0.0 }
 0x960   :  { %v2149_v2 = vmax.f32 %v1960_v37, 0.0  ;;  %v9636_v37 = vld [vmem:[#allocation14 + $0x2a0] sm:$0xff] }
 0x961   :  { %v2162_v6 = vpack.c.bf16 %v2146_v62, %v2130_v61  ;;  %v9618_v62 = vld [vmem:[#allocation14 + $0x210] sm:$0xff] }
 0x962   :  { %v2165_v9 = vpack.c.bf16 %v2149_v2, %v2133_v0  ;;  %v1931_v10 = vpop.f32.mrf.mxu2 }
 0x963   :  { %v1932_v11 = vadd.f32 %v1931_v10, %v1235_v23  ;;  %v1945_v12 = vpop.f32.mrf.mxu3  ;;  %3214 = vmatmul.bf16.vlgmr.msra.gmra.mxu1 %v2162_v6 }
 0x964   :  { %v1946_v13 = vadd.f32 %v1945_v12, %v1236_v35  ;;  %3256 = vmatmul.bf16.vlgmr.msrb.gmra.mxu0 %v2165_v9  ;;  %3318 = vmatpush.bf16.msra.mxu1 %v9623_v4  ;;  %v1971_v14 = vpop.f32.mrf.mxu1  ;;  %v9642_v4 = vld [vmem:[#allocation14 + $0x2d0] sm:$0xff]  ;;  %v9627_v9 = vld [vmem:[#allocation14 + $0x258] sm:$0xff] }
 0x965   :  { %v2147_v18 = vmax.f32 %v1932_v11, 0.0  ;;  %3360 = vmatpush.bf16.msrb.mxu0 %v9647_v7  ;;  %v2013_v20 = vpop.f32.mrf.mxu0  ;;  %v1972_v32 = vadd.f32 %v1971_v14, %v1238_v27  ;;  %v10751_v7 = vld [vmem:[#allocation13 + $0x8] sm:$0xff]  ;;  %v9635_v12 = vld [vmem:[#allocation14 + $0x298] sm:$0xff] }
 0x966   :  { %v2148_v33 = vmax.f32 %v1946_v13, 0.0  ;;  %v2014_v34 = vadd.f32 %v2013_v20, %v1241_v60  ;;  %v9617_v14 = vld [vmem:[#allocation14 + $0x208] sm:$0xff]  ;;  %v9626_v20 = vld [vmem:[#allocation14 + $0x250] sm:$0xff] }
 0x967   :  { %v2163_v19 = vpack.c.bf16 %v2147_v18, %v2131_v17  ;;  %v2134_v49 = vmax.f32 %v1972_v32, 0.0  ;;  %v9641_v17 = vld [vmem:[#allocation14 + $0x2c8] sm:$0xff]  ;;  %v1245_v18 = vperm.slane %v10751_v7, 3 }
 0x968   :  { %v2164_v43 = vpack.c.bf16 %v2148_v33, %v2132_v22  ;;  %3319 = vmatpush.bf16.msra.mxu1 %v9622_v16  ;;  %v2137_v53 = vmax.f32 %v2014_v34, 0.0  ;;  %v1242_v16 = vperm.slane %v10751_v7, 0  ;;  %v9616_v33 = vld [vmem:[#allocation14 + $0x200] sm:$0xff] }
 0x969   :  { %3361 = vmatpush.bf16.msrb.mxu0 %v9646_v21  ;;  %3228 = vmatmul.bf16.vlgmr.msra.gmra.mxu2 %v2163_v19  ;;  %v9634_v21 = vld [vmem:[#allocation14 + $0x290] sm:$0xff] }
 0x96a   :  { %3242 = vmatmul.bf16.vlgmr.msra.gmra.mxu3 %v2164_v43  ;;  %3332 = vmatpush.bf16.msra.mxu2 %v9631_v29  ;;  %v1985_v25 = vpop.f32.mrf.mxu2 }
 0x96b   :  { %3346 = vmatpush.bf16.msra.mxu3 %v9639_v28  ;;  %v1999_v24 = vpop.f32.mrf.mxu3  ;;  %v1986_v56 = vadd.f32 %v1985_v25, %v1239_v63  ;;  %v9655_v28 = vld [vmem:[#allocation14 + $0x338] sm:$0xff]  ;;  %v1243_v25 = vperm.slane %v10751_v7, 1 }
 0x96c   :  { %3320 = vmatpush.bf16.msra.mxu1 %v9621_v45  ;;  %v1973_v39 = vpop.f32.mrf.mxu1  ;;  %v2000_v58 = vadd.f32 %v1999_v24, %v1240_v46  ;;  %v9679_v45 = vld [vmem:[#allocation14 + $0x3f8] sm:$0xff]  ;;  %v9633_v24 = vld [vmem:[#allocation14 + $0x288] sm:$0xff] }
 0x96d   :  { %3362 = vmatpush.bf16.msrb.mxu0 %v9645_v1  ;;  %v1974_v41 = vadd.f32 %v1973_v39, %v1238_v27  ;;  %v2015_v42 = vpop.f32.mrf.mxu0  ;;  %v2135_v0 = vmax.f32 %v1986_v56, 0.0  ;;  %v9640_v27 = vld [vmem:[#allocation14 + $0x2c0] sm:$0xff]  ;;  %v9625_v1 = vld [vmem:[#allocation14 + $0x248] sm:$0xff] }
 0x96e   :  { %v2016_v47 = vadd.f32 %v2015_v42, %v1241_v60  ;;  %3333 = vmatpush.bf16.msra.mxu2 %v9630_v31  ;;  %v2136_v5 = vmax.f32 %v2000_v58, 0.0  ;;  %v9654_v42 = vld [vmem:[#allocation14 + $0x330] sm:$0xff]  ;;  %v9653_v58 = vld [vmem:[#allocation14 + $0x328] sm:$0xff] }
 0x96f   :  { %v2150_v51 = vmax.f32 %v1974_v41, 0.0  ;;  %3347 = vmatpush.bf16.msra.mxu3 %v9638_v26  ;;  %v1244_v26 = vperm.slane %v10751_v7, 2 }
 0x970   :  { %v2153_v54 = vmax.f32 %v2016_v47, 0.0  ;;  %3321 = vmatpush.bf16.msra.mxu1 %v9620_v40  ;;  %v9678_v47 = vld [vmem:[#allocation14 + $0x3f0] sm:$0xff] }
 0x971   :  { %v2166_v3 = vpack.c.bf16 %v2150_v51, %v2134_v49  ;;  %3363 = vmatpush.bf16.msrb.mxu0 %v9644_v44 }
 0x972   :  { %v2169_v23 = vpack.c.bf16 %v2153_v54, %v2137_v53  ;;  %3334 = vmatpush.bf16.msra.mxu2 %v9629_v48  ;;  %v1987_v59 = vpop.f32.mrf.mxu2  ;;  %v9624_v48 = vld [vmem:[#allocation14 + $0x240] sm:$0xff]  ;;  %v9663_v54 = vld [vmem:[#allocation14 + $0x378] sm:$0xff] }
 0x973   :  { %3348 = vmatpush.bf16.msra.mxu3 %v9637_v52  ;;  %v1988_v30 = vadd.f32 %v1987_v59, %v1239_v63  ;;  %v2001_v35 = vpop.f32.mrf.mxu3  ;;  %3270 = vmatmul.bf16.vlgmr.msrb.gmra.mxu1 %v2166_v3  ;;  %v9632_v53 = vld [vmem:[#allocation14 + $0x280] sm:$0xff]  ;;  %v9671_v3 = vld [vmem:[#allocation14 + $0x3b8] sm:$0xff] }
 0x974   :  { %v2002_v61 = vadd.f32 %v2001_v35, %v1240_v46  ;;  %3312 = vmatmul.bf16.vlgmr.msra.gmra.mxu0 %v2169_v23  ;;  %3322 = vmatpush.bf16.msra.mxu1 %v9619_v55 }
 0x975   :  { %v2151_v2 = vmax.f32 %v1988_v30, 0.0  ;;  %3364 = vmatpush.bf16.msrb.mxu0 %v9643_v57  ;;  %v2027_v8 = vpop.f32.mrf.mxu1 }
 0x976   :  { %v2152_v6 = vmax.f32 %v2002_v61, 0.0  ;;  %3335 = vmatpush.bf16.msra.mxu2 %v9628_v50  ;;  %v2028_v29 = vadd.f32 %v2027_v8, %v1242_v16  ;;  %v9677_v50 = vld [vmem:[#allocation14 + $0x3e8] sm:$0xff]  ;;  %v9651_v8 = vld [vmem:[#allocation14 + $0x318] sm:$0xff] }
 0x977   :  { %v2167_v10 = vpack.c.bf16 %v2151_v2, %v2135_v0  ;;  %3349 = vmatpush.bf16.msra.mxu3 %v9636_v37  ;;  %v9662_v37 = vld [vmem:[#allocation14 + $0x370] sm:$0xff]  ;;  %v9652_v2 = vld [vmem:[#allocation14 + $0x320] sm:$0xff] }
 0x978   :  { %v2069_v11 = vpop.f32.mrf.mxu0  ;;  %v2168_v13 = vpack.c.bf16 %v2152_v6, %v2136_v5  ;;  %3323 = vmatpush.bf16.msra.mxu1 %v9618_v62  ;;  %v2138_v39 = vmax.f32 %v2028_v29, 0.0  ;;  %v9670_v62 = vld [vmem:[#allocation14 + $0x3b0] sm:$0xff]  ;;  %v9661_v5 = vld [vmem:[#allocation14 + $0x368] sm:$0xff] }
 0x979   :  { %3365 = vmatpush.bf16.msrb.mxu0 %v9642_v4  ;;  %3284 = vmatmul.bf16.vlgmr.msrb.gmra.mxu2 %v2167_v10  ;;  %v2070_v43 = vadd.f32 %v2069_v11, %v1245_v18  ;;  %v9676_v4 = vld [vmem:[#allocation14 + $0x3e0] sm:$0xff]  ;;  %v9669_v6 = vld [vmem:[#allocation14 + $0x3a8] sm:$0xff]  ;;  %v9658_v29 = vld [vmem:[#allocation14 + $0x350] sm:$0xff] }
 0x97a   :  { %3298 = vmatmul.bf16.vlgmr.msrb.gmra.mxu3 %v2168_v13  ;;  %3336 = vmatpush.bf16.msra.mxu2 %v9627_v9  ;;  %v9675_v9 = vld [vmem:[#allocation14 + $0x3d8] sm:$0xff]  ;;  %v9660_v10 = vld [vmem:[#allocation14 + $0x360] sm:$0xff] }
 0x97b   :  { %3350 = vmatpush.bf16.msra.mxu3 %v9635_v12  ;;  %v2041_v22 = vpop.f32.mrf.mxu2  ;;  %v2141_v63 = vmax.f32 %v2070_v43, 0.0  ;;  %v9668_v11 = vld [vmem:[#allocation14 + $0x3a0] sm:$0xff]  ;;  %v9650_v12 = vld [vmem:[#allocation14 + $0x310] sm:$0xff] }
 0x97c   :  { %3324 = vmatpush.bf16.msra.mxu1 %v9617_v14  ;;  %v2042_v44 = vadd.f32 %v2041_v22, %v1243_v25  ;;  %v9674_v14 = vld [vmem:[#allocation14 + $0x3d0] sm:$0xff]  ;;  %v1249_v22 = vperm.slane %v10751_v7, 7 }
 0x97d   :  { %3366 = vmatpush.bf16.msrb.mxu0 %v9641_v17  ;;  %v2029_v60 = vpop.f32.mrf.mxu1  ;;  %v9659_v17 = vld [vmem:[#allocation14 + $0x358] sm:$0xff] }
 0x97e   :  { %v2055_v19 = vpop.f32.mrf.mxu3  ;;  %3337 = vmatpush.bf16.msra.mxu2 %v9626_v20  ;;  %v2030_v31 = vadd.f32 %v2029_v60, %v1242_v16  ;;  %v2139_v23 = vmax.f32 %v2042_v44, 0.0  ;;  %v1246_v20 = vperm.slane %v10751_v7, 4  ;;  %v9648_v60 = vld [vmem:[#allocation14 + $0x300] sm:$0xff] }
 0x97f   :  { %3351 = vmatpush.bf16.msra.mxu3 %v9634_v21  ;;  %v2056_v49 = vadd.f32 %v2055_v19, %v1244_v26  ;;  %v9649_v21 = vld [vmem:[#allocation14 + $0x308] sm:$0xff] }
 0x980   :  { %v2071_v32 = vpop.f32.mrf.mxu0  ;;  %3325 = vmatpush.bf16.msra.mxu1 %v9616_v33  ;;  %v2154_v40 = vmax.f32 %v2030_v31, 0.0  ;;  %v9673_v33 = vld [vmem:[#allocation14 + $0x3c8] sm:$0xff]  ;;  %v1247_v31 = vperm.slane %v10751_v7, 5 }
 0x981   :  { %v2072_v34 = vadd.f32 %v2071_v32, %v1245_v18  ;;  %3367 = vmatpush.bf16.msrb.mxu0 %v9640_v27  ;;  %v2140_v30 = vmax.f32 %v2056_v49, 0.0  ;;  %v9667_v18 = vld [vmem:[#allocation14 + $0x398] sm:$0xff]  ;;  %v9666_v27 = vld [vmem:[#allocation14 + $0x390] sm:$0xff] }
 0x982   :  { %3338 = vmatpush.bf16.msra.mxu2 %v9625_v1  ;;  %v2170_v46 = vpack.c.bf16 %v2154_v40, %v2138_v39  ;;  %v9665_v40 = vld [vmem:[#allocation14 + $0x388] sm:$0xff] }
 0x983   :  { %v2157_v41 = vmax.f32 %v2072_v34, 0.0  ;;  %3352 = vmatpush.bf16.msra.mxu3 %v9633_v24  ;;  %v2043_v52 = vpop.f32.mrf.mxu2  ;;  %v1248_v34 = vperm.slane %v10751_v7, 6 }
 0x984   :  { %3374 = vmatpush.bf16.msrb.mxu1 %v9655_v28  ;;  %v2044_v55 = vadd.f32 %v2043_v52, %v1243_v25  ;;  %v9672_v25 = vld [vmem:[#allocation14 + $0x3c0] sm:$0xff] }
 0x985   :  { %3416 = vmatpush.bf16.msra.mxu0 %v9679_v45  ;;  %v2173_v51 = vpack.c.bf16 %v2157_v41, %v2141_v63  ;;  %3326 = vmatmul.bf16.vlgmr.msra.gmra.mxu1 %v2170_v46 }
 0x986   :  { %v2057_v56 = vpop.f32.mrf.mxu3  ;;  %v2155_v59 = vmax.f32 %v2044_v55, 0.0  ;;  %3339 = vmatpush.bf16.msra.mxu2 %v9624_v48  ;;  %v9656_v48 = vld [vmem:[#allocation14 + $0x340] sm:$0xff] }
 0x987   :  { %v2058_v57 = vadd.f32 %v2057_v56, %v1244_v26  ;;  %3368 = vmatmul.bf16.vlgmr.msrb.gmra.mxu0 %v2173_v51  ;;  %3353 = vmatpush.bf16.msra.mxu3 %v9632_v53  ;;  %v9657_v26 = vld [vmem:[#allocation14 + $0x348] sm:$0xff]  ;;  %v9664_v53 = vld [vmem:[#allocation14 + $0x380] sm:$0xff] }
 0x988   :  { %3375 = vmatpush.bf16.msrb.mxu1 %v9654_v42  ;;  %v2171_v61 = vpack.c.bf16 %v2155_v59, %v2139_v23 }
 0x989   :  { %3417 = vmatpush.bf16.msra.mxu0 %v9678_v47  ;;  %v2156_v35 = vmax.f32 %v2058_v57, 0.0 }
 0x98a   :  { %3388 = vmatpush.bf16.msrb.mxu2 %v9663_v54 }
 0x98b   :  { %3402 = vmatpush.bf16.msrb.mxu3 %v9671_v3  ;;  %v2172_v0 = vpack.c.bf16 %v2156_v35, %v2140_v30  ;;  %3340 = vmatmul.bf16.vlgmr.msra.gmra.mxu2 %v2171_v61 }
 0x98c   :  { %3376 = vmatpush.bf16.msrb.mxu1 %v9653_v58 }
 0x98d   :  { %3418 = vmatpush.bf16.msra.mxu0 %v9677_v50  ;;  %3354 = vmatmul.bf16.vlgmr.msra.gmra.mxu3 %v2172_v0 }
 0x98e   :  { %3389 = vmatpush.bf16.msrb.mxu2 %v9662_v37 }
 0x98f   :  { %3403 = vmatpush.bf16.msrb.mxu3 %v9670_v62 }
 0x990   :  { %3377 = vmatpush.bf16.msrb.mxu1 %v9652_v2  ;;  %v10013_v2 = vld [vmem:[%s11044_s10] ss:$0 sm:$0xff] }
 0x991   :  { %3419 = vmatpush.bf16.msra.mxu0 %v9676_v4 }
 0x992   :  { %3390 = vmatpush.bf16.msrb.mxu2 %v9661_v5 }
 0x993   :  { %3404 = vmatpush.bf16.msrb.mxu3 %v9669_v6 }
 0x994   :  { %3378 = vmatpush.bf16.msrb.mxu1 %v9651_v8 }
 0x995   :  { %v2083_v13 = vpop.f32.mrf.mxu1  ;;  %3420 = vmatpush.bf16.msra.mxu0 %v9675_v9 }
 0x996   :  { %3391 = vmatpush.bf16.msrb.mxu2 %v9660_v10  ;;  %v2084_v28 = vadd.f32 %v2083_v13, %v1246_v20 }
 0x997   :  { %3405 = vmatpush.bf16.msrb.mxu3 %v9668_v11 }
 0x998   :  { %v2125_v16 = vpop.f32.mrf.mxu0  ;;  %3379 = vmatpush.bf16.msrb.mxu1 %v9650_v12  ;;  %v2142_v63 = vmax.f32 %v2084_v28, 0.0 }
 0x999   :  { %3421 = vmatpush.bf16.msra.mxu0 %v9674_v14  ;;  %v2126_v45 = vadd.f32 %v2125_v16, %v1249_v22 }
 0x99a   :  { %3392 = vmatpush.bf16.msrb.mxu2 %v9659_v17 }
 0x99b   :  { %v2097_v19 = vpop.f32.mrf.mxu2  ;;  %3406 = vmatpush.bf16.msrb.mxu3 %v9667_v18  ;;  %v2145_v42 = vmax.f32 %v2126_v45, 0.0 }
 0x99c   :  { %v2111_v43 = vpop.f32.mrf.mxu3  ;;  %3380 = vmatpush.bf16.msrb.mxu1 %v9649_v21  ;;  %v2098_v46 = vadd.f32 %v2097_v19, %v1247_v31 }
 0x99d   :  { %v2085_v1 = vpop.f32.mrf.mxu1  ;;  %3422 = vmatpush.bf16.msra.mxu0 %v9673_v33  ;;  %v2112_v49 = vadd.f32 %v2111_v43, %v1248_v34 }
 0x99e   :  { %v2086_v32 = vadd.f32 %v2085_v1, %v1246_v20  ;;  %3393 = vmatpush.bf16.msrb.mxu2 %v9658_v29  ;;  %v2143_v56 = vmax.f32 %v2098_v46, 0.0 }
 0x99f   :  { %3407 = vmatpush.bf16.msrb.mxu3 %v9666_v27  ;;  %v2144_v57 = vmax.f32 %v2112_v49, 0.0 }
 0x9a0   :  { %v2127_v24 = vpop.f32.mrf.mxu0  ;;  %v2158_v41 = vmax.f32 %v2086_v32, 0.0  ;;  %3381 = vmatpush.bf16.msrb.mxu1 %v9648_v60 }
 0x9a1   :  { %v2128_v39 = vadd.f32 %v2127_v24, %v1249_v22  ;;  %3423 = vmatpush.bf16.msra.mxu0 %v9672_v25 }
 0x9a2   :  { %v2174_v47 = vpack.c.bf16 %v2158_v41, %v2142_v63  ;;  %3394 = vmatpush.bf16.msrb.mxu2 %v9657_v26 }
 0x9a3   :  { %v2161_v44 = vmax.f32 %v2128_v39, 0.0  ;;  %v2099_v52 = vpop.f32.mrf.mxu2  ;;  %3408 = vmatpush.bf16.msrb.mxu3 %v9665_v40 }
 0x9a4   :  { %v2100_v54 = vadd.f32 %v2099_v52, %v1247_v31  ;;  %v2113_v7 = vpop.f32.mrf.mxu3  ;;  %3382 = vmatmul.bf16.vlgmr.msrb.gmra.mxu1 %v2174_v47 }
 0x9a5   :  { %v2177_v51 = vpack.c.bf16 %v2161_v44, %v2145_v42  ;;  %v2114_v55 = vadd.f32 %v2113_v7, %v1248_v34 }
 0x9a6   :  { %v2159_v3 = vmax.f32 %v2100_v54, 0.0  ;;  %3395 = vmatpush.bf16.msrb.mxu2 %v9656_v48 }
 0x9a7   :  { %3424 = vmatmul.bf16.vlgmr.msra.gmra.mxu0 %v2177_v51  ;;  %v2160_v58 = vmax.f32 %v2114_v55, 0.0  ;;  %3409 = vmatpush.bf16.msrb.mxu3 %v9664_v53 }
 0x9a8   :  { %v2175_v23 = vpack.c.bf16 %v2159_v3, %v2143_v56 }
 0x9a9   :  { %v2176_v59 = vpack.c.bf16 %v2160_v58, %v2144_v57 }
 0x9aa   :  { %3396 = vmatmul.bf16.vlgmr.msrb.gmra.mxu2 %v2175_v23 }
 0x9ab   :  { %3410 = vmatmul.bf16.vlgmr.msrb.gmra.mxu3 %v2176_v59 }
 0x9e0   :  { %v3215_v50 = vpop.f32.mrf.mxu1 }
 0x9e1   :  { %v3257_v37 = vpop.f32.mrf.mxu0  ;;  %v3216_v6 = vadd.f32 %v10013_v2, %v3215_v50 }
 0x9e8   :  { %v3217_v61 = vpop.f32.mrf.mxu1 }
 0x9e9   :  { %v3259_v4 = vpop.f32.mrf.mxu0  ;;  %v3218_v14 = vadd.f32 %v10013_v2, %v3217_v61  ;;  %v8237_v2 = vld [vmem:[#allocation5 + $0x168] sm:$0xf] }
 0x9ec   :  { %v3229_v30 = vpop.f32.mrf.mxu2 }
 0x9ed   :  { %v3243_v35 = vpop.f32.mrf.mxu3  ;;  %v3230_v8 = vadd.f32 %v3229_v30, %v3216_v6 }
 0x9ef   :  { %v3244_v11 = vadd.f32 %v3243_v35, %v3230_v8  ;;  %v8239_v8 = vld [vmem:[#allocation5 + $0x174] sm:$0xf0] }
 0x9f0   :  { %v3271_v5 = vpop.f32.mrf.mxu1 }
 0x9f1   :  { %v3313_v12 = vpop.f32.mrf.mxu0  ;;  %v3258_v16 = vadd.f32 %v3257_v37, %v3244_v11 }
 0x9f3   :  { %v3272_v20 = vadd.f32 %v3271_v5, %v3258_v16  ;;  %v9701_v5 = vld [vmem:[#allocation5 + $0x16c] sm:$0xf] }
 0x9f4   :  { %v3231_v62 = vpop.f32.mrf.mxu2  ;;  %v8242_v11 = vor.u32 %v9701_v5, %v8239_v8  ;;  %v9684_v5 = vld [vmem:[#allocation5 + $0xe0] sm:$0xf0] }
 0x9f5   :  { %v3245_v0 = vpop.f32.mrf.mxu3  ;;  %v3232_v17 = vadd.f32 %v3231_v62, %v3218_v14  ;;  %v9698_v14 = vld [vmem:[#allocation5 + $0x154] sm:$0xf] }
 0x9f6   :  { %3673 = vmatpush.bf16.msra.mxu2 %v8242_v11  ;;  %v9685_v11 = vld [vmem:[#allocation5 + $0xe8] sm:$0xf0] }
 0x9f7   :  { %v3246_v22 = vadd.f32 %v3245_v0, %v3232_v17  ;;  %v8227_v17 = vld [vmem:[#allocation5 + $0x15c] sm:$0xf0] }
 0x9f8   :  { %v3273_v13 = vpop.f32.mrf.mxu1 }
 0x9f9   :  { %v3315_v29 = vpop.f32.mrf.mxu0  ;;  %v3260_v27 = vadd.f32 %v3259_v4, %v3246_v22  ;;  %v9702_v4 = vld [vmem:[#allocation5 + $0x170] sm:$0xf0] }
 0x9fa   :  { %v8238_v6 = vor.u32 %v9702_v4, %v8237_v2  ;;  %v8165_v4 = vld [vmem:[#allocation5 + $0xd8] sm:$0xf] }
 0x9fb   :  { %v3274_v60 = vadd.f32 %v3273_v13, %v3260_v27  ;;  %v9699_v13 = vld [vmem:[#allocation5 + $0x158] sm:$0xf0]  ;;  %v8166_v8 = vor.u32 %v9684_v5, %v8165_v4 }
 0x9fc   :  { %v3285_v9 = vpop.f32.mrf.mxu2  ;;  %3659 = vmatpush.bf16.msra.mxu1 %v8238_v6  ;;  %v9695_v27 = vld [vmem:[#allocation5 + $0x13c] sm:$0xf] }
 0x9fd   :  { %v3299_v10 = vpop.f32.mrf.mxu3  ;;  %v3286_v33 = vadd.f32 %v3285_v9, %v3272_v20  ;;  %v8245_v9 = vld [vmem:[#allocation5 + $0x170] sm:$0xf]  ;;  %v9700_v20 = vld [vmem:[#allocation5 + $0x160] sm:$0xf0]  ;;  %v9683_v6 = vld [vmem:[#allocation5 + $0xdc] sm:$0xf] }
 0x9ff   :  { %v3300_v28 = vadd.f32 %v3299_v10, %v3286_v33  ;;  %v9703_v10 = vld [vmem:[#allocation5 + $0x178] sm:$0xf0] }
 0xa01   :  { %v3314_v45 = vadd.f32 %v3313_v12, %v3300_v28  ;;  %v8246_v12 = vor.u32 %v9703_v10, %v8245_v9  ;;  %v8167_v9 = vld [vmem:[#allocation5 + $0xe4] sm:$0xf0]  ;;  %v8173_v10 = vld [vmem:[#allocation5 + $0xe0] sm:$0xf] }
 0xa02   :  { %v3327_v19 = vpop.f32.mrf.mxu1 }
 0xa03   :  { %v3328_v32 = vadd.f32 %v3327_v19, %v3314_v45  ;;  %3687 = vmatpush.bf16.msra.mxu3 %v8246_v12  ;;  %v9696_v19 = vld [vmem:[#allocation5 + $0x140] sm:$0xf0]  ;;  %v9697_v45 = vld [vmem:[#allocation5 + $0x148] sm:$0xf0]  ;;  %v8170_v12 = vor.u32 %v9683_v6, %v8167_v9 }
 0xa04   :  { %v3287_v18 = vpop.f32.mrf.mxu2  ;;  %v3369_v31 = vpop.f32.mrf.mxu0 }
 0xa05   :  { %v3301_v21 = vpop.f32.mrf.mxu3  ;;  %v3288_v25 = vadd.f32 %v3287_v18, %v3274_v60  ;;  %v8233_v18 = vld [vmem:[#allocation5 + $0x158] sm:$0xf]  ;;  %v8221_v60 = vld [vmem:[#allocation5 + $0x140] sm:$0xf] }
 0xa06   :  { %v8234_v22 = vor.u32 %v9700_v20, %v8233_v18  ;;  %v8155_v18 = vld [vmem:[#allocation5 + $0xcc] sm:$0xf0]  ;;  %v8161_v20 = vld [vmem:[#allocation5 + $0xc8] sm:$0xf] }
 0xa07   :  { %v3302_v26 = vadd.f32 %v3301_v21, %v3288_v25  ;;  %v8230_v21 = vor.u32 %v9698_v14, %v8227_v17  ;;  %v8222_v25 = vor.u32 %v9697_v45, %v8221_v60  ;;  %v9681_v14 = vld [vmem:[#allocation5 + $0xc8] sm:$0xf0] }
 0xa08   :  { %3688 = vmatpush.bf16.msra.mxu3 %v8234_v22 }
 0xa09   :  { %v3316_v40 = vadd.f32 %v3315_v29, %v3302_v26  ;;  %3674 = vmatpush.bf16.msra.mxu2 %v8230_v21  ;;  %v8213_v29 = vld [vmem:[#allocation5 + $0x138] sm:$0xf]  ;;  %v9682_v21 = vld [vmem:[#allocation5 + $0xd0] sm:$0xf0] }
 0xa0a   :  { %v3329_v24 = vpop.f32.mrf.mxu1  ;;  %v8214_v28 = vor.u32 %v9696_v19, %v8213_v29  ;;  %v8162_v19 = vor.u32 %v9682_v21, %v8161_v20 }
 0xa0b   :  { %v3330_v46 = vadd.f32 %v3329_v24, %v3316_v40  ;;  %v9692_v24 = vld [vmem:[#allocation5 + $0x124] sm:$0xf]  ;;  %v8209_v40 = vld [vmem:[#allocation5 + $0x128] sm:$0xf] }
 0xa0c   :  { %v3371_v42 = vpop.f32.mrf.mxu0  ;;  %3689 = vmatpush.bf16.msra.mxu3 %v8222_v25 }
 0xa0e   :  { %v3341_v43 = vpop.f32.mrf.mxu2 }
 0xa0f   :  { %v3342_v34 = vadd.f32 %v3341_v43, %v3328_v32  ;;  %v8215_v43 = vld [vmem:[#allocation5 + $0x144] sm:$0xf0]  ;;  %v9693_v32 = vld [vmem:[#allocation5 + $0x128] sm:$0xf0] }
 0xa10   :  { %v3355_v1 = vpop.f32.mrf.mxu3 }
 0xa11   :  { %v3356_v63 = vadd.f32 %v3355_v1, %v3342_v34  ;;  %v8218_v1 = vor.u32 %v9695_v27, %v8215_v43 }
 0xa13   :  { %v3370_v47 = vadd.f32 %v3369_v31, %v3356_v63  ;;  %3675 = vmatpush.bf16.msra.mxu2 %v8218_v1  ;;  %v8201_v31 = vld [vmem:[#allocation5 + $0x120] sm:$0xf]  ;;  %v9694_v63 = vld [vmem:[#allocation5 + $0x130] sm:$0xf0] }
 0xa14   :  { %v8202_v34 = vor.u32 %v9693_v32, %v8201_v31 }
 0xa16   :  { %v3343_v39 = vpop.f32.mrf.mxu2 }
 0xa17   :  { %v3344_v48 = vadd.f32 %v3343_v39, %v3330_v46  ;;  %v8203_v39 = vld [vmem:[#allocation5 + $0x12c] sm:$0xf0]  ;;  %v8189_v46 = vld [vmem:[#allocation5 + $0x108] sm:$0xf] }
 0xa18   :  { %v3357_v41 = vpop.f32.mrf.mxu3 }
 0xa19   :  { %v3358_v54 = vadd.f32 %v3357_v41, %v3344_v48  ;;  %v8206_v41 = vor.u32 %v9692_v24, %v8203_v39  ;;  %v9689_v48 = vld [vmem:[#allocation5 + $0x10c] sm:$0xf] }
 0xa1b   :  { %v3372_v57 = vadd.f32 %v3371_v42, %v3358_v54  ;;  %v8210_v42 = vor.u32 %v9694_v63, %v8209_v40  ;;  %3676 = vmatpush.bf16.msra.mxu2 %v8206_v41  ;;  %v8197_v54 = vld [vmem:[#allocation5 + $0x110] sm:$0xf] }
 0xa1d   :  { %3690 = vmatpush.bf16.msra.mxu3 %v8210_v42 }
 0xa21   :  { %v3383_v44 = vpop.f32.mrf.mxu1 }
 0xa22   :  { %v3384_v49 = vadd.f32 %v3383_v44, %v3370_v47  ;;  %v9690_v47 = vld [vmem:[#allocation5 + $0x110] sm:$0xf0] }
 0xa24   :  { %v3425_v55 = vpop.f32.mrf.mxu0 }
 0xa29   :  { %v3385_v3 = vpop.f32.mrf.mxu1 }
 0xa2a   :  { %v3386_v59 = vadd.f32 %v3385_v3, %v3372_v57  ;;  %v8177_v57 = vld [vmem:[#allocation5 + $0xf0] sm:$0xf] }
 0xa2c   :  { %v3427_v61 = vpop.f32.mrf.mxu0 }
 0xa2d   :  { %v3397_v51 = vpop.f32.mrf.mxu2 }
 0xa2e   :  { %v3398_v52 = vadd.f32 %v3397_v51, %v3384_v49  ;;  %v3411_v53 = vpop.f32.mrf.mxu3 }
 0xa30   :  { %v3412_v7 = vadd.f32 %v3411_v53, %v3398_v52  ;;  %v8190_v52 = vor.u32 %v9690_v47, %v8189_v46  ;;  %v8191_v53 = vld [vmem:[#allocation5 + $0x114] sm:$0xf0]  ;;  %v10014_v46 = vld [vmem:[%s11045_s11] ss:$0 sm:$0xff] }
 0xa32   :  { %v3426_v56 = vadd.f32 %v3425_v55, %v3412_v7  ;;  %v9691_v7 = vld [vmem:[#allocation5 + $0x118] sm:$0xf0]  ;;  %v8194_v55 = vor.u32 %v9689_v48, %v8191_v53 }
 0xa34   :  { %v10765_v58 = vadd.f32 %v3426_v56, %v10717_v36  ;;  %v8198_v56 = vor.u32 %v9691_v7, %v8197_v54  ;;  %3677 = vmatpush.bf16.msra.mxu2 %v8194_v55  ;;  %v10015_v54 = vld [vmem:[%s11046_s12] ss:$0 sm:$0xff] }
 0xa35   :  { %v3399_v23 = vpop.f32.mrf.mxu2 }
 0xa36   :  { %3434 = vadd.xlane.f32.xlu2 %v10765_v58  ;;  %v3400_v50 = vadd.f32 %v3399_v23, %v3386_v59  ;;  %v3413_v30 = vpop.f32.mrf.mxu3  ;;  %v3440_v37 = vmul.f32 %v10765_v58, %v10765_v58  ;;  %3691 = vmatpush.bf16.msra.mxu3 %v8198_v56  ;;  %v9687_v23 = vld [vmem:[#allocation5 + $0xf8] sm:$0xf0]  ;;  %v9686_v59 = vld [vmem:[#allocation5 + $0xf4] sm:$0xf] }
 0xa38   :  { %v3414_v35 = vadd.f32 %v3413_v30, %v3400_v50  ;;  %v8178_v30 = vor.u32 %v9687_v23, %v8177_v57 }
 0xa3a   :  { %v3428_v62 = vadd.f32 %v3427_v61, %v3414_v35  ;;  %v8179_v35 = vld [vmem:[#allocation5 + $0xfc] sm:$0xf0] }
 0xa3b   :  { %v8182_v61 = vor.u32 %v9686_v59, %v8179_v35 }
 0xa3c   :  { %v10771_v0 = vadd.f32 %v3428_v62, %v10719_v38  ;;  %v8225_v38 = vld [vmem:[#allocation5 + $0x150] sm:$0xf]  ;;  %v9688_v62 = vld [vmem:[#allocation5 + $0x100] sm:$0xf0] }
 0xa3d   :  { %v8226_v16 = vor.u32 %v9699_v13, %v8225_v38  ;;  %3678 = vmatpush.bf16.msra.mxu2 %v8182_v61  ;;  %v8174_v38 = vor.u32 %v9685_v11, %v8173_v10  ;;  %v8153_v13 = vld [vmem:[#allocation5 + $0xc0] sm:$0xf] }
 0xa3e   :  { %3442 = vadd.xlane.f32.xlu2 %v3440_v37  ;;  %v3441_v36 = vmul.f32 %v10771_v0, %v10771_v0  ;;  %v8185_v37 = vld [vmem:[#allocation5 + $0xf8] sm:$0xf]  ;;  %v8154_v17 = vor.u32 %v9681_v14, %v8153_v13 }
 0xa3f   :  { %3660 = vmatpush.bf16.msra.mxu1 %v8226_v16  ;;  %v9680_v16 = vld [vmem:[#allocation5 + $0xc4] sm:$0xf] }
 0xa40   :  { %v8158_v29 = vor.u32 %v9680_v16, %v8155_v18 }
 0xa41   :  { %3679 = vmatpush.bf16.msra.mxu2 %v8170_v12 }
 0xa43   :  { %3661 = vmatpush.bf16.msra.mxu1 %v8214_v28 }
 0xa45   :  { %3680 = vmatpush.bf16.msra.mxu2 %v8158_v29 }
 0xa46   :  { %3436 = vadd.xlane.f32.xlu2 %v10771_v0 }
 0xa47   :  { %3662 = vmatpush.bf16.msra.mxu1 %v8202_v34 }
 0xa4b   :  { %3663 = vmatpush.bf16.msra.mxu1 %v8190_v52 }
 0xa4e   :  { %3444 = vadd.xlane.f32.xlu2 %v3441_v36  ;;  %v8186_v36 = vor.u32 %v9688_v62, %v8185_v37 }
 0xa4f   :  { %3664 = vmatpush.bf16.msra.mxu1 %v8178_v30 }
 0xa50   :  { %3692 = vmatpush.bf16.msra.mxu3 %v8186_v36 }
 0xa53   :  { %3665 = vmatpush.bf16.msra.mxu1 %v8166_v8 }
 0xa54   :  { %3693 = vmatpush.bf16.msra.mxu3 %v8174_v38 }
 0xa57   :  { %3666 = vmatpush.bf16.msra.mxu1 %v8154_v17 }
 0xa58   :  { %3694 = vmatpush.bf16.msra.mxu3 %v8162_v19 }
 0xaa9   :  { %v3435_v33 = vpop.xlane.xlu2 %3434 }
 0xaaa   :  { %v10777_v26 = vmul.f32 %v3435_v33, %v10701_v15 }
 0xaac   :  { %v3448_v49 = vmul.f32 %v10777_v26, %v10777_v26  ;;  %v3452_v42 = vsub.f32 %v10765_v58, %v10777_v26 }
 0xab1   :  { %v3443_v44 = vpop.xlane.xlu2 %3442 }
 0xab2   :  { %v3446_v51 = vmul.f32 %v3443_v44, %v10701_v15 }
 0xab4   :  { %v3450_v3 = vsub.f32 %v3446_v51, %v3448_v49 }
 0xab6   :  { %v3454_v50 = vadd.f32 1e-05, %v3450_v3 }
 0xab8   :  { %10062 = vrsqrt.f32 %v3454_v50  ;;  %vm3462_vm11 = vweird.f32 %v3454_v50 }
 0xab9   :  { %v3437_v2 = vpop.xlane.xlu2 %3436 }
 0xaba   :  { %v3439_v33 = vmul.f32 %v3437_v2, %v10701_v15 }
 0xabc   :  { %v3449_v43 = vmul.f32 %v3439_v33, %v3439_v33  ;;  %v3453_v49 = vsub.f32 %v10771_v0, %v3439_v33  ;;  %v3523_v0 = vld [vmem:[#allocation7 + $0x3] sm:$0x7] }
 0xabd   :  { %v3525_v56 = vperm.slane %v3523_v0, 0  ;;  %v3526_v59 = vperm.slane %v3523_v0, 1 }
 0xabe   :  { %v10063_v22 = vpop.eup %10062 }
 0xabf   :  { %v3457_v27 = vmul.f32 %v10063_v22, %v3454_v50  ;;  %vm3463_vm10 = vweird.f32 %v10063_v22  ;;  %v3527_v50 = vperm.slane %v3523_v0, 2 }
 0xac0   :  { %vm3464_vm12 = vmor %vm3462_vm11, %vm3463_vm10 }
 0xac1   :  { %v3445_v28 = vpop.xlane.xlu2 %3444  ;;  %v3458_v45 = vmul.f32 %v10063_v22, %v3457_v27 }
 0xac2   :  { %v3447_v60 = vmul.f32 %v3445_v28, %v10701_v15 }
 0xac3   :  { %v3459_v31 = vmul.f32 0.5, %v3458_v45 }
 0xac4   :  { %v3451_v1 = vsub.f32 %v3447_v60, %v3449_v43 }
 0xac5   :  { %v3460_v32 = vsub.f32 1.5, %v3459_v31 }
 0xac6   :  { %v3455_v25 = vadd.f32 1e-05, %v3451_v1 }
 0xac7   :  { %v3461_v34 = vmul.f32 %v10063_v22, %v3460_v32 }
 0xac8   :  { %10064 = vrsqrt.f32 %v3455_v25  ;;  %vm3472_vm14 = vweird.f32 %v3455_v25 }
 0xac9   :  { %v3465_v63 = vsel %vm3464_vm12, %v10063_v22, %v3461_v34 }
 0xaca   :  { %v3476_v47 = vmul.f32 %v3465_v63, %v3452_v42 }
 0xacc   :  { %v3481_v52 = vmul.f32 %v10014_v46, %v3476_v47 }
 0xace   :  { %v10065_v24 = vpop.eup %10064  ;;  %v10793_v26 = vadd.f32 %v10015_v54, %v3481_v52 }
 0xacf   :  { %v3467_v39 = vmul.f32 %v10065_v24, %v3455_v25  ;;  %vm3473_vm13 = vweird.f32 %v10065_v24 }
 0xad0   :  { %vm3474_vm15 = vmor %vm3472_vm14, %vm3473_vm13 }
 0xad1   :  { %v3468_v40 = vmul.f32 %v10065_v24, %v3467_v39 }
 0xad3   :  { %v3469_v41 = vmul.f32 0.5, %v3468_v40 }
 0xad5   :  { %v3470_v44 = vsub.f32 1.5, %v3469_v41 }
 0xad7   :  { %v3471_v48 = vmul.f32 %v10065_v24, %v3470_v44 }
 0xad9   :  { %v3475_v51 = vsel %vm3474_vm15, %v10065_v24, %v3471_v48 }
 0xada   :  { %v3477_v53 = vmul.f32 %v3475_v51, %v3453_v49 }
 0xadc   :  { %v3482_v58 = vmul.f32 %v10014_v46, %v3477_v53 }
 0xade   :  { %v10795_v7 = vadd.f32 %v10015_v54, %v3482_v58 }
 0xae0   :  { %v3488_v55 = vpack.c.bf16 %v10795_v7, %v10793_v26 }
 0xae2   :  { %3667 = vmatmul.bf16.vlgmr.msra.gmra.mxu1 %v3488_v55  ;;  %3681 = vmatmul.bf16.vlgmr.msra.gmra.mxu2 %v3488_v55 }
 0xae3   :  { %3695 = vmatmul.bf16.vlgmr.msra.gmra.mxu3 %v3488_v55 }
 0xb5f   :  { %v3668_v3 = vpop.f32.mrf.mxu1 }
 0xb60   :  { %v3669_v57 = vadd.f32 %v3668_v3, %v3525_v56 }
 0xb62   :  { %v3701_v23 = vmul.f32 0.17677669, %v3669_v57 }
 0xb64   :  { %v3703_v30 = vpack.c.bf16 %v3701_v23, %v3701_v23 }
 0xb65   :  { %v3682_v35 = vpop.f32.mrf.mxu2 }
 0xb66   :  { %v3828_v37 = vunpack.c.l.b16 %v3703_v30  ;;  %v3683_v61 = vadd.f32 %v3682_v35, %v3526_v59  ;;  %v3696_v62 = vpop.f32.mrf.mxu3 }
 0xb67   :  { %v3697_v36 = vadd.f32 %v3696_v62, %v3527_v50  ;;  %v3670_v2 = vpop.f32.mrf.mxu1 }
 0xb68   :  { %v3705_v4 = vpack.c.bf16 %v3683_v61, %v3683_v61  ;;  %v3671_v5 = vadd.f32 %v3670_v2, %v3525_v56  ;;  %v10799_v6 = vpack.c.b16 %v3828_v37, %v3828_v37 }
 0xb69   :  { %v3707_v8 = vpack.c.bf16 %v3697_v36, %v3697_v36 }
 0xb6a   :  { %v3730_v9 = vsel %vm449_vm0, %v3705_v4, 0  ;;  %v3833_v10 = vunpack.c.l.b16 %v3705_v4  ;;  %v3702_v11 = vmul.f32 0.17677669, %v3671_v5  ;;  %3830 = vrot.lane.b32.xlu0 %v10799_v6, %s10410_s13 }
 0xb6b   :  { %v3792_v12 = vsel %vm516_vm1, %v3707_v8, 0  ;;  %3739 = vmatpush.bf16.xpose.msrb.mxu0 %v3730_v9  ;;  %v3910_v53 = vunpack.c.l.b16 %v3707_v8 }
 0xb6c   :  { %v10805_v38 = vpack.c.b16 %v3833_v10, %v3833_v10  ;;  %v3704_v13 = vpack.c.bf16 %v3702_v11, %v3702_v11  ;;  %3801 = vmatpush.bf16.msrb.mxu1 %v3792_v12 }
 0xb6d   :  { %v3684_v14 = vpop.f32.mrf.mxu2  ;;  %v10829_v58 = vpack.c.b16 %v3910_v53, %v3910_v53 }
 0xb6e   :  { %v3685_v16 = vadd.f32 %v3684_v14, %v3526_v59  ;;  %v3698_v17 = vpop.f32.mrf.mxu3  ;;  %3835 = vrot.lane.b32.xlu2 %v10805_v38, %s10410_s13  ;;  %v3857_v21 = vunpack.c.l.b16 %v3704_v13 }
 0xb6f   :  { %v3699_v18 = vadd.f32 %v3698_v17, %v3527_v50 }
 0xb70   :  { %v3706_v20 = vpack.c.bf16 %v3685_v16, %v3685_v16  ;;  %v10814_v28 = vpack.c.b16 %v3857_v21, %v3857_v21 }
 0xb71   :  { %v3708_v22 = vpack.c.bf16 %v3699_v18, %v3699_v18  ;;  %v9707_v18 = vld [vmem:[#allocation8 + $0x58] sm:$0xff] }
 0xb72   :  { %v3862_v33 = vunpack.c.l.b16 %v3706_v20  ;;  %8247 = vmatmul.msk.bf16.vlgmr.msrb.gmra.mxu0 %vm449_vm0, %v3703_v30  ;;  %v3749_v29 = vsel %vm449_vm0, %v3706_v20, 0 }
 0xb73   :  { %3758 = vmatpush.bf16.xpose.msra.mxu0 %v3749_v29  ;;  %v3811_v19 = vsel %vm516_vm1, %v3708_v22, 0  ;;  %v3934_v59 = vunpack.c.l.b16 %v3708_v22 }
 0xb74   :  { %3820 = vmatpush.bf16.msrb.mxu2 %v3811_v19  ;;  %v10812_v27 = vpack.c.b16 %v3862_v33, %v3862_v33 }
 0xb75   :  { %v10837_v50 = vpack.c.b16 %v3934_v59, %v3934_v59 }
 0xb76   :  { %3864 = vrot.lane.b32.xlu1 %v10812_v27, %s10410_s13  ;;  %3859 = vrot.lane.b32.xlu2 %v10814_v28, %s10410_s13 }
 0xb82   :  { %8248 = vmatmul.msk.bf16.vlgmr.msra.gmra.mxu0 %vm449_vm0, %v3704_v13 }
 0xbc8   :  { %v3836_v43 = vpop.permute.xlu2 %3835 }
 0xbc9   :  { %v3841_v60 = vsel %vm449_vm0, %v3836_v43, 0 }
 0xbca   :  { %3850 = vmatpush.bf16.xpose.msrb.mxu3 %v3841_v60 }
 0xbd0   :  { %v3860_v32 = vpop.permute.xlu2 %3859 }
 0xbd2   :  { %3979 = vmatpush.bf16.msra.mxu3 %v9707_v18 }
 0xbdc   :  { %v3831_v45 = vpop.permute.xlu0 %3830 }
 0xbdd   :  { %8251 = vmatmul.msk.bf16.vlgmr.msrb.gmra.mxu3 %vm449_vm0, %v3831_v45 }
 0xbe8   :  { %v3865_v1 = vpop.permute.xlu1 %3864 }
 0xbe9   :  { %v3870_v25 = vsel %vm449_vm0, %v3865_v1, 0 }
 0xbea   :  { %3879 = vmatpush.bf16.xpose.msrb.mxu0 %v3870_v25 }
 0xbef   :  { %v3741_v31 = vpop.f32.mrf.mxu0 }
 0xbf0   :  { %v3764_v24 = vsel %vm488_vm2, %v3741_v31, -inf }
 0xbf1   :  { %8252 = vmatmul.msk.bf16.vlgmr.msrb.gmra.mxu0 %vm449_vm0, %v3860_v32  ;;  %3765 = vmax.xlane.f32.xlu0 %v3764_v24 }
 0xbf7   :  { %v3743_v34 = vpop.f32.mrf.mxu0 }
 0xbf8   :  { %v9705_v34 = vld [vmem:[#allocation8 + $0x48] sm:$0xff] }
 0xbf9   :  { %4008 = vmatpush.bf16.msra.mxu0 %v9705_v34 }
 0xbff   :  { %v3760_v39 = vpop.f32.mrf.mxu0 }
 0xc00   :  { %v3767_v40 = vsel %vm488_vm2, %v3760_v39, -inf }
 0xc01   :  { %3768 = vmax.xlane.f32.xlu0 %v3767_v40 }
 0xc07   :  { %v3762_v63 = vpop.f32.mrf.mxu0 }
 0xc60   :  { %v3852_v41 = vpop.f32.mrf.mxu3 }
 0xc61   :  { %v3885_v42 = vsel %vm488_vm2, %v3852_v41, -inf }
 0xc62   :  { %3886 = vmax.xlane.f32.xlu2 %v3885_v42 }
 0xc64   :  { %v3766_v44 = vpop.xlane.xlu0 %3765 }
 0xc65   :  { %v3770_v46 = vsub.f32 %v3741_v31, %v3766_v44 }
 0xc67   :  { %v3772_v47 = vmul.f32 1.442695, %v3770_v46 }
 0xc68   :  { %v3854_v48 = vpop.f32.mrf.mxu3 }
 0xc69   :  { %10066 = vpow2.f32 %v3772_v47 }
 0xc6e   :  { %v3881_v49 = vpop.f32.mrf.mxu0 }
 0xc6f   :  { %v10067_v51 = vpop.eup %10066  ;;  %v3888_v56 = vsel %vm488_vm2, %v3881_v49, -inf }
 0xc70   :  { %v3776_v52 = vsel %vm488_vm2, %v10067_v51, 0.0 }
 0xc71   :  { %3777 = vadd.xlane.f32.xlu1 %v3776_v52 }
 0xc74   :  { %v3769_v55 = vpop.xlane.xlu0 %3768 }
 0xc75   :  { %v3771_v0 = vsub.f32 %v3760_v39, %v3769_v55  ;;  %v9704_v39 = vld [vmem:[#allocation8 + $0x40] sm:$0xff] }
 0xc76   :  { %v3883_v54 = vpop.f32.mrf.mxu0  ;;  %4009 = vmatpush.bf16.msra.mxu0 %v9704_v39 }
 0xc77   :  { %v3774_v3 = vmul.f32 1.442695, %v3771_v0 }
 0xc79   :  { %10068 = vpow2.f32 %v3774_v3 }
 0xc7a   :  { %3912 = vrot.lane.b32.xlu2 %v10829_v58, %s10410_s13 }
 0xc7f   :  { %v10069_v57 = vpop.eup %10068 }
 0xc80   :  { %v3779_v23 = vsel %vm488_vm2, %v10069_v57, 0.0 }
 0xc8a   :  { %4018 = vrot.lane.b32.xlu1 %v10805_v38, %s10392_s22 }
 0xca3   :  { %3889 = vmax.xlane.f32.xlu2 %v3888_v56 }
 0xcb4   :  { %3780 = vadd.xlane.f32.xlu1 %v3779_v23 }
 0xcbb   :  { %3936 = vrot.lane.b32.xlu2 %v10837_v50, %s10410_s13 }
 0xccd   :  { %4041 = vrot.lane.b32.xlu1 %v10812_v27, %s10392_s22 }
 0xcd5   :  { %v3887_v30 = vpop.xlane.xlu2 %3886  ;;  %4086 = vrot.lane.b32.xlu1 %v10829_v58, %s10392_s22 }
 0xcd6   :  { %v3891_v35 = vsub.f32 %v3852_v41, %v3887_v30 }
 0xcd8   :  { %v3893_v37 = vmul.f32 1.442695, %v3891_v35 }
 0xcda   :  { %10070 = vpow2.f32 %v3893_v37 }
 0xcdd   :  { %v3913_v61 = vpop.permute.xlu2 %3912  ;;  %4162 = vrot.lane.b32.xlu1 %v10805_v38, %s10411_s15 }
 0xcde   :  { %v3918_v62 = vsel %vm516_vm1, %v3913_v61, 0 }
 0xcdf   :  { %3927 = vmatpush.bf16.msra.mxu1 %v3918_v62 }
 0xce0   :  { %v10071_v36 = vpop.eup %10070 }
 0xce1   :  { %v3897_v2 = vsel %vm488_vm2, %v10071_v36, 0.0 }
 0xce2   :  { %3898 = vadd.xlane.f32.xlu0 %v3897_v2 }
 0xce4   :  { %v3778_v4 = vpop.xlane.xlu1 %3777 }
 0xce5   :  { %10072 = vrcp.f32 %v3778_v4  ;;  %4185 = vrot.lane.b32.xlu1 %v10812_v27, %s10411_s15 }
 0xceb   :  { %v10073_v5 = vpop.eup %10072 }
 0xcec   :  { %v3784_v8 = vmul.f32 %v10073_v5, %v10067_v51 }
 0xced   :  { %4160 = vrot.lane.b32.xlu1 %v10799_v6, %s10411_s15 }
 0xcee   :  { %v3786_v9 = vpack.c.bf16 %v3784_v8, %v3784_v8 }
 0xcf0   :  { %8249 = vmatmul.msk.bf16.vlgmr.msrb.gmra.mxu1 %vm488_vm2, %v3786_v9 }
 0xcf5   :  { %4183 = vrot.lane.b32.xlu1 %v10814_v28, %s10411_s15 }
 0xcf6   :  { %4016 = vrot.lane.b32.xlu0 %v10799_v6, %s10392_s22  ;;  %v9706_v6 = vld [vmem:[#allocation8 + $0x50] sm:$0xff] }
 0xcf7   :  { %3980 = vmatpush.bf16.msra.mxu3 %v9706_v6 }
 0xcfc   :  { %v4019_v10 = vpop.permute.xlu1 %4018 }
 0xcfd   :  { %v4024_v11 = vsel %vm449_vm0, %v4019_v10, 0 }
 0xcfe   :  { %4033 = vmatpush.bf16.xpose.msrb.mxu1 %v4024_v11 }
 0xd16   :  { %v3890_v12 = vpop.xlane.xlu2 %3889 }
 0xd17   :  { %v3892_v38 = vsub.f32 %v3881_v49, %v3890_v12 }
 0xd19   :  { %v3895_v13 = vmul.f32 1.442695, %v3892_v38 }
 0xd1b   :  { %10074 = vpow2.f32 %v3895_v13 }
 0xd1e   :  { %v3937_v14 = vpop.permute.xlu2 %3936 }
 0xd1f   :  { %v3942_v16 = vsel %vm516_vm1, %v3937_v14, 0 }
 0xd20   :  { %3951 = vmatpush.bf16.msra.mxu2 %v3942_v16 }
 0xd21   :  { %v10075_v17 = vpop.eup %10074 }
 0xd22   :  { %v3900_v20 = vsel %vm488_vm2, %v10075_v17, 0.0 }
 0xd23   :  { %3901 = vadd.xlane.f32.xlu0 %v3900_v20 }
 0xd27   :  { %v3781_v21 = vpop.xlane.xlu1 %3780 }
 0xd28   :  { %10076 = vrcp.f32 %v3781_v21 }
 0xd2e   :  { %v10077_v22 = vpop.eup %10076 }
 0xd2f   :  { %v3785_v33 = vmul.f32 %v10077_v22, %v10069_v57 }
 0xd31   :  { %v3787_v29 = vpack.c.bf16 %v3785_v33, %v3785_v33  ;;  %v9709_v33 = vld [vmem:[#allocation8 + $0x68] sm:$0xff] }
 0xd33   :  { %8250 = vmatmul.msk.bf16.vlgmr.msrb.gmra.mxu2 %vm488_vm2, %v3787_v29  ;;  %v9708_v29 = vld [vmem:[#allocation8 + $0x60] sm:$0xff] }
 0xd37   :  { %4039 = vrot.lane.b32.xlu0 %v10814_v28, %s10392_s22 }
 0xd3f   :  { %v4042_v19 = vpop.permute.xlu1 %4041 }
 0xd40   :  { %v4047_v27 = vsel %vm449_vm0, %v4042_v19, 0 }
 0xd41   :  { %4056 = vmatpush.bf16.xpose.msrb.mxu2 %v4047_v27 }
 0xd47   :  { %v4087_v43 = vpop.permute.xlu1 %4086 }
 0xd48   :  { %v4092_v60 = vsel %vm516_vm1, %v4087_v43, 0 }
 0xd49   :  { %4101 = vmatpush.bf16.msrb.mxu3 %v4092_v60 }
 0xd4f   :  { %v4163_v42 = vpop.permute.xlu1 %4162 }
 0xd50   :  { %v4168_v46 = vsel %vm449_vm0, %v4163_v42, 0 }
 0xd55   :  { %v3899_v45 = vpop.xlane.xlu0 %3898 }
 0xd56   :  { %10078 = vrcp.f32 %v3899_v45 }
 0xd57   :  { %v4186_v49 = vpop.permute.xlu1 %4185 }
 0xd58   :  { %v4191_v59 = vsel %vm449_vm0, %v4186_v49, 0 }
 0xd5c   :  { %v10079_v1 = vpop.eup %10078 }
 0xd5d   :  { %v3905_v25 = vmul.f32 %v10079_v1, %v10071_v36 }
 0xd5f   :  { %v3907_v31 = vpack.c.bf16 %v3905_v25, %v3905_v25  ;;  %v4161_v53 = vpop.permute.xlu1 %4160 }
 0xd61   :  { %8253 = vmatmul.msk.bf16.vlgmr.msra.gmra.mxu1 %vm488_vm2, %v3907_v31 }
 0xd62   :  { %4150 = vmatpush.bf16.msra.mxu1 %v9709_v33  ;;  %v8761_v33 = vld [vmem:[#allocation11 + $0x7c8] sm:$0xf0] }
 0xd66   :  { %4151 = vmatpush.bf16.msra.mxu1 %v9708_v29  ;;  %v8687_v29 = vld [vmem:[#allocation11 + $0x700] sm:$0xf] }
 0xd67   :  { %v4184_v22 = vpop.permute.xlu1 %4183 }
 0xd68   :  { %v4017_v24 = vpop.permute.xlu0 %4016 }
 0xd6d   :  { %v3803_v32 = vpop.f32.mrf.mxu1 }
 0xd71   :  { %8273 = vmatmul.msk.bf16.vlgmr.msrb.gmra.mxu1 %vm449_vm0, %v4017_v24 }
 0xd75   :  { %v3805_v28 = vpop.f32.mrf.mxu1 }
 0xd96   :  { %v3902_v40 = vpop.xlane.xlu0 %3901 }
 0xd97   :  { %10080 = vrcp.f32 %v3902_v40 }
 0xd9d   :  { %v10081_v63 = vpop.eup %10080 }
 0xd9e   :  { %v3906_v41 = vmul.f32 %v10081_v63, %v10075_v17 }
 0xda0   :  { %v3908_v44 = vpack.c.bf16 %v3906_v41, %v3906_v41 }
 0xda2   :  { %8254 = vmatmul.msk.bf16.vlgmr.msra.gmra.mxu2 %vm488_vm2, %v3908_v44 }
 0xda3   :  { %4177 = vmatpush.bf16.xpose.msra.mxu2 %v4168_v46 }
 0xda9   :  { %v4040_v47 = vpop.permute.xlu0 %4039 }
 0xdb2   :  { %8274 = vmatmul.msk.bf16.vlgmr.msrb.gmra.mxu2 %vm449_vm0, %v4040_v47 }
 0xdb6   :  { %v3822_v48 = vpop.f32.mrf.mxu2 }
 0xdb7   :  { %v3826_v51 = vpack.c.bf16 %v3822_v48, %v3803_v32 }
 0xdb9   :  { %8272 = vmatmul.msk.bf16.vlgmr.msra.gmra.mxu0 %vm449_vm0, %v3826_v51 }
 0xdbe   :  { %v3824_v52 = vpop.f32.mrf.mxu2 }
 0xdc2   :  { %8286 = vmatmul.msk.bf16.vlgmr.msra.gmra.mxu2 %vm449_vm0, %v4161_v53 }
 0xdde   :  { %v3929_v54 = vpop.f32.mrf.mxu1 }
 0xde6   :  { %v3931_v55 = vpop.f32.mrf.mxu1 }
 0xdee   :  { %v4035_v0 = vpop.f32.mrf.mxu1 }
 0xdef   :  { %v4062_v56 = vsel %vm488_vm2, %v4035_v0, -inf }
 0xdf0   :  { %4063 = vmax.xlane.f32.xlu2 %v4062_v56 }
 0xdf6   :  { %v4037_v3 = vpop.f32.mrf.mxu1 }
 0xe25   :  { %v3953_v57 = vpop.f32.mrf.mxu2 }
 0xe26   :  { %v3957_v23 = vpack.c.bf16 %v3953_v57, %v3929_v54 }
 0xe28   :  { %8263 = vmatmul.msk.bf16.vlgmr.msra.gmra.mxu3 %vm449_vm0, %v3957_v23 }
 0xe29   :  { %4200 = vmatpush.bf16.xpose.msra.mxu3 %v4191_v59 }
 0xe2d   :  { %v3955_v30 = vpop.f32.mrf.mxu2 }
 0xe35   :  { %v4058_v35 = vpop.f32.mrf.mxu2 }
 0xe36   :  { %v4065_v37 = vsel %vm488_vm2, %v4058_v35, -inf  ;;  %v4011_v44 = vpop.f32.mrf.mxu0 }
 0xe37   :  { %4066 = vmax.xlane.f32.xlu2 %v4065_v37  ;;  %v9711_v37 = vld [vmem:[#allocation8 + $0x78] sm:$0xff] }
 0xe38   :  { %4294 = vmatpush.bf16.msrb.mxu2 %v9711_v37  ;;  %v9784_v37 = vld [vmem:[#allocation11 + $0x63c] sm:$0xf0] }
 0xe3d   :  { %v4060_v61 = vpop.f32.mrf.mxu2 }
 0xe3e   :  { %v10895_v46 = vpop.f32.mrf.mxu0 }
 0xe45   :  { %v4179_v62 = vpop.f32.mrf.mxu2 }
 0xe46   :  { %v4206_v36 = vsel %vm488_vm2, %v4179_v62, -inf }
 0xe47   :  { %4207 = vmax.xlane.f32.xlu2 %v4206_v36 }
 0xe4d   :  { %v4181_v2 = vpop.f32.mrf.mxu2 }
 0xe63   :  { %v4064_v4 = vpop.xlane.xlu2 %4063 }
 0xe64   :  { %v4068_v5 = vsub.f32 %v4035_v0, %v4064_v4 }
 0xe66   :  { %v4070_v8 = vmul.f32 1.442695, %v4068_v5 }
 0xe68   :  { %10082 = vpow2.f32 %v4070_v8  ;;  %v9710_v8 = vld [vmem:[#allocation8 + $0x70] sm:$0xff] }
 0xe69   :  { %4295 = vmatpush.bf16.msrb.mxu2 %v9710_v8 }
 0xe6e   :  { %v10083_v9 = vpop.eup %10082 }
 0xe6f   :  { %v4074_v10 = vsel %vm488_vm2, %v10083_v9, 0.0 }
 0xe70   :  { %4075 = vadd.xlane.f32.xlu0 %v4074_v10 }
 0xe84   :  { %4107 = vrot.lane.b32.xlu0 %v10837_v50, %s10392_s22 }
 0xeaa   :  { %v4067_v11 = vpop.xlane.xlu2 %4066 }
 0xeab   :  { %v4069_v12 = vsub.f32 %v4058_v35, %v4067_v11  ;;  %v3982_v1 = vpop.f32.mrf.mxu3 }
 0xeac   :  { %v4012_v59 = vadd.f32 %v4011_v44, %v3982_v1  ;;  %v8695_v1 = vld [vmem:[#allocation11 + $0x708] sm:$0xf] }
 0xead   :  { %v4072_v38 = vmul.f32 1.442695, %v4069_v12 }
 0xeaf   :  { %10084 = vpow2.f32 %v4072_v38  ;;  %v8751_v38 = vld [vmem:[#allocation11 + $0x780] sm:$0xf] }
 0xeb3   :  { %v10889_v25 = vpop.f32.mrf.mxu3 }
 0xeb5   :  { %v10085_v13 = vpop.eup %10084 }
 0xeb6   :  { %v4077_v14 = vsel %vm488_vm2, %v10085_v13, 0.0 }
 0xeb7   :  { %4078 = vadd.xlane.f32.xlu1 %v4077_v14  ;;  %v9824_v14 = vld [vmem:[#allocation11 + $0x784] sm:$0xf] }
 0xeba   :  { %v4208_v32 = vpop.xlane.xlu2 %4207 }
 0xebb   :  { %v4212_v24 = vsub.f32 %v4179_v62, %v4208_v32  ;;  %v9809_v32 = vld [vmem:[#allocation11 + $0x70c] sm:$0xf] }
 0xebd   :  { %v4214_v34 = vmul.f32 1.442695, %v4212_v24 }
 0xed0   :  { %4251 = vrot.lane.b32.xlu1 %v10837_v50, %s10411_s15 }
 0xee3   :  { %v4076_v16 = vpop.xlane.xlu0 %4075 }
 0xee4   :  { %10086 = vrcp.f32 %v4076_v16 }
 0xeea   :  { %v10087_v17 = vpop.eup %10086 }
 0xeeb   :  { %v4082_v18 = vmul.f32 %v10087_v17, %v10083_v9  ;;  %v8753_v17 = vld [vmem:[#allocation11 + $0x7c0] sm:$0xf0] }
 0xeed   :  { %v4084_v20 = vpack.c.bf16 %v4082_v18, %v4082_v18  ;;  %v8759_v18 = vld [vmem:[#allocation11 + $0x788] sm:$0xf] }
 0xeef   :  { %8275 = vmatmul.msk.bf16.vlgmr.msrb.gmra.mxu3 %vm488_vm2, %v4084_v20  ;;  %v9833_v20 = vld [vmem:[#allocation11 + $0x7c4] sm:$0xf0] }
 0xef6   :  { %v4108_v21 = vpop.permute.xlu0 %4107 }
 0xef7   :  { %v4113_v6 = vsel %vm516_vm1, %v4108_v21, 0  ;;  %v8756_v21 = vor.u32 %v9824_v14, %v8753_v17  ;;  %v8497_v14 = vld [vmem:[#allocation11 + $0x5c0] sm:$0xf0]  ;;  %v9769_v17 = vld [vmem:[#allocation11 + $0x5c4] sm:$0xf0] }
 0xef8   :  { %4122 = vmatpush.bf16.msrb.mxu0 %v4113_v6  ;;  %v8760_v6 = vor.u32 %v9833_v20, %v8759_v18 }
 0xeff   :  { %8287 = vmatmul.msk.bf16.vlgmr.msra.gmra.mxu3 %vm449_vm0, %v4184_v22  ;;  %v9825_v22 = vld [vmem:[#allocation11 + $0x78c] sm:$0xf] }
 0xf2a   :  { %v4079_v19 = vpop.xlane.xlu1 %4078 }
 0xf2b   :  { %10088 = vrcp.f32 %v4079_v19  ;;  %v8764_v19 = vor.u32 %v9825_v22, %v8761_v33  ;;  %v8431_v33 = vld [vmem:[#allocation11 + $0x500] sm:$0xf] }
 0xf2c   :  { %10090 = vpow2.f32 %v4214_v34  ;;  %v8623_v34 = vld [vmem:[#allocation11 + $0x680] sm:$0xf] }
 0xf2d   :  { %5220 = vmatpush.bf16.msra.mxu2 %v8764_v19  ;;  %v9744_v19 = vld [vmem:[#allocation11 + $0x504] sm:$0xf] }
 0xf31   :  { %v10089_v50 = vpop.eup %10088 }
 0xf32   :  { %v4083_v27 = vmul.f32 %v10089_v50, %v10085_v13  ;;  %v10091_v63 = vpop.eup %10090  ;;  %v9832_v13 = vld [vmem:[#allocation11 + $0x7bc] sm:$0xf0] }
 0xf33   :  { %v4218_v42 = vsel %vm488_vm2, %v10091_v63, 0.0  ;;  %v8752_v16 = vor.u32 %v9832_v13, %v8751_v38  ;;  %v9816_v50 = vld [vmem:[#allocation11 + $0x73c] sm:$0xf0]  ;;  %v9760_v38 = vld [vmem:[#allocation11 + $0x584] sm:$0xf] }
 0xf34   :  { %v4085_v43 = vpack.c.bf16 %v4083_v27, %v4083_v27  ;;  %v9808_v27 = vld [vmem:[#allocation11 + $0x704] sm:$0xf]  ;;  %v8500_v18 = vor.u32 %v9760_v38, %v8497_v14  ;;  %v9810_v38 = vld [vmem:[#allocation11 + $0x714] sm:$0xf]  ;;  %v8711_v14 = vld [vmem:[#allocation11 + $0x718] sm:$0xf] }
 0xf35   :  { %5178 = vmatpush.bf16.msrb.mxu3 %v8752_v16  ;;  %v8503_v16 = vld [vmem:[#allocation11 + $0x588] sm:$0xf] }
 0xf36   :  { %8276 = vmatmul.msk.bf16.vlgmr.msrb.gmra.mxu0 %vm488_vm2, %v4085_v43  ;;  %v8689_v43 = vld [vmem:[#allocation11 + $0x740] sm:$0xf0]  ;;  %v8504_v20 = vor.u32 %v9769_v17, %v8503_v16  ;;  %v9819_v17 = vld [vmem:[#allocation11 + $0x754] sm:$0xf0] }
 0xf42   :  { %v4252_v60 = vpop.permute.xlu1 %4251 }
 0xf43   :  { %v4257_v45 = vsel %vm516_vm1, %v4252_v60, 0  ;;  %v8688_v60 = vor.u32 %v9816_v50, %v8687_v29  ;;  %v9752_v29 = vld [vmem:[#allocation11 + $0x53c] sm:$0xf0] }
 0xf44   :  { %4266 = vmatpush.bf16.msrb.mxu1 %v4257_v45  ;;  %v8692_v45 = vor.u32 %v9808_v27, %v8689_v43  ;;  %v8432_v50 = vor.u32 %v9752_v29, %v8431_v33  ;;  %v8433_v27 = vld [vmem:[#allocation11 + $0x540] sm:$0xf0]  ;;  %v8439_v43 = vld [vmem:[#allocation11 + $0x508] sm:$0xf]  ;;  %v9802_v33 = vld [vmem:[#allocation11 + $0x6cc] sm:$0xf0] }
 0xf45   :  { %5179 = vmatpush.bf16.msrb.mxu3 %v8688_v60  ;;  %v9753_v60 = vld [vmem:[#allocation11 + $0x544] sm:$0xf0]  ;;  %v9794_v29 = vld [vmem:[#allocation11 + $0x694] sm:$0xf] }
 0xf72   :  { %v4103_v31 = vpop.f32.mrf.mxu3 }
 0xf7a   :  { %v4105_v28 = vpop.f32.mrf.mxu3 }
 0xf7b   :  { %v8697_v28 = vld [vmem:[#allocation11 + $0x748] sm:$0xf0] }
 0xf82   :  { %v4202_v39 = vpop.f32.mrf.mxu3 }
 0xf83   :  { %v4209_v40 = vsel %vm488_vm2, %v4202_v39, -inf }
 0xf84   :  { %4210 = vmax.xlane.f32.xlu2 %v4209_v40  ;;  %v8700_v40 = vor.u32 %v9809_v32, %v8697_v28  ;;  %v8441_v32 = vld [vmem:[#allocation11 + $0x548] sm:$0xf0]  ;;  %v8367_v28 = vld [vmem:[#allocation11 + $0x480] sm:$0xf] }
 0xf86   :  { %5221 = vmatpush.bf16.msra.mxu2 %v8700_v40 }
 0xf8a   :  { %v4204_v41 = vpop.f32.mrf.mxu3 }
 0xf8b   :  { %v8625_v41 = vld [vmem:[#allocation11 + $0x6c0] sm:$0xf0] }
 0xf8c   :  { %4219 = vadd.xlane.f32.xlu2 %v4218_v42  ;;  %v8631_v42 = vld [vmem:[#allocation11 + $0x688] sm:$0xf] }
 0xfa4   :  { %4230 = vrot.lane.b32.xlu2 %v10829_v58, %s10411_s15 }
 0xfb3   :  { %v4124_v47 = vpop.f32.mrf.mxu0 }
 0xfb4   :  { %v4128_v48 = vpack.c.bf16 %v4124_v47, %v4103_v31  ;;  %v9817_v31 = vld [vmem:[#allocation11 + $0x744] sm:$0xf0] }
 0xfb5   :  { %v8696_v24 = vor.u32 %v9817_v31, %v8695_v1  ;;  %v9801_v47 = vld [vmem:[#allocation11 + $0x6c4] sm:$0xf0]  ;;  %v8440_v1 = vor.u32 %v9753_v60, %v8439_v43  ;;  %v9745_v31 = vld [vmem:[#allocation11 + $0x50c] sm:$0xf]  ;;  %v9803_v43 = vld [vmem:[#allocation11 + $0x6d4] sm:$0xf0] }
 0xfb6   :  { %8285 = vmatmul.msk.bf16.vlgmr.msra.gmra.mxu1 %vm449_vm0, %v4128_v48  ;;  %v9793_v48 = vld [vmem:[#allocation11 + $0x68c] sm:$0xf] }
 0xfb7   :  { %5206 = vmatpush.bf16.msra.mxu1 %v8760_v6  ;;  %v8505_v6 = vld [vmem:[#allocation11 + $0x5c8] sm:$0xf0] }
 0xfbb   :  { %v4126_v49 = vpop.f32.mrf.mxu0  ;;  %5207 = vmatpush.bf16.msra.mxu1 %v8696_v24  ;;  %v8444_v24 = vor.u32 %v9745_v31, %v8441_v32  ;;  %v8649_v31 = vld [vmem:[#allocation11 + $0x6d8] sm:$0xf0] }
 0xfbc   :  { %v8633_v49 = vld [vmem:[#allocation11 + $0x6c8] sm:$0xf0] }
 0xff7   :  { %v4211_v51 = vpop.xlane.xlu2 %4210 }
 0xff8   :  { %v4213_v52 = vsub.f32 %v4202_v39, %v4211_v51  ;;  %v9800_v39 = vld [vmem:[#allocation11 + $0x6bc] sm:$0xf0] }
 0xff9   :  { %v8624_v44 = vor.u32 %v9800_v39, %v8623_v34  ;;  %v9736_v34 = vld [vmem:[#allocation11 + $0x4bc] sm:$0xf0]  ;;  %v9728_v39 = vld [vmem:[#allocation11 + $0x484] sm:$0xf] }
 0xffa   :  { %v4216_v53 = vmul.f32 1.442695, %v4213_v52  ;;  %v8632_v52 = vor.u32 %v9801_v47, %v8631_v42  ;;  %v8368_v40 = vor.u32 %v9736_v34, %v8367_v28  ;;  %v9737_v42 = vld [vmem:[#allocation11 + $0x4c4] sm:$0xf0]  ;;  %v9786_v28 = vld [vmem:[#allocation11 + $0x64c] sm:$0xf0] }
 0xffb   :  { %5180 = vmatpush.bf16.msrb.mxu3 %v8624_v44  ;;  %v9778_v34 = vld [vmem:[#allocation11 + $0x614] sm:$0xf] }
 0xffc   :  { %10092 = vpow2.f32 %v4216_v53  ;;  %5208 = vmatpush.bf16.msra.mxu1 %v8632_v52  ;;  %v8303_v52 = vld [vmem:[#allocation11 + $0x400] sm:$0xf] }
 0xfff   :  { %v4220_v54 = vpop.xlane.xlu2 %4219 }
0x1000   :  { %10094 = vrcp.f32 %v4220_v54  ;;  %v8636_v54 = vor.u32 %v9793_v48, %v8633_v49  ;;  %v9729_v48 = vld [vmem:[#allocation11 + $0x48c] sm:$0xf] }
0x1001   :  { %v8377_v49 = vld [vmem:[#allocation11 + $0x4c8] sm:$0xf0] }
0x1002   :  { %v10093_v55 = vpop.eup %10092  ;;  %5222 = vmatpush.bf16.msra.mxu2 %v8636_v54  ;;  %v9712_v54 = vld [vmem:[#allocation11 + $0x404] sm:$0xf] }
0x1003   :  { %v4221_v0 = vsel %vm488_vm2, %v10093_v55, 0.0 }
0x1004   :  { %4222 = vadd.xlane.f32.xlu0 %v4221_v0  ;;  %v10016_v0 = vld [vmem:[%s11038_s4 + $0x1] ss:$0 sm:$0xff] }
0x1006   :  { %v10095_v56 = vpop.eup %10094 }
0x1007   :  { %v4226_v3 = vmul.f32 %v10095_v56, %v10091_v63  ;;  %v4231_v58 = vpop.permute.xlu2 %4230  ;;  %v9792_v63 = vld [vmem:[#allocation11 + $0x684] sm:$0xf] }
0x1008   :  { %v4236_v57 = vsel %vm516_vm1, %v4231_v58, 0  ;;  %v8628_v51 = vor.u32 %v9792_v63, %v8625_v41  ;;  %v8369_v63 = vld [vmem:[#allocation11 + $0x4c0] sm:$0xf0]  ;;  %v8375_v41 = vld [vmem:[#allocation11 + $0x488] sm:$0xf] }
0x1009   :  { %v4228_v23 = vpack.c.bf16 %v4226_v3, %v4226_v3  ;;  %4245 = vmatpush.bf16.msra.mxu0 %v4236_v57  ;;  %v4014_v3 = vadd.f32 %v10895_v46, %v10889_v25  ;;  %v8559_v46 = vld [vmem:[#allocation11 + $0x600] sm:$0xf]  ;;  %v8372_v44 = vor.u32 %v9728_v39, %v8369_v63  ;;  %v8376_v47 = vor.u32 %v9737_v42, %v8375_v41  ;;  %v8583_v63 = vld [vmem:[#allocation11 + $0x618] sm:$0xf] }
0x100a   :  { %v9787_v41 = vld [vmem:[#allocation11 + $0x654] sm:$0xf0] }
0x100c   :  { %8288 = vmatmul.msk.bf16.vlgmr.msra.gmra.mxu0 %vm488_vm2, %v4228_v23 }
0x100d   :  { %5192 = vmatpush.bf16.msrb.mxu0 %v8756_v21  ;;  %v9761_v21 = vld [vmem:[#allocation11 + $0x58c] sm:$0xf] }
0x100e   :  { %v8508_v22 = vor.u32 %v9761_v21, %v8505_v6  ;;  %v8712_v21 = vor.u32 %v9819_v17, %v8711_v14  ;;  %v8383_v17 = vld [vmem:[#allocation11 + $0x490] sm:$0xf] }
0x1011   :  { %5193 = vmatpush.bf16.msrb.mxu0 %v8692_v45  ;;  %v8436_v45 = vor.u32 %v9744_v19, %v8433_v27  ;;  %v8647_v27 = vld [vmem:[#allocation11 + $0x698] sm:$0xf] }
0x1015   :  { %5194 = vmatpush.bf16.msrb.mxu0 %v8628_v51  ;;  %v8380_v51 = vor.u32 %v9729_v48, %v8377_v49  ;;  %v9779_v48 = vld [vmem:[#allocation11 + $0x61c] sm:$0xf] }
0x1016   :  { %v8585_v49 = vld [vmem:[#allocation11 + $0x658] sm:$0xf0] }
0x1033   :  { %v4153_v30 = vpop.f32.mrf.mxu1 }
0x1034   :  { %v10901_v35 = vadd.f32 %v4153_v30, %v4012_v59 }
0x103b   :  { %v4155_v9 = vpop.f32.mrf.mxu1 }
0x103c   :  { %v4159_v57 = vadd.f32 %v4155_v9, %v4014_v3  ;;  %v9777_v9 = vld [vmem:[#allocation11 + $0x60c] sm:$0xf]  ;;  %v9721_v3 = vld [vmem:[#allocation11 + $0x444] sm:$0xf0] }
0x1077   :  { %v4223_v61 = vpop.xlane.xlu0 %4222 }
0x1078   :  { %10096 = vrcp.f32 %v4223_v61  ;;  %v9776_v61 = vld [vmem:[#allocation11 + $0x604] sm:$0xf] }
0x107e   :  { %v10097_v62 = vpop.eup %10096 }
0x107f   :  { %v4227_v36 = vmul.f32 %v10097_v62, %v10093_v55  ;;  %v8560_v62 = vor.u32 %v9784_v37, %v8559_v46  ;;  %v9834_v46 = vld [vmem:[#allocation11 + $0x7cc] sm:$0xf0]  ;;  %v9826_v37 = vld [vmem:[#allocation11 + $0x794] sm:$0xf] }
0x1081   :  { %v4229_v2 = vpack.c.bf16 %v4227_v36, %v4227_v36  ;;  %v8561_v36 = vld [vmem:[#allocation11 + $0x640] sm:$0xf0]  ;;  %5181 = vmatpush.bf16.msrb.mxu3 %v8560_v62 }
0x1083   :  { %8289 = vmatmul.msk.bf16.vlgmr.msrb.gmra.mxu1 %vm488_vm2, %v4229_v2  ;;  %v8567_v2 = vld [vmem:[#allocation11 + $0x608] sm:$0xf] }
0x1089   :  { %v4247_v4 = vpop.f32.mrf.mxu0 }
0x1091   :  { %v4249_v5 = vpop.f32.mrf.mxu0 }
0x1092   :  { %v8564_v5 = vor.u32 %v9776_v61, %v8561_v36  ;;  %v8769_v61 = vld [vmem:[#allocation11 + $0x7d0] sm:$0xf0] }
0x1093   :  { %v8772_v36 = vor.u32 %v9826_v37, %v8769_v61  ;;  %v8521_v37 = vld [vmem:[#allocation11 + $0x5d8] sm:$0xf0] }
0x1094   :  { %5195 = vmatpush.bf16.msrb.mxu0 %v8564_v5  ;;  %v9827_v5 = vld [vmem:[#allocation11 + $0x79c] sm:$0xf] }
0x1098   :  { %5196 = vmatpush.bf16.msrb.mxu0 %v8500_v18  ;;  %v9811_v18 = vld [vmem:[#allocation11 + $0x71c] sm:$0xf] }
0x109c   :  { %5197 = vmatpush.bf16.msrb.mxu0 %v8436_v45  ;;  %v8648_v45 = vor.u32 %v9803_v43, %v8647_v27  ;;  %v8393_v27 = vld [vmem:[#allocation11 + $0x4d8] sm:$0xf0] }
0x10a0   :  { %5198 = vmatpush.bf16.msrb.mxu0 %v8372_v44 }
0x1100   :  { %v4268_v10 = vpop.f32.mrf.mxu1 }
0x1101   :  { %v4272_v11 = vpack.c.bf16 %v4268_v10, %v4247_v4  ;;  %v9785_v4 = vld [vmem:[#allocation11 + $0x644] sm:$0xf0] }
0x1102   :  { %v8568_v8 = vor.u32 %v9785_v4, %v8567_v2  ;;  %v8775_v2 = vld [vmem:[#allocation11 + $0x798] sm:$0xf] }
0x1103   :  { %8298 = vmatmul.msk.bf16.vlgmr.msrb.gmra.mxu2 %vm449_vm0, %v4272_v11  ;;  %v8495_v11 = vld [vmem:[#allocation11 + $0x580] sm:$0xf]  ;;  %v9835_v4 = vld [vmem:[#allocation11 + $0x7d4] sm:$0xf0] }
0x1104   :  { %5209 = vmatpush.bf16.msra.mxu1 %v8568_v8  ;;  %v8776_v8 = vor.u32 %v9835_v4, %v8775_v2  ;;  %v9754_v2 = vld [vmem:[#allocation11 + $0x54c] sm:$0xf0]  ;;  %v9746_v4 = vld [vmem:[#allocation11 + $0x514] sm:$0xf] }
0x1108   :  { %v4270_v12 = vpop.f32.mrf.mxu1  ;;  %5210 = vmatpush.bf16.msra.mxu1 %v8504_v20  ;;  %v8713_v20 = vld [vmem:[#allocation11 + $0x758] sm:$0xf0] }
0x1109   :  { %v9768_v12 = vld [vmem:[#allocation11 + $0x5bc] sm:$0xf0]  ;;  %v8716_v6 = vor.u32 %v9811_v18, %v8713_v20  ;;  %v9738_v18 = vld [vmem:[#allocation11 + $0x4cc] sm:$0xf0]  ;;  %v9730_v20 = vld [vmem:[#allocation11 + $0x494] sm:$0xf] }
0x110a   :  { %v8496_v13 = vor.u32 %v9768_v12, %v8495_v11 }
0x110c   :  { %5182 = vmatpush.bf16.msrb.mxu3 %v8496_v13  ;;  %5211 = vmatpush.bf16.msra.mxu1 %v8440_v1  ;;  %v8705_v13 = vld [vmem:[#allocation11 + $0x750] sm:$0xf0]  ;;  %v9795_v1 = vld [vmem:[#allocation11 + $0x69c] sm:$0xf] }
0x110d   :  { %v8708_v16 = vor.u32 %v9810_v38, %v8705_v13  ;;  %v8652_v32 = vor.u32 %v9795_v1, %v8649_v31  ;;  %v9747_v38 = vld [vmem:[#allocation11 + $0x51c] sm:$0xf]  ;;  %v9722_v1 = vld [vmem:[#allocation11 + $0x44c] sm:$0xf0]  ;;  %v9714_v31 = vld [vmem:[#allocation11 + $0x414] sm:$0xf] }
0x110e   :  { %v8457_v13 = vld [vmem:[#allocation11 + $0x558] sm:$0xf0] }
0x1110   :  { %5183 = vmatpush.bf16.msrb.mxu3 %v8432_v50  ;;  %5212 = vmatpush.bf16.msra.mxu1 %v8376_v47  ;;  %v8641_v50 = vld [vmem:[#allocation11 + $0x6d0] sm:$0xf0]  ;;  %v8584_v47 = vor.u32 %v9787_v41, %v8583_v63 }
0x1111   :  { %v8644_v60 = vor.u32 %v9794_v29, %v8641_v50  ;;  %v9731_v50 = vld [vmem:[#allocation11 + $0x49c] sm:$0xf] }
0x1114   :  { %5184 = vmatpush.bf16.msrb.mxu3 %v8368_v40  ;;  %v8577_v40 = vld [vmem:[#allocation11 + $0x650] sm:$0xf0] }
0x1115   :  { %v8580_v44 = vor.u32 %v9778_v34, %v8577_v40  ;;  %v8327_v34 = vld [vmem:[#allocation11 + $0x418] sm:$0xf] }
0x1186   :  { %v4297_v53 = vpop.f32.mrf.mxu2 }
0x1187   :  { %v4302_v55 = vadd.f32 %v4297_v53, %v10901_v35  ;;  %v9720_v53 = vld [vmem:[#allocation11 + $0x43c] sm:$0xf0] }
0x1189   :  { %v4304_v56 = vadd.f32 %v4302_v55, %v10793_v26  ;;  %v8304_v55 = vor.u32 %v9720_v53, %v8303_v52  ;;  %v8588_v52 = vor.u32 %v9779_v48, %v8585_v49 }
0x118b   :  { %v10912_v58 = vadd.f32 %v10016_v0, %v4304_v56  ;;  %v8311_v56 = vld [vmem:[#allocation11 + $0x408] sm:$0xf]  ;;  %5185 = vmatpush.bf16.msrb.mxu3 %v8304_v55  ;;  %v9770_v55 = vld [vmem:[#allocation11 + $0x5cc] sm:$0xf0] }
0x118d   :  { %4317 = vadd.xlane.f32.xlu2 %v10912_v58  ;;  %v4323_v23 = vmul.f32 %v10912_v58, %v10912_v58 }
0x118e   :  { %v4299_v59 = vpop.f32.mrf.mxu2 }
0x118f   :  { %v4303_v30 = vadd.f32 %v4299_v59, %v4159_v57  ;;  %4325 = vadd.xlane.f32.xlu1 %v4323_v23  ;;  %v8312_v23 = vor.u32 %v9721_v3, %v8311_v56  ;;  %v9713_v59 = vld [vmem:[#allocation11 + $0x40c] sm:$0xf] }
0x1191   :  { %v4305_v35 = vadd.f32 %v4303_v30, %v10795_v7  ;;  %v8569_v7 = vld [vmem:[#allocation11 + $0x648] sm:$0xf0]  ;;  %5213 = vmatpush.bf16.msra.mxu1 %v8312_v23  ;;  %v8513_v23 = vld [vmem:[#allocation11 + $0x5d0] sm:$0xf0] }
0x1192   :  { %v8572_v10 = vor.u32 %v9777_v9, %v8569_v7  ;;  %v8313_v30 = vld [vmem:[#allocation11 + $0x448] sm:$0xf0]  ;;  %v8777_v9 = vld [vmem:[#allocation11 + $0x7d8] sm:$0xf0]  ;;  %v8703_v7 = vld [vmem:[#allocation11 + $0x710] sm:$0xf] }
0x1193   :  { %v10918_v26 = vadd.f32 %v10016_v0, %v4305_v35  ;;  %v8305_v0 = vld [vmem:[#allocation11 + $0x440] sm:$0xf0]  ;;  %v8767_v35 = vld [vmem:[#allocation11 + $0x790] sm:$0xf]  ;;  %v8780_v11 = vor.u32 %v9827_v5, %v8777_v9  ;;  %v8449_v9 = vld [vmem:[#allocation11 + $0x550] sm:$0xf0] }
0x1194   :  { %5223 = vmatpush.bf16.msra.mxu2 %v8572_v10  ;;  %v8308_v57 = vor.u32 %v9712_v54, %v8305_v0  ;;  %v8768_v62 = vor.u32 %v9834_v46, %v8767_v35  ;;  %v9818_v10 = vld [vmem:[#allocation11 + $0x74c] sm:$0xf0]  ;;  %v9762_v0 = vld [vmem:[#allocation11 + $0x594] sm:$0xf]  ;;  %v9763_v46 = vld [vmem:[#allocation11 + $0x59c] sm:$0xf] }
0x1195   :  { %4319 = vadd.xlane.f32.xlu0 %v10918_v26  ;;  %v4324_v25 = vmul.f32 %v10918_v26, %v10918_v26  ;;  %v8704_v12 = vor.u32 %v9818_v10, %v8703_v7  ;;  %5262 = vmatpush.bf16.msrb.mxu1 %v8776_v8  ;;  %v8511_v54 = vld [vmem:[#allocation11 + $0x590] sm:$0xf]  ;;  %v8516_v35 = vor.u32 %v9762_v0, %v8513_v23  ;;  %v8455_v7 = vld [vmem:[#allocation11 + $0x518] sm:$0xf] }
0x1196   :  { %5199 = vmatpush.bf16.msrb.mxu0 %v8308_v57  ;;  %5234 = vmatpush.bf16.msra.mxu3 %v8768_v62  ;;  %v8512_v57 = vor.u32 %v9770_v55, %v8511_v54  ;;  %v8524_v62 = vor.u32 %v9763_v46, %v8521_v37  ;;  %v10017_v37 = vld [vmem:[%s11039_s5 + $0x1] ss:$0 sm:$0xff] }
0x1198   :  { %5224 = vmatpush.bf16.msra.mxu2 %v8508_v22  ;;  %v8639_v22 = vld [vmem:[#allocation11 + $0x690] sm:$0xf] }
0x1199   :  { %v8640_v19 = vor.u32 %v9802_v33, %v8639_v22  ;;  %5263 = vmatpush.bf16.msrb.mxu1 %v8712_v21  ;;  %v8384_v21 = vor.u32 %v9738_v18, %v8383_v17  ;;  %v8391_v22 = vld [vmem:[#allocation11 + $0x498] sm:$0xf] }
0x119a   :  { %5248 = vmatpush.bf16.msra.mxu0 %v8772_v36  ;;  %5235 = vmatpush.bf16.msra.mxu3 %v8704_v12  ;;  %v8447_v36 = vld [vmem:[#allocation11 + $0x510] sm:$0xf]  ;;  %v9755_v12 = vld [vmem:[#allocation11 + $0x554] sm:$0xf0] }
0x119b   :  { %v8448_v8 = vor.u32 %v9754_v2, %v8447_v36  ;;  %v8456_v14 = vor.u32 %v9755_v12, %v8455_v7  ;;  %v9739_v33 = vld [vmem:[#allocation11 + $0x4d4] sm:$0xf0]  ;;  %v8783_v7 = vld [vmem:[#allocation11 + $0x7a0] sm:$0xf] }
0x119c   :  { %5225 = vmatpush.bf16.msra.mxu2 %v8444_v24  ;;  %v8575_v24 = vld [vmem:[#allocation11 + $0x610] sm:$0xf] }
0x119d   :  { %4327 = vadd.xlane.f32.xlu0 %v4324_v25  ;;  %v8316_v25 = vor.u32 %v9713_v59, %v8313_v30  ;;  %v8576_v39 = vor.u32 %v9786_v28, %v8575_v24  ;;  %5264 = vmatpush.bf16.msrb.mxu1 %v8648_v45  ;;  %v8519_v59 = vld [vmem:[#allocation11 + $0x598] sm:$0xf]  ;;  %v8319_v45 = vld [vmem:[#allocation11 + $0x410] sm:$0xf]  ;;  %v8321_v28 = vld [vmem:[#allocation11 + $0x450] sm:$0xf0] }
0x119e   :  { %5249 = vmatpush.bf16.msra.mxu0 %v8708_v16  ;;  %5236 = vmatpush.bf16.msra.mxu3 %v8640_v19  ;;  %v9771_v30 = vld [vmem:[#allocation11 + $0x5d4] sm:$0xf0]  ;;  %v8460_v16 = vor.u32 %v9747_v38, %v8457_v13  ;;  %v8392_v19 = vor.u32 %v9739_v33, %v8391_v22  ;;  %v8320_v24 = vor.u32 %v9722_v1, %v8319_v45  ;;  %v9837_v13 = vld [vmem:[#allocation11 + $0x7e4] sm:$0xf0]  ;;  %v9812_v33 = vld [vmem:[#allocation11 + $0x724] sm:$0xf] }
0x119f   :  { %v8324_v41 = vor.u32 %v9714_v31, %v8321_v28  ;;  %v8655_v1 = vld [vmem:[#allocation11 + $0x6a0] sm:$0xf]  ;;  %v9796_v28 = vld [vmem:[#allocation11 + $0x6a4] sm:$0xf] }
0x11a0   :  { %5226 = vmatpush.bf16.msra.mxu2 %v8380_v51  ;;  %v9804_v31 = vld [vmem:[#allocation11 + $0x6dc] sm:$0xf0] }
0x11a1   :  { %5265 = vmatpush.bf16.msrb.mxu1 %v8584_v47  ;;  %v8329_v47 = vld [vmem:[#allocation11 + $0x458] sm:$0xf0] }
0x11a2   :  { %5250 = vmatpush.bf16.msra.mxu0 %v8644_v60  ;;  %5237 = vmatpush.bf16.msra.mxu3 %v8576_v39  ;;  %v8396_v60 = vor.u32 %v9731_v50, %v8393_v27  ;;  %v9723_v39 = vld [vmem:[#allocation11 + $0x454] sm:$0xf0]  ;;  %v9821_v50 = vld [vmem:[#allocation11 + $0x764] sm:$0xf0]  ;;  %v9813_v27 = vld [vmem:[#allocation11 + $0x72c] sm:$0xf] }
0x11a4   :  { %5227 = vmatpush.bf16.msra.mxu2 %v8316_v25  ;;  %v8520_v25 = vor.u32 %v9771_v30, %v8519_v59 }
0x11a6   :  { %5251 = vmatpush.bf16.msra.mxu0 %v8580_v44  ;;  %5238 = vmatpush.bf16.msra.mxu3 %v8512_v57  ;;  %v9715_v44 = vld [vmem:[#allocation11 + $0x41c] sm:$0xf] }
0x11a7   :  { %5266 = vmatpush.bf16.msrb.mxu1 %v8520_v25 }
0x11a8   :  { %5276 = vmatpush.bf16.msrb.mxu2 %v8780_v11  ;;  %v8452_v11 = vor.u32 %v9746_v4, %v8449_v9  ;;  %v10018_v4 = vld [vmem:[#allocation10 + $0x1] ss:$0 sm:$0xff] }
0x11aa   :  { %5252 = vmatpush.bf16.msra.mxu0 %v8516_v35  ;;  %5239 = vmatpush.bf16.msra.mxu3 %v8448_v8 }
0x11ab   :  { %5267 = vmatpush.bf16.msrb.mxu1 %v8456_v14  ;;  %v9829_v14 = vld [vmem:[#allocation11 + $0x7ac] sm:$0xf] }
0x11ac   :  { %5277 = vmatpush.bf16.msrb.mxu2 %v8716_v6  ;;  %v8385_v6 = vld [vmem:[#allocation11 + $0x4d0] sm:$0xf0] }
0x11ad   :  { %v8388_v29 = vor.u32 %v9730_v20, %v8385_v6  ;;  %v8719_v20 = vld [vmem:[#allocation11 + $0x720] sm:$0xf] }
0x11ae   :  { %5253 = vmatpush.bf16.msra.mxu0 %v8452_v11  ;;  %5240 = vmatpush.bf16.msra.mxu3 %v8384_v21  ;;  %v8791_v11 = vld [vmem:[#allocation11 + $0x7a8] sm:$0xf]  ;;  %v9820_v21 = vld [vmem:[#allocation11 + $0x75c] sm:$0xf0] }
0x11af   :  { %5268 = vmatpush.bf16.msrb.mxu1 %v8392_v19  ;;  %v8792_v6 = vor.u32 %v9837_v13, %v8791_v11  ;;  %v8727_v19 = vld [vmem:[#allocation11 + $0x728] sm:$0xf] }
0x11b0   :  { %5278 = vmatpush.bf16.msrb.mxu2 %v8652_v32  ;;  %v8471_v11 = vld [vmem:[#allocation11 + $0x528] sm:$0xf] }
0x11b1   :  { %v9757_v13 = vld [vmem:[#allocation11 + $0x564] sm:$0xf0] }
0x11b2   :  { %5254 = vmatpush.bf16.msra.mxu0 %v8388_v29  ;;  %5241 = vmatpush.bf16.msra.mxu3 %v8320_v24  ;;  %v8721_v29 = vld [vmem:[#allocation11 + $0x760] sm:$0xf0] }
0x11b3   :  { %v8724_v45 = vor.u32 %v9812_v33, %v8721_v29  ;;  %v9732_v33 = vld [vmem:[#allocation11 + $0x4a4] sm:$0xf] }
0x11b4   :  { %5279 = vmatpush.bf16.msrb.mxu2 %v8588_v52  ;;  %v8332_v52 = vor.u32 %v9715_v44, %v8329_v47  ;;  %v8591_v47 = vld [vmem:[#allocation11 + $0x620] sm:$0xf]  ;;  %v8401_v29 = vld [vmem:[#allocation11 + $0x4e0] sm:$0xf0] }
0x11b6   :  { %5255 = vmatpush.bf16.msra.mxu0 %v8324_v41  ;;  %v8665_v41 = vld [vmem:[#allocation11 + $0x6e8] sm:$0xf0] }
0x11b8   :  { %5280 = vmatpush.bf16.msrb.mxu2 %v8524_v62 }
0x11bc   :  { %5281 = vmatpush.bf16.msrb.mxu2 %v8460_v16  ;;  %v8793_v16 = vld [vmem:[#allocation11 + $0x7e8] sm:$0xf0] }
0x11bd   :  { %v8796_v22 = vor.u32 %v9829_v14, %v8793_v16  ;;  %v9749_v14 = vld [vmem:[#allocation11 + $0x52c] sm:$0xf] }
0x11be   :  { %v8473_v16 = vld [vmem:[#allocation11 + $0x568] sm:$0xf0] }
0x11c0   :  { %5282 = vmatpush.bf16.msrb.mxu2 %v8396_v60  ;;  %v8720_v60 = vor.u32 %v9820_v21, %v8719_v20  ;;  %v8399_v20 = vld [vmem:[#allocation11 + $0x4a0] sm:$0xf] }
0x11c1   :  { %v9740_v21 = vld [vmem:[#allocation11 + $0x4dc] sm:$0xf0] }
0x11c4   :  { %5283 = vmatpush.bf16.msrb.mxu2 %v8332_v52 }
0x1200   :  { %v4318_v42 = vpop.xlane.xlu2 %4317 }
0x1201   :  { %v10924_v51 = vmul.f32 %v4318_v42, %v10701_v15  ;;  %v8328_v42 = vor.u32 %v9723_v39, %v8327_v34  ;;  %v8657_v34 = vld [vmem:[#allocation11 + $0x6e0] sm:$0xf0]  ;;  %v8663_v39 = vld [vmem:[#allocation11 + $0x6a8] sm:$0xf] }
0x1202   :  { %v4326_v53 = vpop.xlane.xlu1 %4325  ;;  %v8660_v44 = vor.u32 %v9796_v28, %v8657_v34 }
0x1203   :  { %v4331_v56 = vmul.f32 %v10924_v51, %v10924_v51  ;;  %v4329_v3 = vmul.f32 %v4326_v53, %v10701_v15  ;;  %5269 = vmatpush.bf16.msrb.mxu1 %v8328_v42  ;;  %v4335_v25 = vsub.f32 %v10912_v58, %v10924_v51  ;;  %v9828_v58 = vld [vmem:[#allocation11 + $0x7a4] sm:$0xf]  ;;  %v8656_v42 = vor.u32 %v9804_v31, %v8655_v1  ;;  %v9724_v31 = vld [vmem:[#allocation11 + $0x45c] sm:$0xf0] }
0x1204   :  { %v8785_v51 = vld [vmem:[#allocation11 + $0x7e0] sm:$0xf0]  ;;  %v8404_v1 = vor.u32 %v9732_v33, %v8401_v29  ;;  %v9782_v33 = vld [vmem:[#allocation11 + $0x634] sm:$0xf] }
0x1205   :  { %v4333_v61 = vsub.f32 %v4329_v3, %v4331_v56  ;;  %v8788_v18 = vor.u32 %v9828_v58, %v8785_v51  ;;  %v9748_v58 = vld [vmem:[#allocation11 + $0x524] sm:$0xf]  ;;  %v8609_v29 = vld [vmem:[#allocation11 + $0x670] sm:$0xf0] }
0x1206   :  { %v8465_v51 = vld [vmem:[#allocation11 + $0x560] sm:$0xf0] }
0x1207   :  { %v10929_v5 = vadd.f32 1e-05, %v4333_v61 }
0x1208   :  { %v4320_v10 = vpop.xlane.xlu0 %4319 }
0x1209   :  { %10098 = vrsqrt.f32 %v10929_v5  ;;  %v4322_v43 = vmul.f32 %v4320_v10, %v10701_v15  ;;  %vm4345_vm1 = vweird.f32 %v10929_v5  ;;  %v9836_v10 = vld [vmem:[#allocation11 + $0x7dc] sm:$0xf0] }
0x120a   :  { %v8784_v17 = vor.u32 %v9836_v10, %v8783_v7 }
0x120b   :  { %v4332_v48 = vmul.f32 %v4322_v43, %v4322_v43  ;;  %v4336_v36 = vsub.f32 %v10918_v26, %v4322_v43  ;;  %v8729_v43 = vld [vmem:[#allocation11 + $0x768] sm:$0xf0] }
0x120c   :  { %v8732_v24 = vor.u32 %v9813_v27, %v8729_v43  ;;  %v9733_v27 = vld [vmem:[#allocation11 + $0x4ac] sm:$0xf] }
0x120d   :  { %v8409_v43 = vld [vmem:[#allocation11 + $0x4e8] sm:$0xf0] }
0x120e   :  { %v8412_v34 = vor.u32 %v9733_v27, %v8409_v43  ;;  %v9783_v27 = vld [vmem:[#allocation11 + $0x63c] sm:$0xf] }
0x120f   :  { %v10099_v32 = vpop.eup %10098  ;;  %v8617_v43 = vld [vmem:[#allocation11 + $0x678] sm:$0xf0] }
0x1210   :  { %v4340_v40 = vmul.f32 %v10099_v32, %v10929_v5  ;;  %v4328_v63 = vpop.xlane.xlu0 %4327  ;;  %vm4346_vm0 = vweird.f32 %v10099_v32 }
0x1211   :  { %v4330_v49 = vmul.f32 %v4328_v63, %v10701_v15  ;;  %vm4347_vm2 = vmor %vm4345_vm1, %vm4346_vm0  ;;  %v9797_v63 = vld [vmem:[#allocation11 + $0x6ac] sm:$0xf] }
0x1212   :  { %v4341_v53 = vmul.f32 %v10099_v32, %v4340_v40  ;;  %v9805_v40 = vld [vmem:[#allocation11 + $0x6e4] sm:$0xf0]  ;;  %v8668_v52 = vor.u32 %v9797_v63, %v8665_v41  ;;  %v9717_v63 = vld [vmem:[#allocation11 + $0x42c] sm:$0xf] }
0x1213   :  { %v4334_v54 = vsub.f32 %v4330_v49, %v4332_v48  ;;  %v9788_v48 = vld [vmem:[#allocation11 + $0x65c] sm:$0xf0]  ;;  %v8664_v49 = vor.u32 %v9805_v40, %v8663_v39  ;;  %v8343_v39 = vld [vmem:[#allocation11 + $0x428] sm:$0xf]  ;;  %v8345_v41 = vld [vmem:[#allocation11 + $0x468] sm:$0xf0] }
0x1214   :  { %v4342_v0 = vmul.f32 0.5, %v4341_v53  ;;  %v9780_v53 = vld [vmem:[#allocation11 + $0x624] sm:$0xf]  ;;  %v9725_v40 = vld [vmem:[#allocation11 + $0x464] sm:$0xf0] }
0x1215   :  { %v4338_v55 = vadd.f32 1e-05, %v4334_v54  ;;  %v8593_v54 = vld [vmem:[#allocation11 + $0x660] sm:$0xf0] }
0x1216   :  { %v4343_v56 = vsub.f32 1.5, %v4342_v0  ;;  %v9789_v0 = vld [vmem:[#allocation11 + $0x664] sm:$0xf0] }
0x1217   :  { %10100 = vrsqrt.f32 %v4338_v55  ;;  %vm4355_vm4 = vweird.f32 %v4338_v55 }
0x1218   :  { %v4344_v57 = vmul.f32 %v10099_v32, %v4343_v56  ;;  %v9781_v56 = vld [vmem:[#allocation11 + $0x62c] sm:$0xf] }
0x121a   :  { %v4348_v30 = vsel %vm4347_vm2, %v10099_v32, %v4344_v57  ;;  %v8728_v32 = vor.u32 %v9821_v50, %v8727_v19  ;;  %v8592_v57 = vor.u32 %v9788_v48, %v8591_v47  ;;  %v8407_v19 = vld [vmem:[#allocation11 + $0x4a8] sm:$0xf]  ;;  %v9830_v47 = vld [vmem:[#allocation11 + $0x7b4] sm:$0xf] }
0x121b   :  { %v4359_v61 = vmul.f32 %v4348_v30, %v4335_v25  ;;  %v9772_v30 = vld [vmem:[#allocation11 + $0x5dc] sm:$0xf0]  ;;  %v9741_v50 = vld [vmem:[#allocation11 + $0x4e4] sm:$0xf0]  ;;  %v8801_v48 = vld [vmem:[#allocation11 + $0x7f0] sm:$0xf0] }
0x121c   :  { %v8408_v28 = vor.u32 %v9741_v50, %v8407_v19  ;;  %v8615_v19 = vld [vmem:[#allocation11 + $0x638] sm:$0xf] }
0x121d   :  { %v10101_v3 = vpop.eup %10100  ;;  %v4364_v5 = vmul.f32 %v10017_v37, %v4359_v61  ;;  %v8535_v61 = vld [vmem:[#allocation11 + $0x5a8] sm:$0xf]  ;;  %v9791_v50 = vld [vmem:[#allocation11 + $0x674] sm:$0xf0] }
0x121e   :  { %v4350_v23 = vmul.f32 %v10101_v3, %v4338_v55  ;;  %vm4356_vm3 = vweird.f32 %v10101_v3  ;;  %v8599_v55 = vld [vmem:[#allocation11 + $0x628] sm:$0xf] }
0x121f   :  { %vm4357_vm5 = vmor %vm4355_vm4, %vm4356_vm3  ;;  %v10942_v12 = vadd.f32 %v10018_v4, %v4364_v5 }
0x1220   :  { %v4351_v59 = vmul.f32 %v10101_v3, %v4350_v23  ;;  %v8596_v23 = vor.u32 %v9780_v53, %v8593_v54  ;;  %v9839_v54 = vld [vmem:[#allocation11 + $0x7f4] sm:$0xf0] }
0x1222   :  { %v4352_v35 = vmul.f32 0.5, %v4351_v59  ;;  %v8527_v59 = vld [vmem:[#allocation11 + $0x5a0] sm:$0xf] }
0x1224   :  { %v4353_v46 = vsub.f32 1.5, %v4352_v35  ;;  %v8600_v35 = vor.u32 %v9789_v0, %v8599_v55  ;;  %v9831_v55 = vld [vmem:[#allocation11 + $0x7bc] sm:$0xf] }
0x1225   :  { %v8809_v0 = vld [vmem:[#allocation11 + $0x7f8] sm:$0xf0] }
0x1226   :  { %v4354_v62 = vmul.f32 %v10101_v3, %v4353_v46  ;;  %v9764_v46 = vld [vmem:[#allocation11 + $0x5a4] sm:$0xf] }
0x1228   :  { %v4358_v2 = vsel %vm4357_vm5, %v10101_v3, %v4354_v62  ;;  %v8601_v3 = vld [vmem:[#allocation11 + $0x668] sm:$0xf0]  ;;  %v9773_v62 = vld [vmem:[#allocation11 + $0x5e4] sm:$0xf0] }
0x1229   :  { %v4360_v8 = vmul.f32 %v4358_v2, %v4336_v36  ;;  %v8604_v25 = vor.u32 %v9781_v56, %v8601_v3  ;;  %v9765_v36 = vld [vmem:[#allocation11 + $0x5ac] sm:$0xf]  ;;  %v8536_v7 = vor.u32 %v9773_v62, %v8535_v61  ;;  %v8344_v56 = vor.u32 %v9725_v40, %v8343_v39  ;;  %v8743_v61 = vld [vmem:[#allocation11 + $0x738] sm:$0xf] }
0x122a   :  { %v8537_v2 = vld [vmem:[#allocation11 + $0x5e8] sm:$0xf0]  ;;  %v8348_v3 = vor.u32 %v9717_v63, %v8345_v41  ;;  %v9823_v62 = vld [vmem:[#allocation11 + $0x774] sm:$0xf0]  ;;  %v9767_v63 = vld [vmem:[#allocation11 + $0x5bc] sm:$0xf] }
0x122b   :  { %v4365_v9 = vmul.f32 %v10017_v37, %v4360_v8  ;;  %v8529_v37 = vld [vmem:[#allocation11 + $0x5e0] sm:$0xf0]  ;;  %v8463_v8 = vld [vmem:[#allocation11 + $0x520] sm:$0xf]  ;;  %v8540_v10 = vor.u32 %v9765_v36, %v8537_v2  ;;  %v9815_v36 = vld [vmem:[#allocation11 + $0x73c] sm:$0xf] }
0x122c   :  { %v8532_v5 = vor.u32 %v9764_v46, %v8529_v37  ;;  %v9814_v46 = vld [vmem:[#allocation11 + $0x734] sm:$0xf]  ;;  %v8745_v2 = vld [vmem:[#allocation11 + $0x778] sm:$0xf0]  ;;  %v8551_v39 = vld [vmem:[#allocation11 + $0x5b8] sm:$0xf] }
0x122d   :  { %v10944_v38 = vadd.f32 %v10018_v4, %v4365_v9  ;;  %v8528_v4 = vor.u32 %v9772_v30, %v8527_v59  ;;  %v9756_v9 = vld [vmem:[#allocation11 + $0x55c] sm:$0xf0]  ;;  %v8735_v59 = vld [vmem:[#allocation11 + $0x730] sm:$0xf]  ;;  %v8737_v37 = vld [vmem:[#allocation11 + $0x770] sm:$0xf0] }
0x122e   :  { %v9822_v30 = vld [vmem:[#allocation11 + $0x76c] sm:$0xf0]  ;;  %v9775_v40 = vld [vmem:[#allocation11 + $0x5f4] sm:$0xf0]  ;;  %v8553_v41 = vld [vmem:[#allocation11 + $0x5f8] sm:$0xf0] }
0x122f   :  { %v10948_v26 = vpack.c.bf16 %v10944_v38, %v10942_v12 }
0x1231   :  { %5186 = vmatmul.bf16.vlgmr.msrb.gmra.mxu3 %v10948_v26  ;;  %5200 = vmatmul.bf16.vlgmr.msrb.gmra.mxu0 %v10948_v26 }
0x1232   :  { %5214 = vmatmul.bf16.vlgmr.msra.gmra.mxu1 %v10948_v26  ;;  %5228 = vmatmul.bf16.vlgmr.msra.gmra.mxu2 %v10948_v26 }
0x1233   :  { %5290 = vmatpush.bf16.msrb.mxu3 %v8784_v17  ;;  %5304 = vmatpush.bf16.msrb.mxu0 %v8788_v18  ;;  %v8464_v17 = vor.u32 %v9756_v9, %v8463_v8  ;;  %v8468_v18 = vor.u32 %v9748_v58, %v8465_v51  ;;  %v8671_v8 = vld [vmem:[#allocation11 + $0x6b0] sm:$0xf]  ;;  %v9798_v58 = vld [vmem:[#allocation11 + $0x6b4] sm:$0xf] }
0x1234   :  { %5318 = vmatpush.bf16.msra.mxu1 %v8792_v6  ;;  %5332 = vmatpush.bf16.msra.mxu2 %v8796_v22  ;;  %v8472_v6 = vor.u32 %v9757_v13, %v8471_v11  ;;  %v8476_v22 = vor.u32 %v9749_v14, %v8473_v16  ;;  %v9806_v9 = vld [vmem:[#allocation11 + $0x6ec] sm:$0xf0]  ;;  %v8673_v51 = vld [vmem:[#allocation11 + $0x6f0] sm:$0xf0]  ;;  %v8679_v11 = vld [vmem:[#allocation11 + $0x6b8] sm:$0xf] }
0x1235   :  { %v9807_v13 = vld [vmem:[#allocation11 + $0x6f4] sm:$0xf0]  ;;  %v9799_v14 = vld [vmem:[#allocation11 + $0x6bc] sm:$0xf] }
0x1236   :  { %v8681_v16 = vld [vmem:[#allocation11 + $0x6f8] sm:$0xf0] }
0x1237   :  { %5291 = vmatpush.bf16.msrb.mxu3 %v8720_v60  ;;  %5305 = vmatpush.bf16.msrb.mxu0 %v8724_v45  ;;  %v8335_v60 = vld [vmem:[#allocation11 + $0x420] sm:$0xf]  ;;  %v8400_v45 = vor.u32 %v9740_v21, %v8399_v20  ;;  %v8607_v20 = vld [vmem:[#allocation11 + $0x630] sm:$0xf] }
0x1238   :  { %5319 = vmatpush.bf16.msra.mxu1 %v8728_v32  ;;  %5333 = vmatpush.bf16.msra.mxu2 %v8732_v24  ;;  %v9716_v32 = vld [vmem:[#allocation11 + $0x424] sm:$0xf]  ;;  %v9790_v21 = vld [vmem:[#allocation11 + $0x66c] sm:$0xf0] }
0x1239   :  { %v8337_v24 = vld [vmem:[#allocation11 + $0x460] sm:$0xf0] }
0x123a   :  { %v8340_v53 = vor.u32 %v9716_v32, %v8337_v24  ;;  %v8616_v32 = vor.u32 %v9791_v50, %v8615_v19  ;;  %v8620_v24 = vor.u32 %v9783_v27, %v8617_v43  ;;  %v9854_v19 = vld [vmem:[#allocation14 + $0x470] sm:$0xff] }
0x123b   :  { %5292 = vmatpush.bf16.msrb.mxu3 %v8656_v42  ;;  %5306 = vmatpush.bf16.msrb.mxu0 %v8660_v44  ;;  %v8799_v42 = vld [vmem:[#allocation11 + $0x7b0] sm:$0xf] }
0x123c   :  { %5320 = vmatpush.bf16.msra.mxu1 %v8664_v49  ;;  %5334 = vmatpush.bf16.msra.mxu2 %v8668_v52  ;;  %v9838_v44 = vld [vmem:[#allocation11 + $0x7ec] sm:$0xf0]  ;;  %v8807_v49 = vld [vmem:[#allocation11 + $0x7b8] sm:$0xf]  ;;  %v8336_v52 = vor.u32 %v9724_v31, %v8335_v60  ;;  %v8608_v60 = vor.u32 %v9790_v21, %v8607_v20 }
0x123d   :  { %v9774_v31 = vld [vmem:[#allocation11 + $0x5ec] sm:$0xf0] }
0x123e   :  { %v9862_v50 = vld [vmem:[#allocation14 + $0x4b0] sm:$0xff] }
0x123f   :  { %5293 = vmatpush.bf16.msrb.mxu3 %v8592_v57  ;;  %5307 = vmatpush.bf16.msrb.mxu0 %v8596_v23  ;;  %v8800_v57 = vor.u32 %v9838_v44, %v8799_v42  ;;  %v8804_v23 = vor.u32 %v9830_v47, %v8801_v48  ;;  %v8479_v47 = vld [vmem:[#allocation11 + $0x530] sm:$0xf] }
0x1240   :  { %5321 = vmatpush.bf16.msra.mxu1 %v8600_v35  ;;  %5335 = vmatpush.bf16.msra.mxu2 %v8604_v25  ;;  %v8808_v35 = vor.u32 %v9839_v54, %v8807_v49  ;;  %v8812_v25 = vor.u32 %v9831_v55, %v8809_v0  ;;  %v9758_v48 = vld [vmem:[#allocation11 + $0x56c] sm:$0xf0]  ;;  %v8552_v49 = vor.u32 %v9775_v40, %v8551_v39  ;;  %v8481_v54 = vld [vmem:[#allocation11 + $0x570] sm:$0xf0]  ;;  %v8487_v55 = vld [vmem:[#allocation11 + $0x538] sm:$0xf] }
0x1241   :  { %5242 = vmatmul.bf16.vlgmr.msra.gmra.mxu3 %v10948_v26  ;;  %5256 = vmatmul.bf16.vlgmr.msra.gmra.mxu0 %v10948_v26  ;;  %v9759_v0 = vld [vmem:[#allocation11 + $0x574] sm:$0xf0]  ;;  %v9846_v27 = vld [vmem:[#allocation14 + $0x430] sm:$0xff] }
0x1242   :  { %5270 = vmatmul.bf16.vlgmr.msrb.gmra.mxu1 %v10948_v26  ;;  %5284 = vmatmul.bf16.vlgmr.msrb.gmra.mxu2 %v10948_v26  ;;  %v9870_v43 = vld [vmem:[#allocation14 + $0x4f0] sm:$0xff]  ;;  %v9859_v39 = vld [vmem:[#allocation14 + $0x498] sm:$0xff] }
0x1243   :  { %5294 = vmatpush.bf16.msrb.mxu3 %v8528_v4  ;;  %5308 = vmatpush.bf16.msrb.mxu0 %v8532_v5  ;;  %v8736_v4 = vor.u32 %v9822_v30, %v8735_v59  ;;  %v8740_v5 = vor.u32 %v9814_v46, %v8737_v37  ;;  %v8415_v59 = vld [vmem:[#allocation11 + $0x4b0] sm:$0xf]  ;;  %v9734_v46 = vld [vmem:[#allocation11 + $0x4b4] sm:$0xf]  ;;  %v9843_v40 = vld [vmem:[#allocation14 + $0x418] sm:$0xff] }
0x1244   :  { %5322 = vmatpush.bf16.msra.mxu1 %v8536_v7  ;;  %5336 = vmatpush.bf16.msra.mxu2 %v8540_v10  ;;  %v8744_v7 = vor.u32 %v9823_v62, %v8743_v61  ;;  %v8748_v10 = vor.u32 %v9815_v36, %v8745_v2  ;;  %v9742_v30 = vld [vmem:[#allocation11 + $0x4ec] sm:$0xf0]  ;;  %v8417_v37 = vld [vmem:[#allocation11 + $0x4f0] sm:$0xf0]  ;;  %v8423_v61 = vld [vmem:[#allocation11 + $0x4b8] sm:$0xf] }
0x1245   :  { %v9743_v62 = vld [vmem:[#allocation11 + $0x4f4] sm:$0xf0]  ;;  %v9735_v36 = vld [vmem:[#allocation11 + $0x4bc] sm:$0xf] }
0x1246   :  { %v8425_v2 = vld [vmem:[#allocation11 + $0x4f8] sm:$0xf0] }
0x1247   :  { %5295 = vmatpush.bf16.msrb.mxu3 %v8464_v17  ;;  %5309 = vmatpush.bf16.msrb.mxu0 %v8468_v18  ;;  %v8672_v17 = vor.u32 %v9806_v9, %v8671_v8  ;;  %v8676_v18 = vor.u32 %v9798_v58, %v8673_v51  ;;  %v8351_v8 = vld [vmem:[#allocation11 + $0x430] sm:$0xf]  ;;  %v9718_v58 = vld [vmem:[#allocation11 + $0x434] sm:$0xf] }
0x1248   :  { %5323 = vmatpush.bf16.msra.mxu1 %v8472_v6  ;;  %5337 = vmatpush.bf16.msra.mxu2 %v8476_v22  ;;  %v8680_v6 = vor.u32 %v9807_v13, %v8679_v11  ;;  %v8684_v22 = vor.u32 %v9799_v14, %v8681_v16  ;;  %v9726_v9 = vld [vmem:[#allocation11 + $0x46c] sm:$0xf0]  ;;  %v8353_v51 = vld [vmem:[#allocation11 + $0x470] sm:$0xf0]  ;;  %v8359_v11 = vld [vmem:[#allocation11 + $0x438] sm:$0xf] }
0x1249   :  { %v9727_v13 = vld [vmem:[#allocation11 + $0x474] sm:$0xf0]  ;;  %v9719_v14 = vld [vmem:[#allocation11 + $0x43c] sm:$0xf] }
0x124a   :  { %v8361_v16 = vld [vmem:[#allocation11 + $0x478] sm:$0xf0]  ;;  %v8360_v20 = vor.u32 %v9727_v13, %v8359_v11  ;;  %v9890_v11 = vld [vmem:[#allocation14 + $0x590] sm:$0xff] }
0x124b   :  { %5296 = vmatpush.bf16.msrb.mxu3 %v8400_v45  ;;  %5310 = vmatpush.bf16.msrb.mxu0 %v8404_v1  ;;  %v8612_v45 = vor.u32 %v9782_v33, %v8609_v29  ;;  %v8543_v1 = vld [vmem:[#allocation11 + $0x5b0] sm:$0xf]  ;;  %v8364_v21 = vor.u32 %v9719_v14, %v8361_v16  ;;  %v9847_v33 = vld [vmem:[#allocation14 + $0x438] sm:$0xff]  ;;  %v9881_v16 = vld [vmem:[#allocation14 + $0x548] sm:$0xff] }
0x124c   :  { %5324 = vmatpush.bf16.msra.mxu1 %v8408_v28  ;;  %5338 = vmatpush.bf16.msra.mxu2 %v8412_v34  ;;  %v9766_v28 = vld [vmem:[#allocation11 + $0x5b4] sm:$0xf]  ;;  %v8544_v42 = vor.u32 %v9774_v31, %v8543_v1  ;;  %v9871_v29 = vld [vmem:[#allocation14 + $0x4f8] sm:$0xff]  ;;  %v9845_v1 = vld [vmem:[#allocation14 + $0x428] sm:$0xff] }
0x124d   :  { %v8545_v34 = vld [vmem:[#allocation11 + $0x5f0] sm:$0xf0]  ;;  %v9869_v31 = vld [vmem:[#allocation14 + $0x4e8] sm:$0xff] }
0x124e   :  { %v8548_v44 = vor.u32 %v9766_v28, %v8545_v34  ;;  %v9844_v28 = vld [vmem:[#allocation14 + $0x420] sm:$0xff]  ;;  %v9851_v34 = vld [vmem:[#allocation14 + $0x458] sm:$0xff]  ;;  %v9874_v13 = vld [vmem:[#allocation14 + $0x510] sm:$0xff] }
0x124f   :  { %5297 = vmatpush.bf16.msrb.mxu3 %v8336_v52  ;;  %5311 = vmatpush.bf16.msrb.mxu0 %v8340_v53  ;;  %v8556_v52 = vor.u32 %v9767_v63, %v8553_v41  ;;  %v9750_v53 = vld [vmem:[#allocation11 + $0x534] sm:$0xf]  ;;  %v9867_v63 = vld [vmem:[#allocation14 + $0x4d8] sm:$0xff] }
0x1250   :  { %5325 = vmatpush.bf16.msra.mxu1 %v8344_v56  ;;  %5339 = vmatpush.bf16.msra.mxu2 %v8348_v3  ;;  %v9751_v56 = vld [vmem:[#allocation11 + $0x53c] sm:$0xf]  ;;  %v9850_v41 = vld [vmem:[#allocation14 + $0x450] sm:$0xff] }
0x1251   :  { %v8489_v3 = vld [vmem:[#allocation11 + $0x578] sm:$0xf0]  ;;  %v9898_v14 = vld [vmem:[#allocation14 + $0x5d0] sm:$0xff] }
0x1252   :  { %5298 = vmatmul.bf16.vlgmr.msrb.gmra.mxu3 %v10948_v26  ;;  %5312 = vmatmul.bf16.vlgmr.msrb.gmra.mxu0 %v10948_v26 }
0x1253   :  { %5346 = vmatpush.bf16.msra.mxu3 %v8800_v57  ;;  %5360 = vmatpush.bf16.msra.mxu0 %v8804_v23  ;;  %v8480_v57 = vor.u32 %v9758_v48, %v8479_v47  ;;  %v8484_v23 = vor.u32 %v9750_v53, %v8481_v54  ;;  %v9866_v47 = vld [vmem:[#allocation14 + $0x4d0] sm:$0xff]  ;;  %v9849_v48 = vld [vmem:[#allocation14 + $0x448] sm:$0xff]  ;;  %v9848_v54 = vld [vmem:[#allocation14 + $0x440] sm:$0xff] }
0x1254   :  { %5374 = vmatpush.bf16.msrb.mxu1 %v8808_v35  ;;  %5388 = vmatpush.bf16.msrb.mxu2 %v8812_v25  ;;  %v8488_v35 = vor.u32 %v9759_v0, %v8487_v55  ;;  %v8492_v25 = vor.u32 %v9751_v56, %v8489_v3  ;;  %v9865_v53 = vld [vmem:[#allocation14 + $0x4c8] sm:$0xff]  ;;  %v9856_v55 = vld [vmem:[#allocation14 + $0x480] sm:$0xff]  ;;  %v9887_v0 = vld [vmem:[#allocation14 + $0x578] sm:$0xff] }
0x1255   :  { %5326 = vmatmul.bf16.vlgmr.msra.gmra.mxu1 %v10948_v26  ;;  %5340 = vmatmul.bf16.vlgmr.msra.gmra.mxu2 %v10948_v26  ;;  %v9895_v56 = vld [vmem:[#allocation14 + $0x5b8] sm:$0xff]  ;;  %v9840_v3 = vld [vmem:[#allocation14 + $0x400] sm:$0xff] }
0x1257   :  { %5347 = vmatpush.bf16.msra.mxu3 %v8736_v4  ;;  %5361 = vmatpush.bf16.msra.mxu0 %v8740_v5  ;;  %v8416_v4 = vor.u32 %v9742_v30, %v8415_v59  ;;  %v8420_v5 = vor.u32 %v9734_v46, %v8417_v37  ;;  %v9903_v59 = vld [vmem:[#allocation14 + $0x5f8] sm:$0xff]  ;;  %v9886_v30 = vld [vmem:[#allocation14 + $0x570] sm:$0xff]  ;;  %v9885_v37 = vld [vmem:[#allocation14 + $0x568] sm:$0xff] }
0x1258   :  { %5375 = vmatpush.bf16.msrb.mxu1 %v8744_v7  ;;  %5389 = vmatpush.bf16.msrb.mxu2 %v8748_v10  ;;  %v8424_v7 = vor.u32 %v9743_v62, %v8423_v61  ;;  %v8428_v10 = vor.u32 %v9735_v36, %v8425_v2  ;;  %v9902_v46 = vld [vmem:[#allocation14 + $0x5f0] sm:$0xff]  ;;  %v9893_v61 = vld [vmem:[#allocation14 + $0x5a8] sm:$0xff]  ;;  %v9884_v2 = vld [vmem:[#allocation14 + $0x560] sm:$0xff] }
0x1259   :  { %v9877_v62 = vld [vmem:[#allocation14 + $0x528] sm:$0xff] }
0x125a   :  { %v9901_v36 = vld [vmem:[#allocation14 + $0x5e8] sm:$0xff] }
0x125b   :  { %5348 = vmatpush.bf16.msra.mxu3 %v8672_v17  ;;  %5362 = vmatpush.bf16.msra.mxu0 %v8676_v18  ;;  %v8352_v17 = vor.u32 %v9726_v9, %v8351_v8  ;;  %v8356_v18 = vor.u32 %v9718_v58, %v8353_v51  ;;  %v9900_v8 = vld [vmem:[#allocation14 + $0x5e0] sm:$0xff]  ;;  %v9883_v9 = vld [vmem:[#allocation14 + $0x558] sm:$0xff]  ;;  %v9882_v51 = vld [vmem:[#allocation14 + $0x550] sm:$0xff] }
0x125c   :  { %5376 = vmatpush.bf16.msrb.mxu1 %v8680_v6  ;;  %5390 = vmatpush.bf16.msrb.mxu2 %v8684_v22  ;;  %v9855_v6 = vld [vmem:[#allocation14 + $0x478] sm:$0xff] }
0x125d   :  { %v9863_v22 = vld [vmem:[#allocation14 + $0x4b8] sm:$0xff] }
0x125e   :  { %v9899_v58 = vld [vmem:[#allocation14 + $0x5d8] sm:$0xff] }
0x125f   :  { %5349 = vmatpush.bf16.msra.mxu3 %v8608_v60  ;;  %5363 = vmatpush.bf16.msra.mxu0 %v8612_v45  ;;  %v9853_v60 = vld [vmem:[#allocation14 + $0x468] sm:$0xff] }
0x1260   :  { %5377 = vmatpush.bf16.msrb.mxu1 %v8616_v32  ;;  %5391 = vmatpush.bf16.msrb.mxu2 %v8620_v24  ;;  %v9861_v45 = vld [vmem:[#allocation14 + $0x4a8] sm:$0xff]  ;;  %v9852_v32 = vld [vmem:[#allocation14 + $0x460] sm:$0xff] }
0x1261   :  { %v9860_v24 = vld [vmem:[#allocation14 + $0x4a0] sm:$0xff] }
0x1263   :  { %5350 = vmatpush.bf16.msra.mxu3 %v8544_v42  ;;  %5364 = vmatpush.bf16.msra.mxu0 %v8548_v44  ;;  %v9858_v42 = vld [vmem:[#allocation14 + $0x490] sm:$0xff] }
0x1264   :  { %5378 = vmatpush.bf16.msrb.mxu1 %v8552_v49  ;;  %5392 = vmatpush.bf16.msrb.mxu2 %v8556_v52  ;;  %v9842_v44 = vld [vmem:[#allocation14 + $0x410] sm:$0xff]  ;;  %v9857_v49 = vld [vmem:[#allocation14 + $0x488] sm:$0xff] }
0x1265   :  { %v9841_v52 = vld [vmem:[#allocation14 + $0x408] sm:$0xff] }
0x1267   :  { %5351 = vmatpush.bf16.msra.mxu3 %v8480_v57  ;;  %5365 = vmatpush.bf16.msra.mxu0 %v8484_v23  ;;  %v9864_v57 = vld [vmem:[#allocation14 + $0x4c0] sm:$0xff]  ;;  %v9879_v23 = vld [vmem:[#allocation14 + $0x538] sm:$0xff] }
0x1268   :  { %5379 = vmatpush.bf16.msrb.mxu1 %v8488_v35  ;;  %5393 = vmatpush.bf16.msrb.mxu2 %v8492_v25  ;;  %v9894_v35 = vld [vmem:[#allocation14 + $0x5b0] sm:$0xff] }
0x1269   :  { %v9878_v25 = vld [vmem:[#allocation14 + $0x530] sm:$0xff] }
0x126b   :  { %5352 = vmatpush.bf16.msra.mxu3 %v8416_v4  ;;  %5366 = vmatpush.bf16.msra.mxu0 %v8420_v5  ;;  %v9892_v4 = vld [vmem:[#allocation14 + $0x5a0] sm:$0xff] }
0x126c   :  { %5380 = vmatpush.bf16.msrb.mxu1 %v8424_v7  ;;  %5394 = vmatpush.bf16.msrb.mxu2 %v8428_v10  ;;  %v9876_v5 = vld [vmem:[#allocation14 + $0x520] sm:$0xff]  ;;  %v9891_v7 = vld [vmem:[#allocation14 + $0x598] sm:$0xff] }
0x126d   :  { %v9875_v10 = vld [vmem:[#allocation14 + $0x518] sm:$0xff] }
0x126f   :  { %5353 = vmatpush.bf16.msra.mxu3 %v8352_v17  ;;  %5367 = vmatpush.bf16.msra.mxu0 %v8356_v18  ;;  %v9889_v17 = vld [vmem:[#allocation14 + $0x588] sm:$0xff] }
0x1270   :  { %5381 = vmatpush.bf16.msrb.mxu1 %v8360_v20  ;;  %5395 = vmatpush.bf16.msrb.mxu2 %v8364_v21  ;;  %v9873_v18 = vld [vmem:[#allocation14 + $0x508] sm:$0xff]  ;;  %v9880_v21 = vld [vmem:[#allocation14 + $0x540] sm:$0xff] }
0x1271   :  { %v9897_v20 = vld [vmem:[#allocation14 + $0x5c8] sm:$0xff] }
0x1272   :  { %5354 = vmatmul.bf16.vlgmr.msra.gmra.mxu3 %v10948_v26  ;;  %5368 = vmatmul.bf16.vlgmr.msra.gmra.mxu0 %v10948_v26 }
0x1273   :  { %6494 = vmatpush.bf16.msrb.mxu0 %v9855_v6  ;;  %5382 = vmatmul.bf16.vlgmr.msrb.gmra.mxu1 %v10948_v26  ;;  %v9888_v6 = vld [vmem:[#allocation14 + $0x580] sm:$0xff] }
0x1274   :  { %6508 = vmatpush.bf16.msra.mxu1 %v9863_v22  ;;  %5396 = vmatmul.bf16.vlgmr.msrb.gmra.mxu2 %v10948_v26  ;;  %v9868_v26 = vld [vmem:[#allocation14 + $0x4e0] sm:$0xff] }
0x1275   :  { %6480 = vmatpush.bf16.msrb.mxu3 %v9847_v33  ;;  %6522 = vmatpush.bf16.msra.mxu2 %v9871_v29  ;;  %v9872_v22 = vld [vmem:[#allocation14 + $0x500] sm:$0xff]  ;;  %v10966_v29 = vld [vmem:[#allocation13 + $0x10] sm:$0xff] }
0x1276   :  { %v9896_v33 = vld [vmem:[#allocation14 + $0x5c0] sm:$0xff] }
0x1277   :  { %6495 = vmatpush.bf16.msrb.mxu0 %v9854_v19 }
0x1278   :  { %6509 = vmatpush.bf16.msra.mxu1 %v9862_v50 }
0x1279   :  { %6481 = vmatpush.bf16.msrb.mxu3 %v9846_v27  ;;  %6523 = vmatpush.bf16.msra.mxu2 %v9870_v43  ;;  %v4507_v27 = vperm.slane %v10966_v29, 1  ;;  %v4508_v43 = vperm.slane %v10966_v29, 2 }
0x127b   :  { %6496 = vmatpush.bf16.msrb.mxu0 %v9853_v60 }
0x127c   :  { %6510 = vmatpush.bf16.msra.mxu1 %v9861_v45 }
0x127d   :  { %6482 = vmatpush.bf16.msrb.mxu3 %v9845_v1  ;;  %6524 = vmatpush.bf16.msra.mxu2 %v9869_v31 }
0x127f   :  { %6497 = vmatpush.bf16.msrb.mxu0 %v9852_v32 }
0x1280   :  { %6511 = vmatpush.bf16.msra.mxu1 %v9860_v24  ;;  %v4506_v24 = vperm.slane %v10966_v29, 0 }
0x1281   :  { %6483 = vmatpush.bf16.msrb.mxu3 %v9844_v28  ;;  %6525 = vmatpush.bf16.msra.mxu2 %v9868_v26 }
0x1283   :  { %6498 = vmatpush.bf16.msrb.mxu0 %v9851_v34  ;;  %v4509_v34 = vperm.slane %v10966_v29, 3 }
0x1284   :  { %6512 = vmatpush.bf16.msra.mxu1 %v9859_v39 }
0x1285   :  { %6484 = vmatpush.bf16.msrb.mxu3 %v9843_v40  ;;  %6526 = vmatpush.bf16.msra.mxu2 %v9867_v63 }
0x1287   :  { %6499 = vmatpush.bf16.msrb.mxu0 %v9850_v41 }
0x1288   :  { %6513 = vmatpush.bf16.msra.mxu1 %v9858_v42 }
0x1289   :  { %6485 = vmatpush.bf16.msrb.mxu3 %v9842_v44  ;;  %6527 = vmatpush.bf16.msra.mxu2 %v9866_v47  ;;  %v9919_v44 = vld [vmem:[#allocation14 + $0x678] sm:$0xff] }
0x128b   :  { %6500 = vmatpush.bf16.msrb.mxu0 %v9849_v48 }
0x128c   :  { %6514 = vmatpush.bf16.msra.mxu1 %v9857_v49  ;;  %v9927_v49 = vld [vmem:[#allocation14 + $0x6b8] sm:$0xff] }
0x128d   :  { %6486 = vmatpush.bf16.msrb.mxu3 %v9841_v52  ;;  %6528 = vmatpush.bf16.msra.mxu2 %v9865_v53 }
0x128f   :  { %6501 = vmatpush.bf16.msrb.mxu0 %v9848_v54 }
0x1290   :  { %6515 = vmatpush.bf16.msra.mxu1 %v9856_v55 }
0x1291   :  { %6487 = vmatpush.bf16.msrb.mxu3 %v9840_v3  ;;  %6529 = vmatpush.bf16.msra.mxu2 %v9864_v57  ;;  %v9918_v57 = vld [vmem:[#allocation14 + $0x670] sm:$0xff] }
0x1293   :  { %6550 = vmatpush.bf16.msra.mxu0 %v9887_v0 }
0x1294   :  { %6564 = vmatpush.bf16.msrb.mxu1 %v9895_v56 }
0x1295   :  { %6536 = vmatpush.bf16.msra.mxu3 %v9879_v23  ;;  %6578 = vmatpush.bf16.msrb.mxu2 %v9903_v59 }
0x1297   :  { %6551 = vmatpush.bf16.msra.mxu0 %v9886_v30 }
0x1298   :  { %6565 = vmatpush.bf16.msrb.mxu1 %v9894_v35  ;;  %v9926_v35 = vld [vmem:[#allocation14 + $0x6b0] sm:$0xff] }
0x1299   :  { %6537 = vmatpush.bf16.msra.mxu3 %v9878_v25  ;;  %6579 = vmatpush.bf16.msrb.mxu2 %v9902_v46 }
0x129b   :  { %6552 = vmatpush.bf16.msra.mxu0 %v9885_v37  ;;  %v9911_v37 = vld [vmem:[#allocation14 + $0x638] sm:$0xff] }
0x129c   :  { %6566 = vmatpush.bf16.msrb.mxu1 %v9893_v61 }
0x129d   :  { %6538 = vmatpush.bf16.msra.mxu3 %v9877_v62  ;;  %6580 = vmatpush.bf16.msrb.mxu2 %v9901_v36  ;;  %v4511_v62 = vperm.slane %v10966_v29, 5  ;;  %v9935_v36 = vld [vmem:[#allocation14 + $0x6f8] sm:$0xff] }
0x129f   :  { %6553 = vmatpush.bf16.msra.mxu0 %v9884_v2 }
0x12a0   :  { %6567 = vmatpush.bf16.msrb.mxu1 %v9892_v4  ;;  %v4512_v4 = vperm.slane %v10966_v29, 6 }
0x12a1   :  { %6539 = vmatpush.bf16.msra.mxu3 %v9876_v5  ;;  %6581 = vmatpush.bf16.msrb.mxu2 %v9900_v8  ;;  %v9917_v5 = vld [vmem:[#allocation14 + $0x668] sm:$0xff] }
0x12a2   :  { %v9925_v8 = vld [vmem:[#allocation14 + $0x6a8] sm:$0xff] }
0x12a3   :  { %6554 = vmatpush.bf16.msra.mxu0 %v9883_v9 }
0x12a4   :  { %6568 = vmatpush.bf16.msrb.mxu1 %v9891_v7  ;;  %v9910_v7 = vld [vmem:[#allocation14 + $0x630] sm:$0xff] }
0x12a5   :  { %6540 = vmatpush.bf16.msra.mxu3 %v9875_v10  ;;  %6582 = vmatpush.bf16.msrb.mxu2 %v9899_v58 }
0x12a7   :  { %6555 = vmatpush.bf16.msra.mxu0 %v9882_v51  ;;  %v9934_v51 = vld [vmem:[#allocation14 + $0x6f0] sm:$0xff] }
0x12a8   :  { %6569 = vmatpush.bf16.msrb.mxu1 %v9890_v11 }
0x12a9   :  { %6541 = vmatpush.bf16.msra.mxu3 %v9874_v13  ;;  %6583 = vmatpush.bf16.msrb.mxu2 %v9898_v14  ;;  %v9916_v14 = vld [vmem:[#allocation14 + $0x660] sm:$0xff] }
0x12ab   :  { %6556 = vmatpush.bf16.msra.mxu0 %v9881_v16  ;;  %v4510_v16 = vperm.slane %v10966_v29, 4 }
0x12ac   :  { %6570 = vmatpush.bf16.msrb.mxu1 %v9889_v17 }
0x12ad   :  { %6542 = vmatpush.bf16.msra.mxu3 %v9873_v18  ;;  %6584 = vmatpush.bf16.msrb.mxu2 %v9897_v20  ;;  %v9924_v20 = vld [vmem:[#allocation14 + $0x6a0] sm:$0xff] }
0x12ae   :  { %v5201_v19 = vpop.f32.mrf.mxu0 }
0x12af   :  { %6557 = vmatpush.bf16.msra.mxu0 %v9880_v21  ;;  %v5215_v50 = vpop.f32.mrf.mxu1  ;;  %v5202_v45 = vadd.f32 %v5201_v19, %v4507_v27  ;;  %v4513_v21 = vperm.slane %v10966_v29, 7  ;;  %v9908_v29 = vld [vmem:[#allocation14 + $0x620] sm:$0xff] }
0x12b0   :  { %6571 = vmatpush.bf16.msrb.mxu1 %v9888_v6  ;;  %v5216_v31 = vadd.f32 %v5215_v50, %v4508_v43  ;;  %v9933_v50 = vld [vmem:[#allocation14 + $0x6e8] sm:$0xff] }
0x12b1   :  { %6543 = vmatpush.bf16.msra.mxu3 %v9872_v22  ;;  %6585 = vmatpush.bf16.msrb.mxu2 %v9896_v33  ;;  %v5403_v40 = vmax.f32 %v5202_v45, 0.0  ;;  %v9909_v22 = vld [vmem:[#allocation14 + $0x628] sm:$0xff] }
0x12b2   :  { %v5404_v41 = vmax.f32 %v5216_v31, 0.0  ;;  %v9923_v31 = vld [vmem:[#allocation14 + $0x698] sm:$0xff] }
0x12b4   :  { %v5187_v60 = vpop.f32.mrf.mxu3 }
0x12b5   :  { %v5229_v1 = vpop.f32.mrf.mxu2  ;;  %v5188_v47 = vadd.f32 %v5187_v60, %v4506_v24  ;;  %v9915_v60 = vld [vmem:[#allocation14 + $0x658] sm:$0xff] }
0x12b6   :  { %v5203_v32 = vpop.f32.mrf.mxu0  ;;  %v5230_v52 = vadd.f32 %v5229_v1, %v4509_v34 }
0x12b7   :  { %v5204_v28 = vadd.f32 %v5203_v32, %v4507_v27  ;;  %v5217_v26 = vpop.f32.mrf.mxu1  ;;  %v5402_v23 = vmax.f32 %v5188_v47, 0.0 }
0x12b8   :  { %v5218_v39 = vadd.f32 %v5217_v26, %v4508_v43  ;;  %v5405_v25 = vmax.f32 %v5230_v52, 0.0 }
0x12b9   :  { %v5419_v63 = vmax.f32 %v5204_v28, 0.0 }
0x12ba   :  { %v5420_v42 = vmax.f32 %v5218_v39, 0.0  ;;  %v9932_v39 = vld [vmem:[#allocation14 + $0x6e0] sm:$0xff] }
0x12bb   :  { %v5435_v48 = vpack.c.bf16 %v5419_v63, %v5403_v40  ;;  %v9914_v63 = vld [vmem:[#allocation14 + $0x650] sm:$0xff] }
0x12bc   :  { %v5436_v53 = vpack.c.bf16 %v5420_v42, %v5404_v41  ;;  %v5189_v54 = vpop.f32.mrf.mxu3 }
0x12bd   :  { %v5190_v55 = vadd.f32 %v5189_v54, %v4506_v24  ;;  %v5231_v0 = vpop.f32.mrf.mxu2  ;;  %6502 = vmatmul.bf16.vlgmr.msrb.gmra.mxu0 %v5435_v48 }
0x12be   :  { %v5232_v56 = vadd.f32 %v5231_v0, %v4509_v34  ;;  %6516 = vmatmul.bf16.vlgmr.msra.gmra.mxu1 %v5436_v53  ;;  %6606 = vmatpush.bf16.msrb.mxu0 %v9919_v44  ;;  %v5257_v3 = vpop.f32.mrf.mxu0  ;;  %v9922_v44 = vld [vmem:[#allocation14 + $0x690] sm:$0xff]  ;;  %v9907_v53 = vld [vmem:[#allocation14 + $0x618] sm:$0xff] }
0x12bf   :  { %v5418_v59 = vmax.f32 %v5190_v55, 0.0  ;;  %6620 = vmatpush.bf16.msra.mxu1 %v9927_v49  ;;  %v5271_v30 = vpop.f32.mrf.mxu1  ;;  %v5258_v10 = vadd.f32 %v5257_v3, %v4511_v62  ;;  %v10976_v49 = vld [vmem:[#allocation13 + $0x18] sm:$0xff]  ;;  %v9913_v3 = vld [vmem:[#allocation14 + $0x648] sm:$0xff] }
0x12c0   :  { %v5421_v46 = vmax.f32 %v5232_v56, 0.0  ;;  %v5272_v11 = vadd.f32 %v5271_v30, %v4512_v4  ;;  %v9931_v0 = vld [vmem:[#allocation14 + $0x6d8] sm:$0xff]  ;;  %v9906_v30 = vld [vmem:[#allocation14 + $0x610] sm:$0xff] }
0x12c1   :  { %v5434_v61 = vpack.c.bf16 %v5418_v59, %v5402_v23  ;;  %v5407_v33 = vmax.f32 %v5258_v10, 0.0  ;;  %v9921_v23 = vld [vmem:[#allocation14 + $0x688] sm:$0xff]  ;;  %v4516_v59 = vperm.slane %v10976_v49, 2 }
0x12c2   :  { %v5437_v2 = vpack.c.bf16 %v5421_v46, %v5405_v25  ;;  %6607 = vmatpush.bf16.msrb.mxu0 %v9918_v57  ;;  %v5408_v27 = vmax.f32 %v5272_v11, 0.0  ;;  %v4515_v57 = vperm.slane %v10976_v49, 1  ;;  %v9912_v46 = vld [vmem:[#allocation14 + $0x640] sm:$0xff] }
0x12c3   :  { %6621 = vmatpush.bf16.msra.mxu1 %v9926_v35  ;;  %6488 = vmatmul.bf16.vlgmr.msrb.gmra.mxu3 %v5434_v61  ;;  %v9930_v35 = vld [vmem:[#allocation14 + $0x6d0] sm:$0xff] }
0x12c4   :  { %6530 = vmatmul.bf16.vlgmr.msra.gmra.mxu2 %v5437_v2  ;;  %6592 = vmatpush.bf16.msrb.mxu3 %v9911_v37  ;;  %v5243_v9 = vpop.f32.mrf.mxu3 }
0x12c5   :  { %6634 = vmatpush.bf16.msra.mxu2 %v9935_v36  ;;  %v5285_v58 = vpop.f32.mrf.mxu2  ;;  %v5244_v45 = vadd.f32 %v5243_v9, %v4510_v16  ;;  %v9951_v36 = vld [vmem:[#allocation14 + $0x778] sm:$0xff]  ;;  %v4514_v9 = vperm.slane %v10976_v49, 0 }
0x12c6   :  { %6608 = vmatpush.bf16.msrb.mxu0 %v9917_v5  ;;  %v5259_v13 = vpop.f32.mrf.mxu0  ;;  %v5286_v32 = vadd.f32 %v5285_v58, %v4513_v21  ;;  %v9959_v5 = vld [vmem:[#allocation14 + $0x7b8] sm:$0xff]  ;;  %v9929_v58 = vld [vmem:[#allocation14 + $0x6c8] sm:$0xff] }
0x12c7   :  { %6622 = vmatpush.bf16.msra.mxu1 %v9925_v8  ;;  %v5260_v17 = vadd.f32 %v5259_v13, %v4511_v62  ;;  %v5273_v18 = vpop.f32.mrf.mxu1  ;;  %v5406_v41 = vmax.f32 %v5244_v45, 0.0  ;;  %v9920_v62 = vld [vmem:[#allocation14 + $0x680] sm:$0xff]  ;;  %v9905_v8 = vld [vmem:[#allocation14 + $0x608] sm:$0xff] }
0x12c8   :  { %v5274_v6 = vadd.f32 %v5273_v18, %v4512_v4  ;;  %6593 = vmatpush.bf16.msrb.mxu3 %v9910_v7  ;;  %v5409_v47 = vmax.f32 %v5286_v32, 0.0  ;;  %v9950_v18 = vld [vmem:[#allocation14 + $0x770] sm:$0xff]  ;;  %v9949_v32 = vld [vmem:[#allocation14 + $0x768] sm:$0xff] }
0x12c9   :  { %v5423_v19 = vmax.f32 %v5260_v17, 0.0  ;;  %6635 = vmatpush.bf16.msra.mxu2 %v9934_v51  ;;  %v4517_v51 = vperm.slane %v10976_v49, 3 }
0x12ca   :  { %v5424_v43 = vmax.f32 %v5274_v6, 0.0  ;;  %6609 = vmatpush.bf16.msrb.mxu0 %v9916_v14  ;;  %v9958_v6 = vld [vmem:[#allocation14 + $0x7b0] sm:$0xff] }
0x12cb   :  { %v5439_v1 = vpack.c.bf16 %v5423_v19, %v5407_v33  ;;  %6623 = vmatpush.bf16.msra.mxu1 %v9924_v20 }
0x12cc   :  { %v5440_v24 = vpack.c.bf16 %v5424_v43, %v5408_v27  ;;  %6594 = vmatpush.bf16.msrb.mxu3 %v9909_v22  ;;  %v5245_v28 = vpop.f32.mrf.mxu3  ;;  %v9904_v22 = vld [vmem:[#allocation14 + $0x600] sm:$0xff]  ;;  %v9943_v43 = vld [vmem:[#allocation14 + $0x738] sm:$0xff] }
0x12cd   :  { %6636 = vmatpush.bf16.msra.mxu2 %v9933_v50  ;;  %v5246_v26 = vadd.f32 %v5245_v28, %v4510_v16  ;;  %v5287_v34 = vpop.f32.mrf.mxu2  ;;  %6558 = vmatmul.bf16.vlgmr.msra.gmra.mxu0 %v5439_v1  ;;  %v9928_v27 = vld [vmem:[#allocation14 + $0x6c0] sm:$0xff]  ;;  %v9967_v1 = vld [vmem:[#allocation14 + $0x7f8] sm:$0xff] }
0x12ce   :  { %v5288_v40 = vadd.f32 %v5287_v34, %v4513_v21  ;;  %6572 = vmatmul.bf16.vlgmr.msrb.gmra.mxu1 %v5440_v24  ;;  %6610 = vmatpush.bf16.msrb.mxu0 %v9915_v60 }
0x12cf   :  { %v5422_v42 = vmax.f32 %v5246_v26, 0.0  ;;  %6624 = vmatpush.bf16.msra.mxu1 %v9923_v31  ;;  %v5313_v52 = vpop.f32.mrf.mxu0 }
0x12d0   :  { %v5425_v48 = vmax.f32 %v5288_v40, 0.0  ;;  %6595 = vmatpush.bf16.msrb.mxu3 %v9908_v29  ;;  %v5314_v37 = vadd.f32 %v5313_v52, %v4515_v57  ;;  %v9957_v29 = vld [vmem:[#allocation14 + $0x7a8] sm:$0xff]  ;;  %v9947_v52 = vld [vmem:[#allocation14 + $0x758] sm:$0xff] }
0x12d1   :  { %v5438_v54 = vpack.c.bf16 %v5422_v42, %v5406_v41  ;;  %6637 = vmatpush.bf16.msra.mxu2 %v9932_v39  ;;  %v9942_v39 = vld [vmem:[#allocation14 + $0x730] sm:$0xff]  ;;  %v9948_v42 = vld [vmem:[#allocation14 + $0x760] sm:$0xff] }
0x12d2   :  { %v5327_v55 = vpop.f32.mrf.mxu1  ;;  %v5441_v56 = vpack.c.bf16 %v5425_v48, %v5409_v47  ;;  %6611 = vmatpush.bf16.msrb.mxu0 %v9914_v63  ;;  %v5411_v13 = vmax.f32 %v5314_v37, 0.0  ;;  %v9966_v63 = vld [vmem:[#allocation14 + $0x7f0] sm:$0xff]  ;;  %v9941_v47 = vld [vmem:[#allocation14 + $0x728] sm:$0xff] }
0x12d3   :  { %6625 = vmatpush.bf16.msra.mxu1 %v9922_v44  ;;  %6544 = vmatmul.bf16.vlgmr.msra.gmra.mxu3 %v5438_v54  ;;  %v5328_v2 = vadd.f32 %v5327_v55, %v4516_v59  ;;  %v9956_v44 = vld [vmem:[#allocation14 + $0x7a0] sm:$0xff]  ;;  %v9965_v48 = vld [vmem:[#allocation14 + $0x7e8] sm:$0xff]  ;;  %v9938_v37 = vld [vmem:[#allocation14 + $0x710] sm:$0xff] }
0x12d4   :  { %6586 = vmatmul.bf16.vlgmr.msrb.gmra.mxu2 %v5441_v56  ;;  %6596 = vmatpush.bf16.msrb.mxu3 %v9907_v53  ;;  %v9955_v53 = vld [vmem:[#allocation14 + $0x798] sm:$0xff]  ;;  %v9940_v54 = vld [vmem:[#allocation14 + $0x720] sm:$0xff] }
0x12d5   :  { %6638 = vmatpush.bf16.msra.mxu2 %v9931_v0  ;;  %v5299_v25 = vpop.f32.mrf.mxu3  ;;  %v5412_v16 = vmax.f32 %v5328_v2, 0.0  ;;  %v9964_v55 = vld [vmem:[#allocation14 + $0x7e0] sm:$0xff]  ;;  %v9946_v0 = vld [vmem:[#allocation14 + $0x750] sm:$0xff] }
0x12d6   :  { %6612 = vmatpush.bf16.msrb.mxu0 %v9913_v3  ;;  %v5300_v20 = vadd.f32 %v5299_v25, %v4514_v9  ;;  %v9954_v3 = vld [vmem:[#allocation14 + $0x790] sm:$0xff]  ;;  %v4520_v25 = vperm.slane %v10976_v49, 6 }
0x12d7   :  { %6626 = vmatpush.bf16.msra.mxu1 %v9921_v23  ;;  %v5315_v4 = vpop.f32.mrf.mxu0  ;;  %v9939_v23 = vld [vmem:[#allocation14 + $0x718] sm:$0xff] }
0x12d8   :  { %v5341_v61 = vpop.f32.mrf.mxu2  ;;  %6597 = vmatpush.bf16.msrb.mxu3 %v9906_v30  ;;  %v5316_v7 = vadd.f32 %v5315_v4, %v4515_v57  ;;  %v5410_v24 = vmax.f32 %v5300_v20, 0.0  ;;  %v4519_v30 = vperm.slane %v10976_v49, 5  ;;  %v9944_v4 = vld [vmem:[#allocation14 + $0x740] sm:$0xff] }
0x12d9   :  { %6639 = vmatpush.bf16.msra.mxu2 %v9930_v35  ;;  %v5342_v33 = vadd.f32 %v5341_v61, %v4517_v51  ;;  %v9945_v35 = vld [vmem:[#allocation14 + $0x748] sm:$0xff] }
0x12da   :  { %v5329_v10 = vpop.f32.mrf.mxu1  ;;  %6613 = vmatpush.bf16.msrb.mxu0 %v9912_v46  ;;  %v5427_v14 = vmax.f32 %v5316_v7, 0.0  ;;  %v9953_v46 = vld [vmem:[#allocation14 + $0x788] sm:$0xff]  ;;  %v4518_v7 = vperm.slane %v10976_v49, 4 }
0x12db   :  { %v5330_v11 = vadd.f32 %v5329_v10, %v4516_v59  ;;  %6627 = vmatpush.bf16.msra.mxu1 %v9920_v62  ;;  %v5413_v26 = vmax.f32 %v5342_v33, 0.0  ;;  %v9963_v59 = vld [vmem:[#allocation14 + $0x7d8] sm:$0xff]  ;;  %v9962_v62 = vld [vmem:[#allocation14 + $0x7d0] sm:$0xff] }
0x12dc   :  { %6598 = vmatpush.bf16.msrb.mxu3 %v9905_v8  ;;  %v5443_v21 = vpack.c.bf16 %v5427_v14, %v5411_v13  ;;  %v9961_v14 = vld [vmem:[#allocation14 + $0x7c8] sm:$0xff] }
0x12dd   :  { %v5428_v17 = vmax.f32 %v5330_v11, 0.0  ;;  %6640 = vmatpush.bf16.msra.mxu2 %v9929_v58  ;;  %v5301_v50 = vpop.f32.mrf.mxu3  ;;  %v4521_v11 = vperm.slane %v10976_v49, 7 }
0x12de   :  { %6662 = vmatpush.bf16.msra.mxu0 %v9951_v36  ;;  %v5302_v60 = vadd.f32 %v5301_v50, %v4514_v9  ;;  %v9952_v9 = vld [vmem:[#allocation14 + $0x780] sm:$0xff] }
0x12df   :  { %6676 = vmatpush.bf16.msrb.mxu1 %v9959_v5  ;;  %v5444_v19 = vpack.c.bf16 %v5428_v17, %v5412_v16  ;;  %6614 = vmatmul.bf16.vlgmr.msrb.gmra.mxu0 %v5443_v21 }
0x12e0   :  { %v5343_v45 = vpop.f32.mrf.mxu2  ;;  %v5426_v28 = vmax.f32 %v5302_v60, 0.0  ;;  %6599 = vmatpush.bf16.msrb.mxu3 %v9904_v22  ;;  %v9936_v22 = vld [vmem:[#allocation14 + $0x700] sm:$0xff] }
0x12e1   :  { %v5344_v31 = vadd.f32 %v5343_v45, %v4517_v51  ;;  %6628 = vmatmul.bf16.vlgmr.msra.gmra.mxu1 %v5444_v19  ;;  %6641 = vmatpush.bf16.msra.mxu2 %v9928_v27  ;;  %v9937_v51 = vld [vmem:[#allocation14 + $0x708] sm:$0xff]  ;;  %v9960_v27 = vld [vmem:[#allocation14 + $0x7c0] sm:$0xff] }
0x12e2   :  { %6663 = vmatpush.bf16.msra.mxu0 %v9950_v18  ;;  %v5442_v40 = vpack.c.bf16 %v5426_v28, %v5410_v24 }
0x12e3   :  { %6677 = vmatpush.bf16.msrb.mxu1 %v9958_v6  ;;  %v5429_v34 = vmax.f32 %v5344_v31, 0.0 }
0x12e4   :  { %6648 = vmatpush.bf16.msra.mxu3 %v9943_v43 }
0x12e5   :  { %6690 = vmatpush.bf16.msrb.mxu2 %v9967_v1  ;;  %v5445_v41 = vpack.c.bf16 %v5429_v34, %v5413_v26  ;;  %6600 = vmatmul.bf16.vlgmr.msrb.gmra.mxu3 %v5442_v40 }
0x12e6   :  { %6664 = vmatpush.bf16.msra.mxu0 %v9949_v32 }
0x12e7   :  { %6678 = vmatpush.bf16.msrb.mxu1 %v9957_v29  ;;  %6642 = vmatmul.bf16.vlgmr.msra.gmra.mxu2 %v5445_v41 }
0x12e8   :  { %6649 = vmatpush.bf16.msra.mxu3 %v9942_v39 }
0x12e9   :  { %6691 = vmatpush.bf16.msrb.mxu2 %v9966_v63 }
0x12ea   :  { %6665 = vmatpush.bf16.msra.mxu0 %v9948_v42  ;;  %v10019_v42 = vld [vmem:[%s11044_s10 + $0x1] ss:$0 sm:$0xff] }
0x12eb   :  { %6679 = vmatpush.bf16.msrb.mxu1 %v9956_v44 }
0x12ec   :  { %6650 = vmatpush.bf16.msra.mxu3 %v9941_v47 }
0x12ed   :  { %6692 = vmatpush.bf16.msrb.mxu2 %v9965_v48 }
0x12ee   :  { %6666 = vmatpush.bf16.msra.mxu0 %v9947_v52 }
0x12ef   :  { %v5369_v56 = vpop.f32.mrf.mxu0  ;;  %6680 = vmatpush.bf16.msrb.mxu1 %v9955_v53 }
0x12f0   :  { %v5383_v57 = vpop.f32.mrf.mxu1  ;;  %6651 = vmatpush.bf16.msra.mxu3 %v9940_v54  ;;  %v5370_v36 = vadd.f32 %v5369_v56, %v4519_v30 }
0x12f1   :  { %6693 = vmatpush.bf16.msrb.mxu2 %v9964_v55  ;;  %v5384_v5 = vadd.f32 %v5383_v57, %v4520_v25 }
0x12f2   :  { %6667 = vmatpush.bf16.msra.mxu0 %v9946_v0  ;;  %v5415_v16 = vmax.f32 %v5370_v36, 0.0 }
0x12f3   :  { %6681 = vmatpush.bf16.msrb.mxu1 %v9954_v3  ;;  %v5416_v18 = vmax.f32 %v5384_v5, 0.0 }
0x12f4   :  { %6652 = vmatpush.bf16.msra.mxu3 %v9939_v23 }
0x12f5   :  { %v5355_v61 = vpop.f32.mrf.mxu3  ;;  %6694 = vmatpush.bf16.msrb.mxu2 %v9963_v59 }
0x12f6   :  { %6668 = vmatpush.bf16.msra.mxu0 %v9945_v35  ;;  %v5356_v21 = vadd.f32 %v5355_v61, %v4518_v7 }
0x12f7   :  { %v5397_v2 = vpop.f32.mrf.mxu2  ;;  %v5371_v8 = vpop.f32.mrf.mxu0  ;;  %6682 = vmatpush.bf16.msrb.mxu1 %v9953_v46 }
0x12f8   :  { %v5372_v10 = vadd.f32 %v5371_v8, %v4519_v30  ;;  %v5385_v58 = vpop.f32.mrf.mxu1  ;;  %6653 = vmatpush.bf16.msra.mxu3 %v9938_v37  ;;  %v5398_v33 = vadd.f32 %v5397_v2, %v4521_v11  ;;  %v5414_v45 = vmax.f32 %v5356_v21, 0.0 }
0x12f9   :  { %v5386_v13 = vadd.f32 %v5385_v58, %v4520_v25  ;;  %6695 = vmatpush.bf16.msrb.mxu2 %v9962_v62 }
0x12fa   :  { %v5431_v17 = vmax.f32 %v5372_v10, 0.0  ;;  %6669 = vmatpush.bf16.msra.mxu0 %v9944_v4  ;;  %v5417_v31 = vmax.f32 %v5398_v33, 0.0 }
0x12fb   :  { %v5432_v20 = vmax.f32 %v5386_v13, 0.0  ;;  %6683 = vmatpush.bf16.msrb.mxu1 %v9952_v9 }
0x12fc   :  { %v5447_v6 = vpack.c.bf16 %v5431_v17, %v5415_v16  ;;  %6654 = vmatpush.bf16.msra.mxu3 %v9937_v51 }
0x12fd   :  { %v5448_v19 = vpack.c.bf16 %v5432_v20, %v5416_v18  ;;  %v5357_v50 = vpop.f32.mrf.mxu3  ;;  %6696 = vmatpush.bf16.msrb.mxu2 %v9961_v14 }
0x12fe   :  { %v5358_v43 = vadd.f32 %v5357_v50, %v4518_v7  ;;  %6670 = vmatmul.bf16.vlgmr.msra.gmra.mxu0 %v5447_v6 }
0x12ff   :  { %v5399_v49 = vpop.f32.mrf.mxu2  ;;  %6684 = vmatmul.bf16.vlgmr.msrb.gmra.mxu1 %v5448_v19 }
0x1300   :  { %v5400_v60 = vadd.f32 %v5399_v49, %v4521_v11  ;;  %v5430_v1 = vmax.f32 %v5358_v43, 0.0  ;;  %6655 = vmatpush.bf16.msra.mxu3 %v9936_v22 }
0x1301   :  { %6697 = vmatpush.bf16.msrb.mxu2 %v9960_v27 }
0x1302   :  { %v5433_v32 = vmax.f32 %v5400_v60, 0.0  ;;  %v5446_v24 = vpack.c.bf16 %v5430_v1, %v5414_v45 }
0x1304   :  { %v5449_v28 = vpack.c.bf16 %v5433_v32, %v5417_v31  ;;  %6656 = vmatmul.bf16.vlgmr.msra.gmra.mxu3 %v5446_v24 }
0x1306   :  { %6698 = vmatmul.bf16.vlgmr.msrb.gmra.mxu2 %v5449_v28 }
0x133a   :  { %v6503_v29 = vpop.f32.mrf.mxu0 }
0x133b   :  { %v6517_v34 = vpop.f32.mrf.mxu1 }
0x1342   :  { %v6505_v40 = vpop.f32.mrf.mxu0 }
0x1343   :  { %v6519_v41 = vpop.f32.mrf.mxu1 }
0x1346   :  { %v6489_v26 = vpop.f32.mrf.mxu3 }
0x1347   :  { %v6531_v39 = vpop.f32.mrf.mxu2  ;;  %v6490_v47 = vadd.f32 %v10019_v42, %v6489_v26 }
0x1349   :  { %v6504_v53 = vadd.f32 %v6503_v29, %v6490_v47 }
0x134a   :  { %v6559_v48 = vpop.f32.mrf.mxu0 }
0x134b   :  { %v6573_v54 = vpop.f32.mrf.mxu1  ;;  %v6518_v0 = vadd.f32 %v6517_v34, %v6504_v53 }
0x134d   :  { %v6532_v3 = vadd.f32 %v6531_v39, %v6518_v0 }
0x134e   :  { %v6491_v63 = vpop.f32.mrf.mxu3 }
0x134f   :  { %v6533_v44 = vpop.f32.mrf.mxu2  ;;  %v6492_v56 = vadd.f32 %v10019_v42, %v6491_v63 }
0x1351   :  { %v6506_v57 = vadd.f32 %v6505_v40, %v6492_v56 }
0x1352   :  { %v6561_v23 = vpop.f32.mrf.mxu0 }
0x1353   :  { %v6575_v35 = vpop.f32.mrf.mxu1  ;;  %v6520_v25 = vadd.f32 %v6519_v41, %v6506_v57 }
0x1355   :  { %v6534_v61 = vadd.f32 %v6533_v44, %v6520_v25 }
0x1356   :  { %v6545_v52 = vpop.f32.mrf.mxu3 }
0x1357   :  { %v6587_v55 = vpop.f32.mrf.mxu2  ;;  %v6546_v30 = vadd.f32 %v6545_v52, %v6532_v3 }
0x1359   :  { %v6560_v37 = vadd.f32 %v6559_v48, %v6546_v30 }
0x135b   :  { %v6574_v62 = vadd.f32 %v6573_v54, %v6560_v37 }
0x135c   :  { %v6615_v2 = vpop.f32.mrf.mxu0 }
0x135d   :  { %v6588_v8 = vadd.f32 %v6587_v55, %v6574_v62  ;;  %v10020_v62 = vld [vmem:[%s11045_s11 + $0x1] ss:$0 sm:$0xff] }
0x135e   :  { %v6547_v59 = vpop.f32.mrf.mxu3  ;;  %v6629_v5 = vpop.f32.mrf.mxu1 }
0x135f   :  { %v6589_v46 = vpop.f32.mrf.mxu2  ;;  %v6548_v36 = vadd.f32 %v6547_v59, %v6534_v61 }
0x1361   :  { %v6562_v9 = vadd.f32 %v6561_v23, %v6548_v36 }
0x1363   :  { %v6576_v58 = vadd.f32 %v6575_v35, %v6562_v9 }
0x1364   :  { %v6617_v11 = vpop.f32.mrf.mxu0 }
0x1365   :  { %v6590_v14 = vadd.f32 %v6589_v46, %v6576_v58 }
0x1366   :  { %v6631_v16 = vpop.f32.mrf.mxu1 }
0x1368   :  { %v6601_v4 = vpop.f32.mrf.mxu3 }
0x1369   :  { %v6602_v10 = vadd.f32 %v6601_v4, %v6588_v8  ;;  %v10021_v4 = vld [vmem:[%s11046_s12 + $0x1] ss:$0 sm:$0xff] }
0x136a   :  { %v6643_v7 = vpop.f32.mrf.mxu2 }
0x136b   :  { %v6616_v51 = vadd.f32 %v6615_v2, %v6602_v10 }
0x136d   :  { %v6630_v17 = vadd.f32 %v6629_v5, %v6616_v51 }
0x136f   :  { %v6644_v21 = vadd.f32 %v6643_v7, %v6630_v17 }
0x1370   :  { %v6603_v13 = vpop.f32.mrf.mxu3 }
0x1371   :  { %v6604_v18 = vadd.f32 %v6603_v13, %v6590_v14 }
0x1372   :  { %v6645_v20 = vpop.f32.mrf.mxu2 }
0x1373   :  { %v6618_v6 = vadd.f32 %v6617_v11, %v6604_v18 }
0x1375   :  { %v6632_v27 = vadd.f32 %v6631_v16, %v6618_v6  ;;  %v9386_v6 = vld [vmem:[#allocation17 + $0x70] sm:$0xf] }
0x1377   :  { %v6646_v45 = vadd.f32 %v6645_v20, %v6632_v27 }
0x137b   :  { %v6671_v22 = vpop.f32.mrf.mxu0 }
0x137c   :  { %v6685_v50 = vpop.f32.mrf.mxu1 }
0x1383   :  { %v6673_v28 = vpop.f32.mrf.mxu0 }
0x1384   :  { %v6687_v34 = vpop.f32.mrf.mxu1 }
0x1387   :  { %v6657_v33 = vpop.f32.mrf.mxu3 }
0x1388   :  { %v6658_v19 = vadd.f32 %v6657_v33, %v6644_v21  ;;  %v9982_v33 = vld [vmem:[#allocation17 + $0x74] sm:$0xf] }
0x1389   :  { %v6699_v49 = vpop.f32.mrf.mxu2 }
0x138a   :  { %v6672_v43 = vadd.f32 %v6671_v22, %v6658_v19  ;;  %v9983_v22 = vld [vmem:[#allocation17 + $0x74] sm:$0xf0] }
0x138b   :  { %v9387_v19 = vor.u32 %v9983_v22, %v9386_v6 }
0x138c   :  { %v6686_v60 = vadd.f32 %v6685_v50, %v6672_v43  ;;  %v9388_v50 = vld [vmem:[#allocation17 + $0x78] sm:$0xf0]  ;;  %v9378_v43 = vld [vmem:[#allocation17 + $0x60] sm:$0xf] }
0x138d   :  { %v9391_v27 = vor.u32 %v9982_v33, %v9388_v50  ;;  %6923 = vmatpush.bf16.msrb.mxu3 %v9387_v19 }
0x138e   :  { %v6700_v1 = vadd.f32 %v6699_v49, %v6686_v60  ;;  %v9981_v49 = vld [vmem:[#allocation17 + $0x64] sm:$0xf0]  ;;  %v9980_v60 = vld [vmem:[#allocation17 + $0x64] sm:$0xf] }
0x138f   :  { %v6659_v31 = vpop.f32.mrf.mxu3  ;;  %6937 = vmatpush.bf16.msrb.mxu0 %v9391_v27 }
0x1390   :  { %v6704_v32 = vadd.f32 %v6700_v1, %v10942_v12  ;;  %v6660_v24 = vadd.f32 %v6659_v31, %v6646_v45  ;;  %v9379_v45 = vor.u32 %v9981_v49, %v9378_v43  ;;  %v9380_v1 = vld [vmem:[#allocation17 + $0x68] sm:$0xf0] }
0x1391   :  { %v6701_v40 = vpop.f32.mrf.mxu2  ;;  %v9383_v31 = vor.u32 %v9980_v60, %v9380_v1 }
0x1392   :  { %v6674_v29 = vadd.f32 %v6673_v28, %v6660_v24  ;;  %6710 = vadd.xlane.f32.xlu0 %v6704_v32  ;;  %v6716_v26 = vmul.f32 %v6704_v32, %v6704_v32  ;;  %6924 = vmatpush.bf16.msrb.mxu3 %v9379_v45  ;;  %v9979_v24 = vld [vmem:[#allocation17 + $0x54] sm:$0xf0]  ;;  %v9978_v28 = vld [vmem:[#allocation17 + $0x54] sm:$0xf] }
0x1393   :  { %6938 = vmatpush.bf16.msrb.mxu0 %v9383_v31 }
0x1394   :  { %v6688_v39 = vadd.f32 %v6687_v34, %v6674_v29  ;;  %6718 = vadd.xlane.f32.xlu2 %v6716_v26  ;;  %v9372_v26 = vld [vmem:[#allocation17 + $0x58] sm:$0xf0] }
0x1395   :  { %v9375_v34 = vor.u32 %v9978_v28, %v9372_v26 }
0x1396   :  { %v6702_v63 = vadd.f32 %v6701_v40, %v6688_v39  ;;  %v9362_v39 = vld [vmem:[#allocation17 + $0x40] sm:$0xf]  ;;  %v9977_v40 = vld [vmem:[#allocation17 + $0x44] sm:$0xf0] }
0x1397   :  { %6939 = vmatpush.bf16.msrb.mxu0 %v9375_v34 }
0x1398   :  { %v6705_v41 = vadd.f32 %v6702_v63, %v10944_v38  ;;  %v9976_v63 = vld [vmem:[#allocation17 + $0x44] sm:$0xf] }
0x139a   :  { %6712 = vadd.xlane.f32.xlu0 %v6705_v41  ;;  %v6717_v42 = vmul.f32 %v6705_v41, %v6705_v41 }
0x13a2   :  { %6720 = vadd.xlane.f32.xlu0 %v6717_v42  ;;  %v9364_v42 = vld [vmem:[#allocation17 + $0x48] sm:$0xf0] }
0x1405   :  { %v6711_v44 = vpop.xlane.xlu0 %6710 }
0x1406   :  { %v6714_v47 = vmul.f32 %v6711_v44, %v10701_v15  ;;  %v9367_v44 = vor.u32 %v9976_v63, %v9364_v42  ;;  %v10023_v63 = vld [vmem:[%s11048_s14] ss:$0 sm:$0xff]  ;;  %s10413_s14 = smov [#allocation19]  }
0x1407   :  { %v6719_v48 = vpop.xlane.xlu2 %6718  ;;  %s6959_s13 = sshll.u32 %s10413_s14, 4  ;;  %s6960_s13 = int_to_ptr.vmem [resolvable:$true] %s6959_s13 }
0x1408   :  { %v6724_v12 = vmul.f32 %v6714_v47, %v6714_v47  ;;  %v6722_v52 = vmul.f32 %v6719_v48, %v10701_v15  ;;  %v6728_v61 = vsub.f32 %v6704_v32, %v6714_v47  ;;  %v9370_v32 = vld [vmem:[#allocation17 + $0x50] sm:$0xf]  ;;  %6940 = vmatpush.bf16.msrb.mxu0 %v9367_v44 }
0x1409   :  { %v9371_v29 = vor.u32 %v9979_v24, %v9370_v32  ;;  %v9354_v48 = vld [vmem:[#allocation17 + $0x30] sm:$0xf] }
0x140a   :  { %v6726_v53 = vsub.f32 %v6722_v52, %v6724_v12  ;;  %v9975_v12 = vld [vmem:[#allocation17 + $0x34] sm:$0xf0]  ;;  %v9974_v52 = vld [vmem:[#allocation17 + $0x34] sm:$0xf] }
0x140b   :  { %6925 = vmatpush.bf16.msrb.mxu3 %v9371_v29 }
0x140c   :  { %v6730_v54 = vadd.f32 1e-05, %v6726_v53 }
0x140d   :  { %v6713_v55 = vpop.xlane.xlu0 %6712 }
0x140e   :  { %10102 = vrsqrt.f32 %v6730_v54  ;;  %v6715_v0 = vmul.f32 %v6713_v55, %v10701_v15  ;;  %vm6738_vm7 = vweird.f32 %v6730_v54  ;;  %v9356_v55 = vld [vmem:[#allocation17 + $0x38] sm:$0xf0] }
0x1410   :  { %v6725_v38 = vmul.f32 %v6715_v0, %v6715_v0  ;;  %v6729_v14 = vsub.f32 %v6705_v41, %v6715_v0  ;;  %v9363_v41 = vor.u32 %v9977_v40, %v9362_v39 }
0x1412   :  { %6926 = vmatpush.bf16.msrb.mxu3 %v9363_v41 }
0x1414   :  { %v10103_v56 = vpop.eup %10102 }
0x1415   :  { %v6733_v3 = vmul.f32 %v10103_v56, %v6730_v54  ;;  %v6721_v57 = vpop.xlane.xlu0 %6720  ;;  %vm6739_vm6 = vweird.f32 %v10103_v56  ;;  %v9355_v54 = vor.u32 %v9975_v12, %v9354_v48 }
0x1416   :  { %v6723_v23 = vmul.f32 %v6721_v57, %v10701_v15  ;;  %vm6740_vm8 = vmor %vm6738_vm7, %vm6739_vm6 }
0x1417   :  { %v6734_v59 = vmul.f32 %v10103_v56, %v6733_v3  ;;  %6927 = vmatpush.bf16.msrb.mxu3 %v9355_v54 }
0x1418   :  { %v6727_v30 = vsub.f32 %v6723_v23, %v6725_v38  ;;  %v9346_v38 = vld [vmem:[#allocation17 + $0x20] sm:$0xf]  ;;  %v9973_v23 = vld [vmem:[#allocation17 + $0x24] sm:$0xf0] }
0x1419   :  { %v6735_v35 = vmul.f32 0.5, %v6734_v59  ;;  %v9972_v59 = vld [vmem:[#allocation17 + $0x24] sm:$0xf] }
0x141a   :  { %v6731_v25 = vadd.f32 1e-05, %v6727_v30 }
0x141b   :  { %v6736_v46 = vsub.f32 1.5, %v6735_v35  ;;  %v9347_v35 = vor.u32 %v9973_v23, %v9346_v38 }
0x141c   :  { %10104 = vrsqrt.f32 %v6731_v25  ;;  %vm6748_vm10 = vweird.f32 %v6731_v25 }
0x141d   :  { %v6737_v37 = vmul.f32 %v10103_v56, %v6736_v46  ;;  %6928 = vmatpush.bf16.msrb.mxu3 %v9347_v35 }
0x141f   :  { %v6741_v36 = vsel %vm6740_vm8, %v10103_v56, %v6737_v37  ;;  %v9359_v56 = vor.u32 %v9974_v52, %v9356_v55 }
0x1420   :  { %v6752_v2 = vmul.f32 %v6741_v36, %v6728_v61  ;;  %v9338_v61 = vld [vmem:[#allocation17 + $0x10] sm:$0xf]  ;;  %v9970_v36 = vld [vmem:[#allocation17 + $0x14] sm:$0xf] }
0x1421   :  { %6941 = vmatpush.bf16.msrb.mxu0 %v9359_v56 }
0x1422   :  { %v10105_v5 = vpop.eup %10104  ;;  %v6757_v8 = vmul.f32 %v10020_v62, %v6752_v2 }
0x1423   :  { %v6743_v9 = vmul.f32 %v10105_v5, %v6731_v25  ;;  %vm6749_vm9 = vweird.f32 %v10105_v5  ;;  %v9348_v25 = vld [vmem:[#allocation17 + $0x28] sm:$0xf0] }
0x1424   :  { %v11001_v7 = vadd.f32 %v10021_v4, %v6757_v8  ;;  %vm6750_vm11 = vmor %vm6748_vm10, %vm6749_vm9  ;;  %v9351_v46 = vor.u32 %v9972_v59, %v9348_v25  ;;  %v9330_v8 = vld [vmem:[#allocation17] sm:$0xf] }
0x1425   :  { %v6744_v10 = vmul.f32 %v10105_v5, %v6743_v9  ;;  %v9969_v9 = vld [vmem:[#allocation17 + $0x4] sm:$0xf0] }
0x1426   :  { %6766 = vadd.xlane.f32.xlu2 %v11001_v7  ;;  %v6772_v58 = vmul.f32 %v11001_v7, %v11001_v7  ;;  %6942 = vmatpush.bf16.msrb.mxu0 %v9351_v46 }
0x1427   :  { %v6745_v51 = vmul.f32 0.5, %v6744_v10  ;;  %v9968_v10 = vld [vmem:[#allocation17 + $0x4] sm:$0xf] }
0x1428   :  { %6774 = vadd.xlane.f32.xlu1 %v6772_v58  ;;  %v9331_v58 = vor.u32 %v9969_v9, %v9330_v8 }
0x1429   :  { %v6746_v11 = vsub.f32 1.5, %v6745_v51  ;;  %v9332_v51 = vld [vmem:[#allocation17 + $0x8] sm:$0xf0] }
0x142b   :  { %v6747_v13 = vmul.f32 %v10105_v5, %v6746_v11  ;;  %v9335_v11 = vor.u32 %v9968_v10, %v9332_v51 }
0x142d   :  { %v6751_v16 = vsel %vm6750_vm11, %v10105_v5, %v6747_v13 }
0x142e   :  { %v6753_v17 = vmul.f32 %v6751_v16, %v6729_v14 }
0x1430   :  { %v6758_v18 = vmul.f32 %v10020_v62, %v6753_v17  ;;  %v9971_v62 = vld [vmem:[#allocation17 + $0x14] sm:$0xf0] }
0x1431   :  { %v9339_v2 = vor.u32 %v9971_v62, %v9338_v61 }
0x1432   :  { %v11006_v20 = vadd.f32 %v10021_v4, %v6758_v18  ;;  %v9340_v4 = vld [vmem:[#allocation17 + $0x18] sm:$0xf0] }
0x1433   :  { %v9343_v5 = vor.u32 %v9970_v36, %v9340_v4  ;;  %6929 = vmatpush.bf16.msrb.mxu3 %v9339_v2 }
0x1434   :  { %6768 = vadd.xlane.f32.xlu0 %v11006_v20  ;;  %v6773_v21 = vmul.f32 %v11006_v20, %v11006_v20 }
0x1435   :  { %6943 = vmatpush.bf16.msrb.mxu0 %v9343_v5 }
0x1436   :  { %6776 = vadd.xlane.f32.xlu2 %v6773_v21 }
0x1437   :  { %6930 = vmatpush.bf16.msrb.mxu3 %v9331_v58 }
0x1439   :  { %6944 = vmatpush.bf16.msrb.mxu0 %v9335_v11 }
0x1499   :  { %v6767_v47 = vpop.xlane.xlu2 %6766 }
0x149a   :  { %v11012_v53 = vmul.f32 %v6767_v47, %v10701_v15  ;;  %v6837_v47 = vld [vmem:[%s11050_s16] sm:$0x3] }
0x149b   :  { %v6775_v0 = vpop.xlane.xlu1 %6774  ;;  %v6840_v48 = vperm.slane %v6837_v47, 1  ;;  %v6839_v52 = vperm.slane %v6837_v47, 0 }
0x149c   :  { %v6780_v3 = vmul.f32 %v11012_v53, %v11012_v53  ;;  %v6778_v57 = vmul.f32 %v6775_v0, %v10701_v15  ;;  %v6784_v32 = vsub.f32 %v11001_v7, %v11012_v53 }
0x149e   :  { %v6782_v30 = vsub.f32 %v6778_v57, %v6780_v3 }
0x14a0   :  { %v6786_v37 = vadd.f32 1e-05, %v6782_v30 }
0x14a2   :  { %10106 = vrsqrt.f32 %v6786_v37  ;;  %vm6794_vm13 = vweird.f32 %v6786_v37 }
0x14a7   :  { %v6769_v13 = vpop.xlane.xlu0 %6768 }
0x14a8   :  { %v10107_v14 = vpop.eup %10106  ;;  %v6771_v16 = vmul.f32 %v6769_v13, %v10701_v15 }
0x14a9   :  { %v6789_v17 = vmul.f32 %v10107_v14, %v6786_v37  ;;  %v6777_v18 = vpop.xlane.xlu2 %6776  ;;  %vm6795_vm12 = vweird.f32 %v10107_v14 }
0x14aa   :  { %v6781_v21 = vmul.f32 %v6771_v16, %v6771_v16  ;;  %v6779_v6 = vmul.f32 %v6777_v18, %v10701_v15  ;;  %vm6796_vm14 = vmor %vm6794_vm13, %vm6795_vm12  ;;  %v10022_v15 = vld [vmem:[#allocation16] ss:$0 sm:$0xff]  ;;  %v6785_v26 = vsub.f32 %v11006_v20, %v6771_v16 }
0x14ab   :  { %v6790_v22 = vmul.f32 %v10107_v14, %v6789_v17 }
0x14ac   :  { %v6783_v33 = vsub.f32 %v6779_v6, %v6781_v21 }
0x14ad   :  { %v6791_v50 = vmul.f32 0.5, %v6790_v22 }
0x14ae   :  { %v6787_v19 = vadd.f32 1e-05, %v6783_v33 }
0x14af   :  { %v6792_v27 = vsub.f32 1.5, %v6791_v50 }
0x14b0   :  { %10108 = vrsqrt.f32 %v6787_v19  ;;  %vm6804_vm0 = vweird.f32 %v6787_v19 }
0x14b1   :  { %v6793_v49 = vmul.f32 %v10107_v14, %v6792_v27 }
0x14b3   :  { %v6797_v1 = vsel %vm6796_vm14, %v10107_v14, %v6793_v49 }
0x14b4   :  { %v6808_v28 = vmul.f32 %v6797_v1, %v6784_v32 }
0x14b6   :  { %v10109_v43 = vpop.eup %10108  ;;  %v6813_v39 = vmul.f32 %v10022_v15, %v6808_v28 }
0x14b7   :  { %v6799_v60 = vmul.f32 %v10109_v43, %v6787_v19  ;;  %vm6805_vm15 = vweird.f32 %v10109_v43 }
0x14b8   :  { %vm6806_vm1 = vmor %vm6804_vm0, %vm6805_vm15  ;;  %v6818_v42 = vadd.f32 %v10023_v63, %v6813_v39 }
0x14b9   :  { %v6800_v45 = vmul.f32 %v10109_v43, %v6799_v60 }
0x14bb   :  { %v6801_v31 = vmul.f32 0.5, %v6800_v45 }
0x14bd   :  { %v6802_v24 = vsub.f32 1.5, %v6801_v31 }
0x14bf   :  { %v6803_v29 = vmul.f32 %v10109_v43, %v6802_v24 }
0x14c1   :  { %v6807_v34 = vsel %vm6806_vm1, %v10109_v43, %v6803_v29 }
0x14c2   :  { %v6809_v40 = vmul.f32 %v6807_v34, %v6785_v26 }
0x14c4   :  { %v6814_v41 = vmul.f32 %v10022_v15, %v6809_v40 }
0x14c6   :  { %v6819_v44 = vadd.f32 %v10023_v63, %v6814_v41 }
0x14c8   :  { %v6820_v7 = vpack.c.bf16 %v6819_v44, %v6818_v42 }
0x14ca   :  { %6931 = vmatmul.bf16.vlgmr.msrb.gmra.mxu3 %v6820_v7  ;;  %6945 = vmatmul.bf16.vlgmr.msrb.gmra.mxu0 %v6820_v7 }
0x1547   :  { %v6946_v20 = vpop.f32.mrf.mxu0 }
0x1548   :  { %v6947_v12 = vadd.f32 %v6946_v20, %v6840_v48 }
0x154a   :  { %6952 = vst [vmem:[#allocation19 + $0x8] sm:$0xff] %v6947_v12 }
0x154d   :  { %v6932_v53 = vpop.f32.mrf.mxu3 }
0x154e   :  { %v6933_v54 = vadd.f32 %v6932_v53, %v6839_v52 }
0x154f   :  { %v6948_v55 = vpop.f32.mrf.mxu0 }
0x1550   :  { %6951 = vst [vmem:[#allocation19] sm:$0xff] %v6933_v54  ;;  %v6949_v0 = vadd.f32 %v6948_v55, %v6840_v48 }
0x1552   :  { %6954 = vst [vmem:[#allocation19 + $0x18] sm:$0xff] %v6949_v0 }
0x1555   :  { %v6934_v56 = vpop.f32.mrf.mxu3 }
0x1556   :  { %v6935_v3 = vadd.f32 %v6934_v56, %v6839_v52 }
0x1558   :  { %6953 = vst [vmem:[#allocation19 + $0x10] sm:$0xff] %v6935_v3 }
0x1559   :  { %6967 = dma.vmem_to_hbm [thread:$0]  %s6960_s13, 512, %s6962_s28, [#allocation4], %s10407_s6, %s10407_s6, %s10404_s24  }
0x155a   :  { %10386 = dma.done.wait [#allocation4], 512  }
0x155b   :  { %10387 = vsyncadd [#allocation4], 4294966784 }
0x155c   :  { %6972 = vsyncpa [#allocation3], 1 }
0x155d   :  { %6973 = vsyncpa [#allocation6], 1 }
0x155e   :  { %6974 = vsyncpa [#allocation9], 1 }
0x155f   :  { %6975 = vsyncpa [#allocation12], 1 }
0x1560   :  { %6976 = vsyncpa [#allocation15], 1 }
0x1561   :  { %6977 = vsyncpa [#allocation18], 1 }
0x1562   :  { %6978 = vsyncpa [#allocation4], 1 }

</bundles_post_ra>
